<compile_context>
chip_gen: v6e
topology: v6e:2x2x1
jax: 0.10.0
libtpu: 0.0.40
codegen_flags: <defaults>
</compile_context>

<pallas_src>
import functools

import jax
import jax.numpy as jnp
import numpy as np
from jax.experimental import pallas as pl
from jax.experimental.pallas import tpu as pltpu


def _attn_pool_kernel(x_ref, posx_ref, pos0_ref, qwt_ref, kvwt_ref,
                      qb_ref, kvb_ref, dkv_ref, cwt_ref, cb_ref,
                      hsel_ref, hselT_ref, o_ref,
                      *, num_heads, scale, approx_recip):
    # x_ref:     (TB, HW, C)  one tile of batch elements (lane-dense layout)
    # posx_ref:  (HW, C)      spatial positional embedding, compute dtype
    # pos0_ref:  (1, C) f32   mean-token positional embedding
    # qwt_ref:   (C, C)       pre-transposed q weight (x @ w^T)
    # kvwt_ref:  (C, 2C)      fused pre-transposed [k|v] weight
    # qb/kvb:    (1,C)/(1,2C) f32 biases
    # dkv_ref:   (1, 2C) f32  (pos0 - mean(posx)) @ [kw|vw]^T  (k0/v0 folding)
    # cwt_ref:   (C, O_pad)   pre-transposed, lane-padded output projection
    # cb_ref:    (1, O_pad) f32
    # hsel:      (C, nh)      one-hot head membership; hselT: (nh, C)
    # o_ref:     (TB, O_pad)
    TB, HW, C = x_ref.shape
    f32 = jnp.float32
    cdt = x_ref.dtype                      # MXU operand dtype (f32 or bf16)

    x = x_ref[...]                                               # (TB, HW, C)
    # Positional add stays in the compute dtype (no full-tile up/down casts);
    # only the mean-token reduction takes an f32 upcast pass.
    tokx = x + posx_ref[...][None, :, :]                         # (TB, HW, C)
    tokx2 = tokx.reshape(TB * HW, C)

    mean_tok = jnp.mean(x.astype(f32), axis=1)                   # (TB, C) f32
    tok0 = (mean_tok + pos0_ref[...]).astype(cdt)                # (TB, C)

    # Fused K/V projection of the HW spatial tokens: one long MXU stream.
    kvx = (jnp.dot(tokx2, kvwt_ref[...], preferred_element_type=f32)
           + kvb_ref[...])                                       # (TB*HW, 2C) f32
    kvx = kvx.reshape(TB, HW, 2 * C)
    # k0/v0 folded out of dedicated matmuls: mean over the spatial kx/vx rows
    # already contains the bias; add the precomputed pos-delta row only.
    kv0 = jnp.mean(kvx, axis=1) + dkv_ref[...]                   # (TB, 2C) f32
    k0, v0 = kv0[:, :C], kv0[:, C:]
    kx, vx = kvx[:, :, :C], kvx[:, :, C:]

    # Only token 0's output is returned, so only its query is needed.
    q0 = (jnp.dot(tok0, qwt_ref[...], preferred_element_type=f32)
          + qb_ref[...])                                         # (TB, C) f32
    q0s = q0 * scale

    # Per-head scores via one-hot head-selection matmuls (no lane-dim slices of
    # width head_dim); operands in the compute dtype, accumulation in f32.
    hsel = hsel_ref[...]                                         # (C, nh)
    s0 = jnp.dot((q0s * k0).astype(cdt), hsel,
                 preferred_element_type=f32)                     # (TB, nh)
    qk = (q0s[:, None, :] * kx).reshape(TB * HW, C)
    sx = jnp.dot(qk.astype(cdt), hsel,
                 preferred_element_type=f32).reshape(TB, HW, num_heads)

    # Softmax over the L = HW + 1 keys per (batch, head); stats in f32.
    m = jnp.maximum(s0, jnp.max(sx, axis=1))                     # (TB, nh)
    e0 = jnp.exp(s0 - m)                                         # (TB, nh)
    ex = jnp.exp(sx - m[:, None, :])                             # (TB, HW, nh)
    denom = e0 + jnp.sum(ex, axis=1)                             # (TB, nh)
    # approx=True -> EUP vrcp (free slot); keep exact reciprocal on the f32 path.
    inv = pl.reciprocal(denom, approx=approx_recip)              # (TB, nh)

    # Broadcast per-head probabilities back to lane width C and combine with v.
    hselT = hselT_ref[...]                                       # (nh, C)
    p0 = jnp.dot((e0 * inv).astype(cdt), hselT,
                 preferred_element_type=f32)                     # (TB, C)
    px = jnp.dot((ex * inv[:, None, :]).reshape(TB * HW, num_heads).astype(cdt),
                 hselT, preferred_element_type=f32)              # (TB*HW, C)
    attn = p0 * v0 + jnp.sum(px.reshape(TB, HW, C) * vx, axis=1)  # (TB, C) f32

    # Output projection for token 0 only (O padded to a multiple of 128).
    y = (jnp.dot(attn.astype(cdt), cwt_ref[...], preferred_element_type=f32)
         + cb_ref[...])                                          # (TB, O_pad)
    o_ref[...] = y.astype(o_ref.dtype)


def _round_up(x, m):
    return ((x + m - 1) // m) * m


def _vmem_capacity_bytes():
    try:
        return int(pltpu.get_tpu_info().vmem_capacity_bytes)
    except Exception:
        return None


def attention_pool2d(x, params, num_heads, *, batch_tile=None, compute_dtype=None,
                     approx_softmax_recip=False, channels_last=False,
                     vmem_limit_bytes=None):
    """CLIP AttentionPool2d forward.

    x: (N, C, H, W) NCHW (default) or (N, HW, C) if channels_last=True (a
       producer-fused layout that skips the wrapper permute pass).
    Returns (N, output_dim) float32 (== token 0 of the attention output).
    """
    if channels_last:
        N, HW, C = x.shape
    else:
        N, C, H, W = x.shape
        HW = H * W
    O = params["cw"].shape[0]
    assert C % num_heads == 0, "embed_dim must be divisible by num_heads"
    hd = C // num_heads

    vmem_cap = _vmem_capacity_bytes()
    if compute_dtype is None:
        # v7x-class parts (64 MiB VMEM / TensorCore) default to bf16 operands so
        # CLIP-scale resident weights fit; v5e/v6e (128 MiB) keep f32.
        small_vmem = vmem_cap is not None and vmem_cap <= 96 * 1024 * 1024
        compute_dtype = jnp.bfloat16 if small_vmem else jnp.float32
    cdt = jnp.dtype(compute_dtype)
    is_bf16 = cdt == jnp.dtype(jnp.bfloat16)

    if batch_tile is None:
        # Review guidance: TB ~64 on v5e/v6e (f32), ~32 on v7x (bf16).
        batch_tile = 32 if is_bf16 else 64
    # Multiple of 16 keeps TB*HW aligned to the bf16 sublane pack even for odd
    # HW (e.g. 49); clamp so tiny batches do not over-pad.  (On v7x prefer a TB
    # that keeps n_tiles >= 2 per chip so both TensorCores get work.)
    TB = min(_round_up(int(batch_tile), 16), _round_up(max(N, 1), 16))
    n_tiles = pl.cdiv(N, TB)
    N_pad = n_tiles * TB

    # Layout glue.  For NCHW this is one XLA permute pass; fuse it into the
    # producer and call with channels_last=True to avoid the extra HBM round
    # trip.  TODO(synk): NCHW path still pays the permute outside the kernel.
    if channels_last:
        x_seq = x.astype(cdt)
    else:
        x_seq = jnp.transpose(x.reshape(N, C, HW), (0, 2, 1)).astype(cdt)
    if N_pad != N:
        x_seq = jnp.pad(x_seq, ((0, N_pad - N), (0, 0), (0, 0)))

    pos = params["pos"].astype(jnp.float32)                      # (HW+1, C)
    pos0 = pos[:1]                                               # (1, C) f32
    posx_f = pos[1:]                                             # (HW, C) f32
    posx = posx_f.astype(cdt)

    # Pre-transposed / fused projection weights (kernel computes x @ w^T).
    qwt = params["qw"].T.astype(cdt)                                    # (C, C)
    kvwt_f = jnp.concatenate([params["kw"].T, params["vw"].T], axis=1)  # (C, 2C) f32
    kvwt = kvwt_f.astype(cdt)
    qb = params["qb"].reshape(1, C).astype(jnp.float32)
    kvb = jnp.concatenate([params["kb"], params["vb"]]).reshape(1, 2 * C)
    kvb = kvb.astype(jnp.float32)

    # k0/v0 folding delta: (pos0 - mean(posx)) @ [kw|vw]^T, NO bias (the bias is
    # already inside mean_HW(kx)/mean_HW(vx) computed in the kernel).
    dkv = ((pos0 - jnp.mean(posx_f, axis=0, keepdims=True)) @ kvwt_f)
    dkv = dkv.astype(jnp.float32)                                       # (1, 2C)

    # Output projection, zero-padded to a lane-dense (multiple-of-128) width so
    # the kernel's stores are unmasked; sliced back off below.
    O_pad = max(_round_up(O, 128), 128)
    cwt = params["cw"].T.astype(cdt)                                    # (C, O)
    cb = params["cb"].reshape(1, O).astype(jnp.float32)
    if O_pad != O:
        cwt = jnp.pad(cwt, ((0, 0), (0, O_pad - O)))
        cb = jnp.pad(cb, ((0, 0), (0, O_pad - O)))

    # One-hot head-membership matrices: hsel[c, h] = 1 iff channel c is in head h.
    hsel_np = np.zeros((C, num_heads), np.float32)
    hsel_np[np.arange(C), np.arange(C) // hd] = 1.0
    hsel = jnp.asarray(hsel_np, dtype=cdt)
    hselT = jnp.asarray(np.ascontiguousarray(hsel_np.T), dtype=cdt)

    kernel = functools.partial(_attn_pool_kernel, num_heads=num_heads,
                               scale=float(hd) ** -0.5,
                               approx_recip=bool(approx_softmax_recip))

    # Footprint / generation-aware VMEM limit.
    csize = cdt.itemsize
    const_bytes = ((C * C + C * 2 * C + C * O_pad + 2 * num_heads * C + HW * C)
                   * csize
                   + (C + C + 2 * C + 2 * C + O_pad) * 4)
    tile_bytes = TB * HW * C * csize + TB * O_pad * 4
    need = 2 * const_bytes + 2 * tile_bytes + (8 << 20)
    cap = vmem_cap if vmem_cap is not None else (128 << 20)
    if vmem_limit_bytes is None:
        vmem_limit_bytes = int(min(0.85 * cap, max(need, 32 << 20)))

    def _call(single_buffer_consts):
        def const(shape):
            idx = lambda *_: (0,) * len(shape)
            if single_buffer_consts:
                # Constant-index inputs never change block: 1 buffer, not 2
                # (halves resident weight VMEM; key for fitting v7x's 64 MiB).
                return pl.BlockSpec(shape, idx, pipeline_mode=pl.Buffered(1))
            return pl.BlockSpec(shape, idx)

        grid_spec = pltpu.PrefetchScalarGridSpec(
            num_scalar_prefetch=0,
            grid=(n_tiles,),
            in_specs=[
                pl.BlockSpec((TB, HW, C), lambda i: (i, 0, 0)),   # x tile
                const((HW, C)),                                   # posx
                const((1, C)),                                    # pos0 (f32)
                const((C, C)),                                    # qwt
                const((C, 2 * C)),                                # kvwt
                const((1, C)),                                    # qb
                const((1, 2 * C)),                                # kvb
                const((1, 2 * C)),                                # dkv
                const((C, O_pad)),                                # cwt
                const((1, O_pad)),                                # cb
                const((C, num_heads)),                            # hsel
                const((num_heads, C)),                            # hselT
            ],
            out_specs=pl.BlockSpec((TB, O_pad), lambda i: (i, 0)),
        )
        return pl.pallas_call(
            kernel,
            out_shape=jax.ShapeDtypeStruct((N_pad, O_pad), jnp.float32),
            grid_spec=grid_spec,
            compiler_params=pltpu.CompilerParams(
                dimension_semantics=("parallel",),   # v7x: shard tiles across TCs
                vmem_limit_bytes=int(vmem_limit_bytes),
            ),
        )(x_seq, posx, pos0, qwt, kvwt, qb, kvb, dkv, cwt, cb, hsel, hselT)

    try:
        out = jax.block_until_ready(_call(True))
    except Exception:
        # BlockSpec(pipeline_mode=Buffered(1)) unsupported on this jax build:
        # fall back to default double-buffered constant specs.
        out = _call(False)

    return out[:N, :O]


def reference_forward(x_nchw, params, num_heads):
    """Pure-JAX reference mirroring F.multi_head_attention_forward semantics."""
    N, C, H, W = x_nchw.shape
    HW = H * W
    xs = jnp.transpose(x_nchw.reshape(N, C, HW), (2, 0, 1))      # (HW, N, C)
    xs = jnp.concatenate([xs.mean(axis=0, keepdims=True), xs], axis=0)
    xs = xs + params["pos"][:, None, :]
    L = xs.shape[0]
    hd = C // num_heads

    q = xs @ params["qw"].T + params["qb"]
    k = xs @ params["kw"].T + params["kb"]
    v = xs @ params["vw"].T + params["vb"]

    def split(t):  # (L, N, C) -> (N, H, L, hd)
        return jnp.transpose(t.reshape(L, N, num_heads, hd), (1, 2, 0, 3))

    qh = split(q) * (float(hd) ** -0.5)
    kh = split(k)
    vh = split(v)
    s = jnp.einsum("nhld,nhmd->nhlm", qh, kh)
    p = jax.nn.softmax(s, axis=-1)
    o = jnp.einsum("nhlm,nhmd->nhld", p, vh)                     # (N, H, L, hd)
    o = jnp.transpose(o, (2, 0, 1, 3)).reshape(L, N, C)
    y = o @ params["cw"].T + params["cb"]
    return y[0]                                                  # (N, O)


if __name__ == "__main__":
    # Small shapes: spacial_dim=4 -> 16 patches (+1 mean token), embed_dim=32,
    # num_heads=4, output_dim=64, batch=2.  Input: (2, 32, 4, 4) NCHW.
    spacial_dim, embed_dim, num_heads, output_dim = 4, 32, 4, 64
    N = 2
    L = spacial_dim ** 2 + 1

    key = jax.random.PRNGKey(0)
    ks = jax.random.split(key, 10)
    params = {
        "pos": (jax.random.normal(ks[0], (L, embed_dim), jnp.float32)
                / embed_dim ** 0.5),
        "qw": jax.random.normal(ks[1], (embed_dim, embed_dim), jnp.float32) * 0.05,
        "kw": jax.random.normal(ks[2], (embed_dim, embed_dim), jnp.float32) * 0.05,
        "vw": jax.random.normal(ks[3], (embed_dim, embed_dim), jnp.float32) * 0.05,
        "qb": jax.random.normal(ks[4], (embed_dim,), jnp.float32) * 0.05,
        "kb": jax.random.normal(ks[5], (embed_dim,), jnp.float32) * 0.05,
        "vb": jax.random.normal(ks[6], (embed_dim,), jnp.float32) * 0.05,
        "cw": jax.random.normal(ks[7], (output_dim, embed_dim), jnp.float32) * 0.05,
        "cb": jax.random.normal(ks[8], (output_dim,), jnp.float32) * 0.05,
    }
    x = jax.random.normal(ks[9], (N, embed_dim, spacial_dim, spacial_dim),
                          jnp.float32)

    ref = jax.block_until_ready(reference_forward(x, params, num_heads))

    # f32 path: tight correctness check against the reference.
    out = jax.block_until_ready(
        attention_pool2d(x, params, num_heads, compute_dtype=jnp.float32))
    np.testing.assert_allclose(np.asarray(out), np.asarray(ref),
                               rtol=1e-4, atol=1e-5)
    assert out.shape == (N, output_dim)

    # channels_last fast path (producer-fused layout, skips the wrapper permute).
    x_cl = jnp.transpose(x.reshape(N, embed_dim, spacial_dim ** 2), (0, 2, 1))
    out_cl = jax.block_until_ready(
        attention_pool2d(x_cl, params, num_heads, compute_dtype=jnp.float32,
                         channels_last=True))
    np.testing.assert_allclose(np.asarray(out_cl), np.asarray(ref),
                               rtol=1e-4, atol=1e-5)

    # bf16 MXU-operand production path (v7x default) + EUP approx reciprocal.
    out_bf16 = jax.block_until_ready(
        attention_pool2d(x, params, num_heads, compute_dtype=jnp.bfloat16,
                         approx_softmax_recip=True))
    np.testing.assert_allclose(np.asarray(out_bf16), np.asarray(ref),
                               rtol=5e-2, atol=3e-2)
    assert out_bf16.shape == (N, output_dim)

    print("KERNEL_OK")
</pallas_src>

<mosaic_0001>
module attributes {stable_mosaic.version = 11 : i64} {
  func.func @_attn_pool_kernel(%arg0: i32, %arg1: memref<16x16x32xf32, #tpu.memory_space<vmem>>, %arg2: memref<16x32xf32, #tpu.memory_space<vmem>>, %arg3: memref<1x32xf32, #tpu.memory_space<vmem>>, %arg4: memref<32x32xf32, #tpu.memory_space<vmem>>, %arg5: memref<32x64xf32, #tpu.memory_space<vmem>>, %arg6: memref<1x32xf32, #tpu.memory_space<vmem>>, %arg7: memref<1x64xf32, #tpu.memory_space<vmem>>, %arg8: memref<1x64xf32, #tpu.memory_space<vmem>>, %arg9: memref<32x128xf32, #tpu.memory_space<vmem>>, %arg10: memref<1x128xf32, #tpu.memory_space<vmem>>, %arg11: memref<32x4xf32, #tpu.memory_space<vmem>>, %arg12: memref<4x32xf32, #tpu.memory_space<vmem>>, %arg13: memref<16x128xf32, #tpu.memory_space<vmem>>) attributes {dimension_semantics = [#tpu.dimension_semantics<parallel>], iteration_bounds = array<i64: 1>, scalar_prefetch = 0 : i64, scratch_operands = 0 : i64, tpu.core_type = #tpu.core_type<tc>, window_params = [{transform_indices = @transform_0, window_bounds = array<i64: 16, 16, 32>}, {pipeline_mode = #tpu.pipeline_mode<synchronous>, transform_indices = @transform_1, window_bounds = array<i64: 16, 32>}, {pipeline_mode = #tpu.pipeline_mode<synchronous>, transform_indices = @transform_2, window_bounds = array<i64: 1, 32>}, {pipeline_mode = #tpu.pipeline_mode<synchronous>, transform_indices = @transform_3, window_bounds = array<i64: 32, 32>}, {pipeline_mode = #tpu.pipeline_mode<synchronous>, transform_indices = @transform_4, window_bounds = array<i64: 32, 64>}, {pipeline_mode = #tpu.pipeline_mode<synchronous>, transform_indices = @transform_5, window_bounds = array<i64: 1, 32>}, {pipeline_mode = #tpu.pipeline_mode<synchronous>, transform_indices = @transform_6, window_bounds = array<i64: 1, 64>}, {pipeline_mode = #tpu.pipeline_mode<synchronous>, transform_indices = @transform_7, window_bounds = array<i64: 1, 64>}, {pipeline_mode = #tpu.pipeline_mode<synchronous>, transform_indices = @transform_8, window_bounds = array<i64: 32, 128>}, {pipeline_mode = #tpu.pipeline_mode<synchronous>, transform_indices = @transform_9, window_bounds = array<i64: 1, 128>}, {pipeline_mode = #tpu.pipeline_mode<synchronous>, transform_indices = @transform_10, window_bounds = array<i64: 32, 4>}, {pipeline_mode = #tpu.pipeline_mode<synchronous>, transform_indices = @transform_11, window_bounds = array<i64: 4, 32>}, {transform_indices = @transform_12, window_bounds = array<i64: 16, 128>}]} {
    %c0 = arith.constant 0 : index
    %c0_0 = arith.constant 0 : index
    %c0_1 = arith.constant 0 : index
    %0 = vector.load %arg1[%c0, %c0_0, %c0_1] : memref<16x16x32xf32, #tpu.memory_space<vmem>>, vector<16x16x32xf32>
    %c0_2 = arith.constant 0 : index
    %c0_3 = arith.constant 0 : index
    %1 = vector.load %arg2[%c0_2, %c0_3] : memref<16x32xf32, #tpu.memory_space<vmem>>, vector<16x32xf32>
    %2 = vector.shape_cast %1 : vector<16x32xf32> to vector<1x16x32xf32>
    %3 = vector.broadcast %2 : vector<1x16x32xf32> to vector<16x16x32xf32>
    %4 = arith.addf %0, %3 : vector<16x16x32xf32>
    %5 = vector.shape_cast %4 : vector<16x16x32xf32> to vector<256x32xf32>
    %cst = arith.constant dense<0.000000e+00> : vector<16x32xf32>
    %6 = vector.multi_reduction <add>, %0, %cst [1] : vector<16x16x32xf32> to vector<16x32xf32>
    %cst_4 = arith.constant 1.600000e+01 : f32
    %7 = vector.broadcast %cst_4 : f32 to vector<16x32xf32>
    %8 = arith.divf %6, %7 : vector<16x32xf32>
    %c0_5 = arith.constant 0 : index
    %c0_6 = arith.constant 0 : index
    %9 = vector.load %arg3[%c0_5, %c0_6] : memref<1x32xf32, #tpu.memory_space<vmem>>, vector<1x32xf32>
    %10 = vector.broadcast %9 : vector<1x32xf32> to vector<16x32xf32>
    %11 = arith.addf %8, %10 : vector<16x32xf32>
    %c0_7 = arith.constant 0 : index
    %c0_8 = arith.constant 0 : index
    %12 = vector.load %arg5[%c0_7, %c0_8] : memref<32x64xf32, #tpu.memory_space<vmem>>, vector<32x64xf32>
    %cst_9 = arith.constant dense<0.000000e+00> : vector<256x64xf32>
    %13 = tpu.matmul %5, %12, %cst_9 {dimension_numbers = #tpu.dot_dimension_numbers<[1], [0], [0], [1], [0, 0, 1, 1], [], []>} : vector<256x32xf32>, vector<32x64xf32>, vector<256x64xf32> -> vector<256x64xf32>
    %c0_10 = arith.constant 0 : index
    %c0_11 = arith.constant 0 : index
    %14 = vector.load %arg7[%c0_10, %c0_11] : memref<1x64xf32, #tpu.memory_space<vmem>>, vector<1x64xf32>
    %15 = vector.broadcast %14 : vector<1x64xf32> to vector<256x64xf32>
    %16 = arith.addf %13, %15 : vector<256x64xf32>
    %17 = vector.shape_cast %16 : vector<256x64xf32> to vector<16x16x64xf32>
    %cst_12 = arith.constant dense<0.000000e+00> : vector<16x64xf32>
    %18 = vector.multi_reduction <add>, %17, %cst_12 [1] : vector<16x16x64xf32> to vector<16x64xf32>
    %cst_13 = arith.constant 1.600000e+01 : f32
    %19 = vector.broadcast %cst_13 : f32 to vector<16x64xf32>
    %20 = arith.divf %18, %19 : vector<16x64xf32>
    %c0_14 = arith.constant 0 : index
    %c0_15 = arith.constant 0 : index
    %21 = vector.load %arg8[%c0_14, %c0_15] : memref<1x64xf32, #tpu.memory_space<vmem>>, vector<1x64xf32>
    %22 = vector.broadcast %21 : vector<1x64xf32> to vector<16x64xf32>
    %23 = arith.addf %20, %22 : vector<16x64xf32>
    %24 = vector.extract_strided_slice %23 {offsets = [0, 0], sizes = [16, 32], strides = [1, 1]} : vector<16x64xf32> to vector<16x32xf32>
    %25 = vector.extract_strided_slice %23 {offsets = [0, 32], sizes = [16, 32], strides = [1, 1]} : vector<16x64xf32> to vector<16x32xf32>
    %26 = vector.extract_strided_slice %17 {offsets = [0, 0, 0], sizes = [16, 16, 32], strides = [1, 1, 1]} : vector<16x16x64xf32> to vector<16x16x32xf32>
    %27 = vector.extract_strided_slice %17 {offsets = [0, 0, 32], sizes = [16, 16, 32], strides = [1, 1, 1]} : vector<16x16x64xf32> to vector<16x16x32xf32>
    %c0_16 = arith.constant 0 : index
    %c0_17 = arith.constant 0 : index
    %28 = vector.load %arg4[%c0_16, %c0_17] : memref<32x32xf32, #tpu.memory_space<vmem>>, vector<32x32xf32>
    %cst_18 = arith.constant dense<0.000000e+00> : vector<16x32xf32>
    %29 = tpu.matmul %11, %28, %cst_18 {dimension_numbers = #tpu.dot_dimension_numbers<[1], [0], [0], [1], [0, 0, 1, 1], [], []>} : vector<16x32xf32>, vector<32x32xf32>, vector<16x32xf32> -> vector<16x32xf32>
    %c0_19 = arith.constant 0 : index
    %c0_20 = arith.constant 0 : index
    %30 = vector.load %arg6[%c0_19, %c0_20] : memref<1x32xf32, #tpu.memory_space<vmem>>, vector<1x32xf32>
    %31 = vector.broadcast %30 : vector<1x32xf32> to vector<16x32xf32>
    %32 = arith.addf %29, %31 : vector<16x32xf32>
    %cst_21 = arith.constant 0.353553385 : f32
    %33 = vector.broadcast %cst_21 : f32 to vector<16x32xf32>
    %34 = arith.mulf %32, %33 : vector<16x32xf32>
    %c0_22 = arith.constant 0 : index
    %c0_23 = arith.constant 0 : index
    %35 = vector.load %arg11[%c0_22, %c0_23] : memref<32x4xf32, #tpu.memory_space<vmem>>, vector<32x4xf32>
    %36 = arith.mulf %34, %24 : vector<16x32xf32>
    %cst_24 = arith.constant dense<0.000000e+00> : vector<16x4xf32>
    %37 = tpu.matmul %36, %35, %cst_24 {dimension_numbers = #tpu.dot_dimension_numbers<[1], [0], [0], [1], [0, 0, 1, 1], [], []>} : vector<16x32xf32>, vector<32x4xf32>, vector<16x4xf32> -> vector<16x4xf32>
    %38 = vector.shape_cast %34 : vector<16x32xf32> to vector<16x1x32xf32>
    %39 = vector.broadcast %38 : vector<16x1x32xf32> to vector<16x16x32xf32>
    %40 = arith.mulf %39, %26 : vector<16x16x32xf32>
    %41 = vector.shape_cast %40 : vector<16x16x32xf32> to vector<256x32xf32>
    %cst_25 = arith.constant dense<0.000000e+00> : vector<256x4xf32>
    %42 = tpu.matmul %41, %35, %cst_25 {dimension_numbers = #tpu.dot_dimension_numbers<[1], [0], [0], [1], [0, 0, 1, 1], [], []>} : vector<256x32xf32>, vector<32x4xf32>, vector<256x4xf32> -> vector<256x4xf32>
    %43 = vector.shape_cast %42 : vector<256x4xf32> to vector<16x16x4xf32>
    %cst_26 = arith.constant dense<0xFF800000> : vector<16x4xf32>
    %44 = vector.multi_reduction <maximumf>, %43, %cst_26 [1] : vector<16x16x4xf32> to vector<16x4xf32>
    %45 = arith.maximumf %37, %44 : vector<16x4xf32>
    %46 = arith.subf %37, %45 : vector<16x4xf32>
    %47 = math.exp %46 : vector<16x4xf32>
    %48 = vector.shape_cast %45 : vector<16x4xf32> to vector<16x1x4xf32>
    %49 = vector.broadcast %48 : vector<16x1x4xf32> to vector<16x16x4xf32>
    %50 = arith.subf %43, %49 : vector<16x16x4xf32>
    %51 = math.exp %50 : vector<16x16x4xf32>
    %cst_27 = arith.constant dense<0.000000e+00> : vector<16x4xf32>
    %52 = vector.multi_reduction <add>, %51, %cst_27 [1] : vector<16x16x4xf32> to vector<16x4xf32>
    %53 = arith.addf %47, %52 : vector<16x4xf32>
    %54 = tpu.reciprocal %53 : vector<16x4xf32> -> vector<16x4xf32>
    %c0_28 = arith.constant 0 : index
    %c0_29 = arith.constant 0 : index
    %55 = vector.load %arg12[%c0_28, %c0_29] : memref<4x32xf32, #tpu.memory_space<vmem>>, vector<4x32xf32>
    %56 = arith.mulf %47, %54 : vector<16x4xf32>
    %cst_30 = arith.constant dense<0.000000e+00> : vector<16x32xf32>
    %57 = tpu.matmul %56, %55, %cst_30 {dimension_numbers = #tpu.dot_dimension_numbers<[1], [0], [0], [1], [0, 0, 1, 1], [], []>} : vector<16x4xf32>, vector<4x32xf32>, vector<16x32xf32> -> vector<16x32xf32>
    %58 = vector.shape_cast %54 : vector<16x4xf32> to vector<16x1x4xf32>
    %59 = vector.broadcast %58 : vector<16x1x4xf32> to vector<16x16x4xf32>
    %60 = arith.mulf %51, %59 : vector<16x16x4xf32>
    %61 = vector.shape_cast %60 : vector<16x16x4xf32> to vector<256x4xf32>
    %cst_31 = arith.constant dense<0.000000e+00> : vector<256x32xf32>
    %62 = tpu.matmul %61, %55, %cst_31 {dimension_numbers = #tpu.dot_dimension_numbers<[1], [0], [0], [1], [0, 0, 1, 1], [], []>} : vector<256x4xf32>, vector<4x32xf32>, vector<256x32xf32> -> vector<256x32xf32>
    %63 = arith.mulf %57, %25 : vector<16x32xf32>
    %64 = vector.shape_cast %62 : vector<256x32xf32> to vector<16x16x32xf32>
    %65 = arith.mulf %64, %27 : vector<16x16x32xf32>
    %cst_32 = arith.constant dense<0.000000e+00> : vector<16x32xf32>
    %66 = vector.multi_reduction <add>, %65, %cst_32 [1] : vector<16x16x32xf32> to vector<16x32xf32>
    %67 = arith.addf %63, %66 : vector<16x32xf32>
    %c0_33 = arith.constant 0 : index
    %c0_34 = arith.constant 0 : index
    %68 = vector.load %arg9[%c0_33, %c0_34] : memref<32x128xf32, #tpu.memory_space<vmem>>, vector<32x128xf32>
    %cst_35 = arith.constant dense<0.000000e+00> : vector<16x128xf32>
    %69 = tpu.matmul %67, %68, %cst_35 {dimension_numbers = #tpu.dot_dimension_numbers<[1], [0], [0], [1], [0, 0, 1, 1], [], []>} : vector<16x32xf32>, vector<32x128xf32>, vector<16x128xf32> -> vector<16x128xf32>
    %c0_36 = arith.constant 0 : index
    %c0_37 = arith.constant 0 : index
    %70 = vector.load %arg10[%c0_36, %c0_37] : memref<1x128xf32, #tpu.memory_space<vmem>>, vector<1x128xf32>
    %71 = vector.broadcast %70 : vector<1x128xf32> to vector<16x128xf32>
    %72 = arith.addf %69, %71 : vector<16x128xf32>
    %c0_38 = arith.constant 0 : index
    %c0_39 = arith.constant 0 : index
    %73 = vector.load %arg13[%c0_38, %c0_39] : memref<16x128xf32, #tpu.memory_space<vmem>>, vector<16x128xf32>
    tpu.vector_store %arg13[%c0_38, %c0_39], %72 {strides = array<i32>} : memref<16x128xf32, #tpu.memory_space<vmem>>, vector<16x128xf32>,
    return
  }
  func.func @transform_0(%arg0: i32) -> (i32, i32, i32) {
    %c0_i32 = arith.constant 0 : i32
    %c0_i32_0 = arith.constant 0 : i32
    %c0_i32_1 = arith.constant 0 : i32
    return %arg0, %c0_i32, %c0_i32_0 : i32, i32, i32
  }
  func.func @transform_1(%arg0: i32) -> (i32, i32) {
    %c0_i32 = arith.constant 0 : i32
    %c0_i32_0 = arith.constant 0 : i32
    %c0_i32_1 = arith.constant 0 : i32
    return %c0_i32, %c0_i32_0 : i32, i32
  }
  func.func @transform_2(%arg0: i32) -> (i32, i32) {
    %c0_i32 = arith.constant 0 : i32
    %c0_i32_0 = arith.constant 0 : i32
    %c0_i32_1 = arith.constant 0 : i32
    return %c0_i32, %c0_i32_0 : i32, i32
  }
  func.func @transform_3(%arg0: i32) -> (i32, i32) {
    %c0_i32 = arith.constant 0 : i32
    %c0_i32_0 = arith.constant 0 : i32
    %c0_i32_1 = arith.constant 0 : i32
    return %c0_i32, %c0_i32_0 : i32, i32
  }
  func.func @transform_4(%arg0: i32) -> (i32, i32) {
    %c0_i32 = arith.constant 0 : i32
    %c0_i32_0 = arith.constant 0 : i32
    %c0_i32_1 = arith.constant 0 : i32
    return %c0_i32, %c0_i32_0 : i32, i32
  }
  func.func @transform_5(%arg0: i32) -> (i32, i32) {
    %c0_i32 = arith.constant 0 : i32
    %c0_i32_0 = arith.constant 0 : i32
    %c0_i32_1 = arith.constant 0 : i32
    return %c0_i32, %c0_i32_0 : i32, i32
  }
  func.func @transform_6(%arg0: i32) -> (i32, i32) {
    %c0_i32 = arith.constant 0 : i32
    %c0_i32_0 = arith.constant 0 : i32
    %c0_i32_1 = arith.constant 0 : i32
    return %c0_i32, %c0_i32_0 : i32, i32
  }
  func.func @transform_7(%arg0: i32) -> (i32, i32) {
    %c0_i32 = arith.constant 0 : i32
    %c0_i32_0 = arith.constant 0 : i32
    %c0_i32_1 = arith.constant 0 : i32
    return %c0_i32, %c0_i32_0 : i32, i32
  }
  func.func @transform_8(%arg0: i32) -> (i32, i32) {
    %c0_i32 = arith.constant 0 : i32
    %c0_i32_0 = arith.constant 0 : i32
    %c0_i32_1 = arith.constant 0 : i32
    return %c0_i32, %c0_i32_0 : i32, i32
  }
  func.func @transform_9(%arg0: i32) -> (i32, i32) {
    %c0_i32 = arith.constant 0 : i32
    %c0_i32_0 = arith.constant 0 : i32
    %c0_i32_1 = arith.constant 0 : i32
    return %c0_i32, %c0_i32_0 : i32, i32
  }
  func.func @transform_10(%arg0: i32) -> (i32, i32) {
    %c0_i32 = arith.constant 0 : i32
    %c0_i32_0 = arith.constant 0 : i32
    %c0_i32_1 = arith.constant 0 : i32
    return %c0_i32, %c0_i32_0 : i32, i32
  }
  func.func @transform_11(%arg0: i32) -> (i32, i32) {
    %c0_i32 = arith.constant 0 : i32
    %c0_i32_0 = arith.constant 0 : i32
    %c0_i32_1 = arith.constant 0 : i32
    return %c0_i32, %c0_i32_0 : i32, i32
  }
  func.func @transform_12(%arg0: i32) -> (i32, i32) {
    %c0_i32 = arith.constant 0 : i32
    %c0_i32_0 = arith.constant 0 : i32
    return %arg0, %c0_i32 : i32, i32
  }
}

module attributes {stable_mosaic.version = 11 : i64} {
  func.func @_attn_pool_kernel(%arg0: i32, %arg1: memref<16x16x32xf32, #tpu.memory_space<vmem>>, %arg2: memref<16x32xf32, #tpu.memory_space<vmem>>, %arg3: memref<1x32xf32, #tpu.memory_space<vmem>>, %arg4: memref<32x32xf32, #tpu.memory_space<vmem>>, %arg5: memref<32x64xf32, #tpu.memory_space<vmem>>, %arg6: memref<1x32xf32, #tpu.memory_space<vmem>>, %arg7: memref<1x64xf32, #tpu.memory_space<vmem>>, %arg8: memref<1x64xf32, #tpu.memory_space<vmem>>, %arg9: memref<32x128xf32, #tpu.memory_space<vmem>>, %arg10: memref<1x128xf32, #tpu.memory_space<vmem>>, %arg11: memref<32x4xf32, #tpu.memory_space<vmem>>, %arg12: memref<4x32xf32, #tpu.memory_space<vmem>>, %arg13: memref<16x128xf32, #tpu.memory_space<vmem>>) attributes {dimension_semantics = [#tpu.dimension_semantics<parallel>], iteration_bounds = array<i64: 1>, scalar_prefetch = 0 : i64, scratch_operands = 0 : i64, tpu.core_type = #tpu.core_type<tc>, window_params = [{transform_indices = @transform_0, window_bounds = array<i64: 16, 16, 32>}, {pipeline_mode = #tpu.pipeline_mode<synchronous>, transform_indices = @transform_1, window_bounds = array<i64: 16, 32>}, {pipeline_mode = #tpu.pipeline_mode<synchronous>, transform_indices = @transform_2, window_bounds = array<i64: 1, 32>}, {pipeline_mode = #tpu.pipeline_mode<synchronous>, transform_indices = @transform_3, window_bounds = array<i64: 32, 32>}, {pipeline_mode = #tpu.pipeline_mode<synchronous>, transform_indices = @transform_4, window_bounds = array<i64: 32, 64>}, {pipeline_mode = #tpu.pipeline_mode<synchronous>, transform_indices = @transform_5, window_bounds = array<i64: 1, 32>}, {pipeline_mode = #tpu.pipeline_mode<synchronous>, transform_indices = @transform_6, window_bounds = array<i64: 1, 64>}, {pipeline_mode = #tpu.pipeline_mode<synchronous>, transform_indices = @transform_7, window_bounds = array<i64: 1, 64>}, {pipeline_mode = #tpu.pipeline_mode<synchronous>, transform_indices = @transform_8, window_bounds = array<i64: 32, 128>}, {pipeline_mode = #tpu.pipeline_mode<synchronous>, transform_indices = @transform_9, window_bounds = array<i64: 1, 128>}, {pipeline_mode = #tpu.pipeline_mode<synchronous>, transform_indices = @transform_10, window_bounds = array<i64: 32, 4>}, {pipeline_mode = #tpu.pipeline_mode<synchronous>, transform_indices = @transform_11, window_bounds = array<i64: 4, 32>}, {transform_indices = @transform_12, window_bounds = array<i64: 16, 128>}]} {
    %c0 = arith.constant 0 : index
    %c0_0 = arith.constant 0 : index
    %c0_1 = arith.constant 0 : index
    %0 = vector.load %arg1[%c0, %c0_0, %c0_1] : memref<16x16x32xf32, #tpu.memory_space<vmem>>, vector<16x16x32xf32>
    %c0_2 = arith.constant 0 : index
    %c0_3 = arith.constant 0 : index
    %1 = vector.load %arg2[%c0_2, %c0_3] : memref<16x32xf32, #tpu.memory_space<vmem>>, vector<16x32xf32>
    %2 = vector.shape_cast %1 : vector<16x32xf32> to vector<1x16x32xf32>
    %3 = vector.broadcast %2 : vector<1x16x32xf32> to vector<16x16x32xf32>
    %4 = arith.addf %0, %3 : vector<16x16x32xf32>
    %5 = vector.shape_cast %4 : vector<16x16x32xf32> to vector<256x32xf32>
    %cst = arith.constant dense<0.000000e+00> : vector<16x32xf32>
    %6 = vector.multi_reduction <add>, %0, %cst [1] : vector<16x16x32xf32> to vector<16x32xf32>
    %cst_4 = arith.constant 1.600000e+01 : f32
    %7 = vector.broadcast %cst_4 : f32 to vector<16x32xf32>
    %8 = arith.divf %6, %7 : vector<16x32xf32>
    %c0_5 = arith.constant 0 : index
    %c0_6 = arith.constant 0 : index
    %9 = vector.load %arg3[%c0_5, %c0_6] : memref<1x32xf32, #tpu.memory_space<vmem>>, vector<1x32xf32>
    %10 = vector.broadcast %9 : vector<1x32xf32> to vector<16x32xf32>
    %11 = arith.addf %8, %10 : vector<16x32xf32>
    %c0_7 = arith.constant 0 : index
    %c0_8 = arith.constant 0 : index
    %12 = vector.load %arg5[%c0_7, %c0_8] : memref<32x64xf32, #tpu.memory_space<vmem>>, vector<32x64xf32>
    %cst_9 = arith.constant dense<0.000000e+00> : vector<256x64xf32>
    %13 = tpu.matmul %5, %12, %cst_9 {dimension_numbers = #tpu.dot_dimension_numbers<[1], [0], [0], [1], [0, 0, 1, 1], [], []>} : vector<256x32xf32>, vector<32x64xf32>, vector<256x64xf32> -> vector<256x64xf32>
    %c0_10 = arith.constant 0 : index
    %c0_11 = arith.constant 0 : index
    %14 = vector.load %arg7[%c0_10, %c0_11] : memref<1x64xf32, #tpu.memory_space<vmem>>, vector<1x64xf32>
    %15 = vector.broadcast %14 : vector<1x64xf32> to vector<256x64xf32>
    %16 = arith.addf %13, %15 : vector<256x64xf32>
    %17 = vector.shape_cast %16 : vector<256x64xf32> to vector<16x16x64xf32>
    %cst_12 = arith.constant dense<0.000000e+00> : vector<16x64xf32>
    %18 = vector.multi_reduction <add>, %17, %cst_12 [1] : vector<16x16x64xf32> to vector<16x64xf32>
    %cst_13 = arith.constant 1.600000e+01 : f32
    %19 = vector.broadcast %cst_13 : f32 to vector<16x64xf32>
    %20 = arith.divf %18, %19 : vector<16x64xf32>
    %c0_14 = arith.constant 0 : index
    %c0_15 = arith.constant 0 : index
    %21 = vector.load %arg8[%c0_14, %c0_15] : memref<1x64xf32, #tpu.memory_space<vmem>>, vector<1x64xf32>
    %22 = vector.broadcast %21 : vector<1x64xf32> to vector<16x64xf32>
    %23 = arith.addf %20, %22 : vector<16x64xf32>
    %24 = vector.extract_strided_slice %23 {offsets = [0, 0], sizes = [16, 32], strides = [1, 1]} : vector<16x64xf32> to vector<16x32xf32>
    %25 = vector.extract_strided_slice %23 {offsets = [0, 32], sizes = [16, 32], strides = [1, 1]} : vector<16x64xf32> to vector<16x32xf32>
    %26 = vector.extract_strided_slice %17 {offsets = [0, 0, 0], sizes = [16, 16, 32], strides = [1, 1, 1]} : vector<16x16x64xf32> to vector<16x16x32xf32>
    %27 = vector.extract_strided_slice %17 {offsets = [0, 0, 32], sizes = [16, 16, 32], strides = [1, 1, 1]} : vector<16x16x64xf32> to vector<16x16x32xf32>
    %c0_16 = arith.constant 0 : index
    %c0_17 = arith.constant 0 : index
    %28 = vector.load %arg4[%c0_16, %c0_17] : memref<32x32xf32, #tpu.memory_space<vmem>>, vector<32x32xf32>
    %cst_18 = arith.constant dense<0.000000e+00> : vector<16x32xf32>
    %29 = tpu.matmul %11, %28, %cst_18 {dimension_numbers = #tpu.dot_dimension_numbers<[1], [0], [0], [1], [0, 0, 1, 1], [], []>} : vector<16x32xf32>, vector<32x32xf32>, vector<16x32xf32> -> vector<16x32xf32>
    %c0_19 = arith.constant 0 : index
    %c0_20 = arith.constant 0 : index
    %30 = vector.load %arg6[%c0_19, %c0_20] : memref<1x32xf32, #tpu.memory_space<vmem>>, vector<1x32xf32>
    %31 = vector.broadcast %30 : vector<1x32xf32> to vector<16x32xf32>
    %32 = arith.addf %29, %31 : vector<16x32xf32>
    %cst_21 = arith.constant 0.353553385 : f32
    %33 = vector.broadcast %cst_21 : f32 to vector<16x32xf32>
    %34 = arith.mulf %32, %33 : vector<16x32xf32>
    %c0_22 = arith.constant 0 : index
    %c0_23 = arith.constant 0 : index
    %35 = vector.load %arg11[%c0_22, %c0_23] : memref<32x4xf32, #tpu.memory_space<vmem>>, vector<32x4xf32>
    %36 = arith.mulf %34, %24 : vector<16x32xf32>
    %cst_24 = arith.constant dense<0.000000e+00> : vector<16x4xf32>
    %37 = tpu.matmul %36, %35, %cst_24 {dimension_numbers = #tpu.dot_dimension_numbers<[1], [0], [0], [1], [0, 0, 1, 1], [], []>} : vector<16x32xf32>, vector<32x4xf32>, vector<16x4xf32> -> vector<16x4xf32>
    %38 = vector.shape_cast %34 : vector<16x32xf32> to vector<16x1x32xf32>
    %39 = vector.broadcast %38 : vector<16x1x32xf32> to vector<16x16x32xf32>
    %40 = arith.mulf %39, %26 : vector<16x16x32xf32>
    %41 = vector.shape_cast %40 : vector<16x16x32xf32> to vector<256x32xf32>
    %cst_25 = arith.constant dense<0.000000e+00> : vector<256x4xf32>
    %42 = tpu.matmul %41, %35, %cst_25 {dimension_numbers = #tpu.dot_dimension_numbers<[1], [0], [0], [1], [0, 0, 1, 1], [], []>} : vector<256x32xf32>, vector<32x4xf32>, vector<256x4xf32> -> vector<256x4xf32>
    %43 = vector.shape_cast %42 : vector<256x4xf32> to vector<16x16x4xf32>
    %cst_26 = arith.constant dense<0xFF800000> : vector<16x4xf32>
    %44 = vector.multi_reduction <maximumf>, %43, %cst_26 [1] : vector<16x16x4xf32> to vector<16x4xf32>
    %45 = arith.maximumf %37, %44 : vector<16x4xf32>
    %46 = arith.subf %37, %45 : vector<16x4xf32>
    %47 = math.exp %46 : vector<16x4xf32>
    %48 = vector.shape_cast %45 : vector<16x4xf32> to vector<16x1x4xf32>
    %49 = vector.broadcast %48 : vector<16x1x4xf32> to vector<16x16x4xf32>
    %50 = arith.subf %43, %49 : vector<16x16x4xf32>
    %51 = math.exp %50 : vector<16x16x4xf32>
    %cst_27 = arith.constant dense<0.000000e+00> : vector<16x4xf32>
    %52 = vector.multi_reduction <add>, %51, %cst_27 [1] : vector<16x16x4xf32> to vector<16x4xf32>
    %53 = arith.addf %47, %52 : vector<16x4xf32>
    %54 = tpu.reciprocal %53 : vector<16x4xf32> -> vector<16x4xf32>
    %c0_28 = arith.constant 0 : index
    %c0_29 = arith.constant 0 : index
    %55 = vector.load %arg12[%c0_28, %c0_29] : memref<4x32xf32, #tpu.memory_space<vmem>>, vector<4x32xf32>
    %56 = arith.mulf %47, %54 : vector<16x4xf32>
    %cst_30 = arith.constant dense<0.000000e+00> : vector<16x32xf32>
    %57 = tpu.matmul %56, %55, %cst_30 {dimension_numbers = #tpu.dot_dimension_numbers<[1], [0], [0], [1], [0, 0, 1, 1], [], []>} : vector<16x4xf32>, vector<4x32xf32>, vector<16x32xf32> -> vector<16x32xf32>
    %58 = vector.shape_cast %54 : vector<16x4xf32> to vector<16x1x4xf32>
    %59 = vector.broadcast %58 : vector<16x1x4xf32> to vector<16x16x4xf32>
    %60 = arith.mulf %51, %59 : vector<16x16x4xf32>
    %61 = vector.shape_cast %60 : vector<16x16x4xf32> to vector<256x4xf32>
    %cst_31 = arith.constant dense<0.000000e+00> : vector<256x32xf32>
    %62 = tpu.matmul %61, %55, %cst_31 {dimension_numbers = #tpu.dot_dimension_numbers<[1], [0], [0], [1], [0, 0, 1, 1], [], []>} : vector<256x4xf32>, vector<4x32xf32>, vector<256x32xf32> -> vector<256x32xf32>
    %63 = arith.mulf %57, %25 : vector<16x32xf32>
    %64 = vector.shape_cast %62 : vector<256x32xf32> to vector<16x16x32xf32>
    %65 = arith.mulf %64, %27 : vector<16x16x32xf32>
    %cst_32 = arith.constant dense<0.000000e+00> : vector<16x32xf32>
    %66 = vector.multi_reduction <add>, %65, %cst_32 [1] : vector<16x16x32xf32> to vector<16x32xf32>
    %67 = arith.addf %63, %66 : vector<16x32xf32>
    %c0_33 = arith.constant 0 : index
    %c0_34 = arith.constant 0 : index
    %68 = vector.load %arg9[%c0_33, %c0_34] : memref<32x128xf32, #tpu.memory_space<vmem>>, vector<32x128xf32>
    %cst_35 = arith.constant dense<0.000000e+00> : vector<16x128xf32>
    %69 = tpu.matmul %67, %68, %cst_35 {dimension_numbers = #tpu.dot_dimension_numbers<[1], [0], [0], [1], [0, 0, 1, 1], [], []>} : vector<16x32xf32>, vector<32x128xf32>, vector<16x128xf32> -> vector<16x128xf32>
    %c0_36 = arith.constant 0 : index
    %c0_37 = arith.constant 0 : index
    %70 = vector.load %arg10[%c0_36, %c0_37] : memref<1x128xf32, #tpu.memory_space<vmem>>, vector<1x128xf32>
    %71 = vector.broadcast %70 : vector<1x128xf32> to vector<16x128xf32>
    %72 = arith.addf %69, %71 : vector<16x128xf32>
    %c0_38 = arith.constant 0 : index
    %c0_39 = arith.constant 0 : index
    %73 = vector.load %arg13[%c0_38, %c0_39] : memref<16x128xf32, #tpu.memory_space<vmem>>, vector<16x128xf32>
    tpu.vector_store %arg13[%c0_38, %c0_39], %72 {strides = array<i32>} : memref<16x128xf32, #tpu.memory_space<vmem>>, vector<16x128xf32>,
    return
  }
  func.func @transform_0(%arg0: i32) -> (i32, i32, i32) {
    %c0_i32 = arith.constant 0 : i32
    %c0_i32_0 = arith.constant 0 : i32
    %c0_i32_1 = arith.constant 0 : i32
    return %arg0, %c0_i32, %c0_i32_0 : i32, i32, i32
  }
  func.func @transform_1(%arg0: i32) -> (i32, i32) {
    %c0_i32 = arith.constant 0 : i32
    %c0_i32_0 = arith.constant 0 : i32
    %c0_i32_1 = arith.constant 0 : i32
    return %c0_i32, %c0_i32_0 : i32, i32
  }
  func.func @transform_2(%arg0: i32) -> (i32, i32) {
    %c0_i32 = arith.constant 0 : i32
    %c0_i32_0 = arith.constant 0 : i32
    %c0_i32_1 = arith.constant 0 : i32
    return %c0_i32, %c0_i32_0 : i32, i32
  }
  func.func @transform_3(%arg0: i32) -> (i32, i32) {
    %c0_i32 = arith.constant 0 : i32
    %c0_i32_0 = arith.constant 0 : i32
    %c0_i32_1 = arith.constant 0 : i32
    return %c0_i32, %c0_i32_0 : i32, i32
  }
  func.func @transform_4(%arg0: i32) -> (i32, i32) {
    %c0_i32 = arith.constant 0 : i32
    %c0_i32_0 = arith.constant 0 : i32
    %c0_i32_1 = arith.constant 0 : i32
    return %c0_i32, %c0_i32_0 : i32, i32
  }
  func.func @transform_5(%arg0: i32) -> (i32, i32) {
    %c0_i32 = arith.constant 0 : i32
    %c0_i32_0 = arith.constant 0 : i32
    %c0_i32_1 = arith.constant 0 : i32
    return %c0_i32, %c0_i32_0 : i32, i32
  }
  func.func @transform_6(%arg0: i32) -> (i32, i32) {
    %c0_i32 = arith.constant 0 : i32
    %c0_i32_0 = arith.constant 0 : i32
    %c0_i32_1 = arith.constant 0 : i32
    return %c0_i32, %c0_i32_0 : i32, i32
  }
  func.func @transform_7(%arg0: i32) -> (i32, i32) {
    %c0_i32 = arith.constant 0 : i32
    %c0_i32_0 = arith.constant 0 : i32
    %c0_i32_1 = arith.constant 0 : i32
    return %c0_i32, %c0_i32_0 : i32, i32
  }
  func.func @transform_8(%arg0: i32) -> (i32, i32) {
    %c0_i32 = arith.constant 0 : i32
    %c0_i32_0 = arith.constant 0 : i32
    %c0_i32_1 = arith.constant 0 : i32
    return %c0_i32, %c0_i32_0 : i32, i32
  }
  func.func @transform_9(%arg0: i32) -> (i32, i32) {
    %c0_i32 = arith.constant 0 : i32
    %c0_i32_0 = arith.constant 0 : i32
    %c0_i32_1 = arith.constant 0 : i32
    return %c0_i32, %c0_i32_0 : i32, i32
  }
  func.func @transform_10(%arg0: i32) -> (i32, i32) {
    %c0_i32 = arith.constant 0 : i32
    %c0_i32_0 = arith.constant 0 : i32
    %c0_i32_1 = arith.constant 0 : i32
    return %c0_i32, %c0_i32_0 : i32, i32
  }
  func.func @transform_11(%arg0: i32) -> (i32, i32) {
    %c0_i32 = arith.constant 0 : i32
    %c0_i32_0 = arith.constant 0 : i32
    %c0_i32_1 = arith.constant 0 : i32
    return %c0_i32, %c0_i32_0 : i32, i32
  }
  func.func @transform_12(%arg0: i32) -> (i32, i32) {
    %c0_i32 = arith.constant 0 : i32
    %c0_i32_0 = arith.constant 0 : i32
    return %arg0, %c0_i32 : i32, i32
  }
}

</mosaic_0001>

<bundles_post_ra>
// kernel: tpu_custom_call.1
= control target key start
LH: loop header
LB: loop body
LE: loop exit
PB: predicated region body
PF: predicated region fallthrough
CT: control target
= control target key end

     0   :  { %17 = vsyncpa [#allocation3], 0  ;;  %s5371_s0 = inlined_call_operand.hbm [shape: f32[16,16,32], index: 0, kind: input, shape index: {}]   ;;  %s5372_s1 = inlined_call_operand.hbm [shape: f32[16,32], index: 1, kind: input, shape index: {}]   ;;  %s5373_s2 = inlined_call_operand.vmem [shape: f32[1,32], index: 2, kind: input, shape index: {}]   ;;  %s5374_s3 = inlined_call_operand.vmem [shape: f32[32,32], index: 3, kind: input, shape index: {}]   ;;  %s5375_s4 = inlined_call_operand.hbm [shape: f32[32,64], index: 4, kind: input, shape index: {}]   ;;  %s5376_s5 = inlined_call_operand.vmem [shape: f32[1,32], index: 5, kind: input, shape index: {}]   ;;  %s5377_s6 = inlined_call_operand.vmem [shape: f32[1,64], index: 6, kind: input, shape index: {}]   ;;  %s5378_s7 = inlined_call_operand.vmem [shape: f32[1,64], index: 7, kind: input, shape index: {}]   ;;  %s5379_s8 = inlined_call_operand.hbm [shape: f32[32,128], index: 8, kind: input, shape index: {}]   ;;  %s5380_s9 = inlined_call_operand.vmem [shape: f32[1,128], index: 9, kind: input, shape index: {}]   ;;  %s5381_s10 = inlined_call_operand.vmem [shape: f32[32,4], index: 10, kind: input, shape index: {}]   ;;  %s5382_s11 = inlined_call_operand.vmem [shape: f32[4,32], index: 11, kind: input, shape index: {}]   ;;  %s5383_s12 = inlined_call_operand.hbm [shape: f32[16,128], index: 12, kind: output, shape index: {}]  }
   0x1   :  { %18 = vsyncpa [#allocation6], 0 }
   0x2   :  { %19 = vsyncpa [#allocation9], 0 }
   0x3   :  { %20 = vsyncpa [#allocation4], 0  ;;  %s4028_s21 = smov [#allocation5]   ;;  %s4029_s23 = smov [#allocation2]  }
   0x4   :  { %s38_s22 = sshll.u32 %s4028_s21, 4  ;;  %s26_s24 = sshll.u32 %s4029_s23, 4  ;;  %s39_s22 = int_to_ptr.vmem [resolvable:$true] %s38_s22  ;;  %s27_s24 = int_to_ptr.vmem [resolvable:$true] %s26_s24 }
   0x5   :  { %s3928_s25 = scalar_lea.vmem %s39_s22, 256  ;;  %p3933_p1 = scmp.lt.s32.totalorder %s39_s22, %s39_s22 }
   0x6   :  { %p3929_p0 = scmp.ne.s32.totalorder %s39_s22, %s3928_s25  ;;  %p3934_p2 = scmp.lt.s32.totalorder %s3928_s25, %s3928_s25 }
   0x8   :  { %p3935_p3 = por %p3934_p2, %p3933_p1 }
   0xa   :  { %p3936_p4 = pnand %p3935_p3, %p3929_p0 }
   0xc   :  { %3939 = shalt.err (!%p3936_p4)
}
   0xd   :  { %s4030_s26 = smov 128   ;;  %s4031_s27 = smov 8  }
   0xe   :  { %44 = dma.hbm_to_vmem [thread:$0]  %s5372_s1, 256, %s39_s22, [#allocation6], %s4030_s26, %s4030_s26, %s4031_s27  }
   0xf   :  { %s3948_s30 = scalar_lea.vmem %s27_s24, 4096  ;;  %p3953_p6 = scmp.lt.s32.totalorder %s27_s24, %s27_s24 }
  0x10   :  { %p3949_p5 = scmp.ne.s32.totalorder %s27_s24, %s3948_s30  ;;  %p3954_p7 = scmp.lt.s32.totalorder %s3948_s30, %s3948_s30 }
  0x12   :  { %p3955_p8 = por %p3954_p7, %p3953_p6 }
  0x14   :  { %p3956_p9 = pnand %p3955_p8, %p3949_p5 }
  0x16   :  { %3959 = shalt.err (!%p3956_p9)
}
  0x17   :  { %32 = dma.hbm_to_vmem [thread:$0]  %s5371_s0, 4096, %s27_s24, [#allocation3], %s4030_s26, %s4030_s26, %s4031_s27  }
  0x18   :  { %s4032_s15 = smov [#allocation7]   ;;  %s4033_s17 = smov [#allocation8]  }
  0x19   :  { %s54_s16 = sshll.u32 %s4032_s15, 4  ;;  %s72_s18 = sshll.u32 %s4033_s17, 4  ;;  %s55_s16 = int_to_ptr.vmem [resolvable:$true] %s54_s16  ;;  %s73_s18 = int_to_ptr.vmem [resolvable:$true] %s72_s18 }
  0x1a   :  { %s3968_s1 = scalar_lea.vmem %s55_s16, 512  ;;  %p3973_p11 = scmp.lt.s32.totalorder %s55_s16, %s55_s16 }
  0x1b   :  { %p3969_p10 = scmp.ne.s32.totalorder %s55_s16, %s3968_s1  ;;  %p3974_p12 = scmp.lt.s32.totalorder %s3968_s1, %s3968_s1 }
  0x1d   :  { %p3975_p13 = por %p3974_p12, %p3973_p11 }
  0x1f   :  { %p3976_p0 = pnand %p3975_p13, %p3969_p10 }
  0x21   :  { %3979 = shalt.err (!%p3976_p0)
}
  0x22   :  { %60 = dma.hbm_to_vmem [thread:$0]  %s5375_s4, 512, %s55_s16, [#allocation6], %s4030_s26, %s4030_s26, %s4031_s27  }
  0x23   :  { %s3988_s0 = scalar_lea.vmem %s73_s18, 512  ;;  %p3993_p2 = scmp.lt.s32.totalorder %s73_s18, %s73_s18 }
  0x24   :  { %p3989_p1 = scmp.ne.s32.totalorder %s73_s18, %s3988_s0  ;;  %p3994_p3 = scmp.lt.s32.totalorder %s3988_s0, %s3988_s0 }
  0x26   :  { %p3995_p4 = por %p3994_p3, %p3993_p2 }
  0x28   :  { %p3996_p5 = pnand %p3995_p4, %p3989_p1 }
  0x2a   :  { %3999 = shalt.err (!%p3996_p5)
}
  0x2b   :  { %78 = dma.hbm_to_vmem [thread:$0]  %s5379_s8, 512, %s73_s18, [#allocation9], %s4030_s26, %s4030_s26, %s4031_s27  }
  0x2c   :  { %4020 = dma.done.wait [#allocation3], 4096  }
  0x2d   :  { %4021 = vsyncadd [#allocation3], 4294963200 }
  0x2e   :  { %4022 = dma.done.wait [#allocation6], 768  }
  0x2f   :  { %4023 = vsyncadd [#allocation6], 4294966528 }
  0x30   :  { %4024 = dma.done.wait [#allocation9], 512  }
  0x31   :  { %4025 = vsyncadd [#allocation9], 4294966784  ;;  %v351_v0 = vld [vmem:[#allocation7 + $0x18] sm:$0xff]  ;;  %v350_v1 = vld [vmem:[#allocation7 + $0x10] sm:$0xff]  ;;  %vm163_vm0 = vcmask 261120   ;;  %vm892_vm1 = vcmask 1041409  }
  0x32   :  { %3631 = vmatprep.subr.mxu0 %v351_v0  ;;  %3831 = vmatprep.subr.mxu1 %v351_v0  ;;  %v349_v2 = vld [vmem:[#allocation7 + $0x8] sm:$0xff]  ;;  %v97_v3 = vld [vmem:[#allocation2] sm:$0xff]  ;;  %v98_v4 = vld [vmem:[#allocation2 + $0x8] sm:$0xff]  ;;  %vm895_vm2 = vcmask 1042434   ;;  %vm898_vm3 = vcmask 1043459   ;;  %vm901_vm4 = vcmask 1044484  }
  0x33   :  { %3632 = vmatpush3.msra.mxu0 %v351_v0  ;;  %3835 = vmatpush3.msra.mxu1 %v351_v0  ;;  %v348_v5 = vld [vmem:[#allocation7] sm:$0xff]  ;;  %v4126_v6 = vld [vmem:[#allocation5] sm:$0xff]  ;;  %v164_v7 = vsel %vm163_vm0, %v97_v3, 0.0  ;;  %v165_v8 = vsel %vm163_vm0, %v98_v4, 0.0  ;;  %v4132_v11 = vld [vmem:[#allocation2 + $0x88] sm:$0xff]  ;;  %vm904_vm5 = vcmask 1045509  }
  0x34   :  { %v4130_v9 = vld [vmem:[#allocation2 + $0x80] sm:$0xff]  ;;  %3633 = vmatprep.subr.mxu0 %v350_v1  ;;  %3832 = vmatprep.subr.mxu1 %v350_v1  ;;  %v166_v10 = vadd.f32 %v165_v8, %v164_v7  ;;  %v4134_v12 = vld [vmem:[#allocation2 + $0x90] sm:$0xff]  ;;  %v4136_v13 = vld [vmem:[#allocation2 + $0x98] sm:$0xff]  ;;  %v131_v15 = vadd.f32 %v4126_v6, %v97_v3  ;;  %v237_v18 = vsel %vm163_vm0, %v4132_v11, 0.0  ;;  %vm907_vm6 = vcmask 1046534   ;;  %s4036_s23 = smov [#allocation10]  }
  0x35   :  { %v236_v14 = vsel %vm163_vm0, %v4130_v9, 0.0  ;;  %3634 = vmatpush3.msra.mxu0 %v350_v1  ;;  %3836 = vmatpush3.msra.mxu1 %v350_v1  ;;  %v117_v16 = vld [vmem:[#allocation2 + $0xa0] sm:$0xff]  ;;  %v118_v17 = vld [vmem:[#allocation2 + $0xa8] sm:$0xff]  ;;  %v245_v19 = vsel %vm163_vm0, %v4134_v12, 0.0  ;;  %v246_v20 = vsel %vm163_vm0, %v4136_v13, 0.0  ;;  %v99_v26 = vld [vmem:[#allocation2 + $0x10] sm:$0xff]  ;;  %v4177_v1 = vadd.f32 %v4126_v6, %v4130_v9 }
  0x36   :  { %v4147_v21 = vld [vmem:[#allocation5 + $0x8] sm:$0xff]  ;;  %3635 = vmatprep.subr.mxu0 %v349_v2  ;;  %3833 = vmatprep.subr.mxu1 %v349_v2  ;;  %v167_v22 = vrot.slane %v166_v10, 4  ;;  %v151_v23 = vadd.f32 %v4126_v6, %v117_v16  ;;  %v238_v24 = vadd.f32 %v237_v18, %v236_v14  ;;  %v247_v25 = vadd.f32 %v246_v20, %v245_v19  ;;  %v119_v27 = vld [vmem:[#allocation2 + $0xb0] sm:$0xff]  ;;  %v100_v36 = vld [vmem:[#allocation2 + $0x18] sm:$0xff]  ;;  %s3380_s24 = sshll.u32 %s4036_s23, 4  ;;  %s3381_s24 = int_to_ptr.vmem [resolvable:$true] %s3380_s24 }
  0x37   :  { %3636 = vmatpush3.msra.mxu0 %v349_v2  ;;  %3837 = vmatpush3.msra.mxu1 %v349_v2  ;;  %v254_v28 = vsel %vm163_vm0, %v117_v16, 0.0  ;;  %v255_v29 = vsel %vm163_vm0, %v118_v17, 0.0  ;;  %v132_v30 = vadd.f32 %v4147_v21, %v98_v4  ;;  %v152_v31 = vadd.f32 %v4147_v21, %v118_v17  ;;  %v120_v37 = vld [vmem:[#allocation2 + $0xb8] sm:$0xff]  ;;  %v101_v55 = vld [vmem:[#allocation2 + $0x20] sm:$0xff]  ;;  %v866_v59 = vld [vmem:[%s5374_s3 + $0x10] sm:$0xff]  ;;  %s4000_s25 = scalar_lea.vmem %s3381_s24, 256  ;;  %p4005_p7 = scmp.lt.s32.totalorder %s3381_s24, %s3381_s24 }
  0x38   :  { %3637 = vmatprep.subr.mxu0 %v348_v5  ;;  %3834 = vmatprep.subr.mxu1 %v348_v5  ;;  %v168_v32 = vadd.f32 %v167_v22, %v166_v10  ;;  %v239_v33 = vrot.slane %v238_v24, 4  ;;  %v248_v34 = vrot.slane %v247_v25, 4  ;;  %v256_v35 = vadd.f32 %v255_v29, %v254_v28  ;;  %v867_v50 = vld [vmem:[%s5374_s3 + $0x18] sm:$0xff]  ;;  %v121_v63 = vld [vmem:[#allocation2 + $0xc0] sm:$0xff]  ;;  %v102_v0 = vld [vmem:[#allocation2 + $0x28] sm:$0xff]  ;;  %p4001_p6 = scmp.ne.s32.totalorder %s3381_s24, %s4000_s25  ;;  %p4006_p8 = scmp.lt.s32.totalorder %s4000_s25, %s4000_s25 }
  0x39   :  { %3638 = vmatpush3.msra.mxu0 %v348_v5  ;;  %3838 = vmatpush3.msra.mxu1 %v348_v5  ;;  %v133_v38 = vadd.f32 %v4126_v6, %v99_v26  ;;  %v173_v39 = vsel %vm163_vm0, %v99_v26, 0.0  ;;  %v153_v40 = vadd.f32 %v4126_v6, %v119_v27  ;;  %v263_v41 = vsel %vm163_vm0, %v119_v27, 0.0  ;;  %v865_v7 = vld [vmem:[%s5374_s3 + $0x8] sm:$0xff]  ;;  %v864_v19 = vld [vmem:[%s5374_s3] sm:$0xff] }
  0x3a   :  { %v169_v42 = vrot.slane %v168_v32, 2  ;;  %3639 = vmatprep.mubr.msk.f32.mxu0 %vm163_vm0, %v131_v15  ;;  %v240_v43 = vadd.f32 %v239_v33, %v238_v24  ;;  %v249_v44 = vadd.f32 %v248_v34, %v247_v25  ;;  %v257_v45 = vrot.slane %v256_v35, 4  ;;  %3669 = vmatprep.mubr.msk.f32.mxu1 %vm163_vm0, %v151_v23  ;;  %v122_v25 = vld [vmem:[#allocation2 + $0xc8] sm:$0xff]  ;;  %v4197_v26 = vld [vmem:[%s5373_s2] ss:$0 sm:$0xff]  ;;  %p4007_p9 = por %p4006_p8, %p4005_p7 }
  0x3b   :  { %3640 = vmatmul.mubr.msk.f32.vlgmr.msra.gmra.mxu0 %vm163_vm0, %v132_v30  ;;  %3670 = vmatmul.mubr.msk.f32.vlgmr.msra.gmra.mxu1 %vm163_vm0, %v152_v31  ;;  %v134_v46 = vadd.f32 %v4147_v21, %v100_v36  ;;  %v174_v47 = vsel %vm163_vm0, %v100_v36, 0.0  ;;  %v154_v48 = vadd.f32 %v4147_v21, %v120_v37  ;;  %v264_v49 = vsel %vm163_vm0, %v120_v37, 0.0 }
  0x3c   :  { %v170_v51 = vadd.f32 %v169_v42, %v168_v32  ;;  %v241_v52 = vrot.slane %v240_v43, 2  ;;  %v250_v53 = vrot.slane %v249_v44, 2  ;;  %v258_v54 = vadd.f32 %v257_v45, %v256_v35  ;;  %3642 = vmatprep.mubr.msk.f32.mxu0 %vm163_vm0, %v133_v38  ;;  %3672 = vmatprep.mubr.msk.f32.mxu1 %vm163_vm0, %v153_v40  ;;  %p4008_p10 = pnand %p4007_p9, %p4001_p6 }
  0x3d   :  { %v175_v56 = vadd.f32 %v174_v47, %v173_v39  ;;  %v265_v57 = vadd.f32 %v264_v49, %v263_v41  ;;  %v135_v58 = vadd.f32 %v4126_v6, %v101_v55  ;;  %3687 = vmatprep.subr.mxu1 %v867_v50  ;;  %v182_v4 = vsel %vm163_vm0, %v101_v55, 0.0 }
  0x3e   :  { %v242_v60 = vadd.f32 %v241_v52, %v240_v43  ;;  %v251_v61 = vadd.f32 %v250_v53, %v249_v44  ;;  %v259_v62 = vrot.slane %v258_v54, 2  ;;  %3688 = vmatpush3.msra.mxu1 %v867_v50  ;;  %v155_v5 = vadd.f32 %v4126_v6, %v121_v63  ;;  %v103_v43 = vld [vmem:[#allocation2 + $0x30] sm:$0xff] }
  0x3f   :  { %v176_v2 = vrot.slane %v175_v56, 4  ;;  %3643 = vmatmul.mubr.msk.f32.gmra.mxu0 %vm163_vm0, %v134_v46  ;;  %v266_v3 = vrot.slane %v265_v57, 4  ;;  %3673 = vmatmul.mubr.msk.f32.gmra.mxu1 %vm163_vm0, %v154_v48  ;;  %v171_v8 = vrot.slane %v170_v51, 1  ;;  %v136_v17 = vadd.f32 %v4147_v21, %v102_v0  ;;  %v123_v52 = vld [vmem:[#allocation2 + $0xd0] sm:$0xff] }
  0x40   :  { %v243_v10 = vrot.slane %v242_v60, 1  ;;  %v252_v14 = vrot.slane %v251_v61, 1  ;;  %v260_v9 = vadd.f32 %v259_v62, %v258_v54  ;;  %3645 = vmatprep.mubr.msk.f32.mxu0 %vm163_vm0, %v135_v58  ;;  %3689 = vmatprep.subr.mxu1 %v866_v59  ;;  %v183_v18 = vsel %vm163_vm0, %v102_v0, 0.0 }
  0x41   :  { %v177_v15 = vadd.f32 %v176_v2, %v175_v56  ;;  %v267_v16 = vadd.f32 %v266_v3, %v265_v57  ;;  %3675 = vmatprep.mubr.msk.f32.mxu1 %vm163_vm0, %v155_v5  ;;  %3690 = vmatpush3.msra.mxu1 %v866_v59  ;;  %v272_v24 = vsel %vm163_vm0, %v121_v63, 0.0  ;;  %v184_v29 = vadd.f32 %v183_v18, %v182_v4  ;;  %v104_v57 = vld [vmem:[#allocation2 + $0x38] sm:$0xff] }
  0x42   :  { %v244_v20 = vadd.f32 %v243_v10, %v242_v60  ;;  %v253_v22 = vadd.f32 %v252_v14, %v251_v61  ;;  %v261_v23 = vrot.slane %v260_v9, 1  ;;  %3691 = vmatprep.subr.mxu1 %v865_v7  ;;  %v156_v30 = vadd.f32 %v4147_v21, %v122_v25  ;;  %v124_v3 = vld [vmem:[#allocation2 + $0xd8] sm:$0xff]  ;;  %v105_v10 = vld [vmem:[#allocation2 + $0x40] sm:$0xff] }
  0x43   :  { %v178_v27 = vrot.slane %v177_v15, 2  ;;  %v268_v28 = vrot.slane %v267_v16, 2  ;;  %3646 = vmatmul.mubr.msk.f32.gmra.mxu0 %vm163_vm0, %v136_v17  ;;  %3692 = vmatpush3.msra.mxu1 %v865_v7  ;;  %v172_v31 = vadd.f32 %v171_v8, %v170_v51  ;;  %v185_v37 = vrot.slane %v184_v29, 4  ;;  %v125_v17 = vld [vmem:[#allocation2 + $0xe0] sm:$0xff] }
  0x44   :  { %v262_v32 = vadd.f32 %v261_v23, %v260_v9  ;;  %v317_v33 = vmul.f32 0.0625, %v244_v20  ;;  %v318_v34 = vmul.f32 0.0625, %v253_v22  ;;  %3693 = vmatprep.subr.mxu1 %v864_v19  ;;  %v273_v38 = vsel %vm163_vm0, %v122_v25, 0.0  ;;  %3676 = vmatmul.mubr.msk.f32.gmra.mxu1 %vm163_vm0, %v156_v30  ;;  %v106_v23 = vld [vmem:[#allocation2 + $0x48] sm:$0xff] }
  0x45   :  { %v179_v35 = vadd.f32 %v178_v27, %v177_v15  ;;  %v269_v36 = vadd.f32 %v268_v28, %v267_v16  ;;  %v274_v42 = vadd.f32 %v273_v38, %v272_v24  ;;  %3694 = vmatpush3.msra.mxu1 %v864_v19  ;;  %v186_v46 = vadd.f32 %v185_v37, %v184_v29 }
  0x46   :  { %v319_v39 = vmul.f32 0.0625, %v262_v32  ;;  %v340_v40 = vadd.f32 %v4197_v26, %v317_v33  ;;  %v341_v41 = vadd.f32 %v4197_v26, %v318_v34  ;;  %v137_v47 = vadd.f32 %v4126_v6, %v103_v43  ;;  %v126_v33 = vld [vmem:[#allocation2 + $0xe8] sm:$0xff] }
  0x47   :  { %v180_v44 = vrot.slane %v179_v35, 1  ;;  %v270_v45 = vrot.slane %v269_v36, 1  ;;  %v309_v48 = vmul.f32 0.0625, %v172_v31  ;;  %v275_v51 = vrot.slane %v274_v42, 4 }
  0x48   :  { %v342_v49 = vadd.f32 %v4197_v26, %v319_v39  ;;  %v912_v50 = vrot.slane %v341_v41, 7  ;;  %v187_v55 = vrot.slane %v186_v46, 2  ;;  %3648 = vmatprep.mubr.msk.f32.mxu0 %vm163_vm0, %v137_v47  ;;  %v157_v56 = vadd.f32 %v4126_v6, %v123_v52  ;;  %v127_v47 = vld [vmem:[#allocation2 + $0xf0] sm:$0xff] }
  0x49   :  { %v181_v53 = vadd.f32 %v180_v44, %v179_v35  ;;  %v271_v54 = vadd.f32 %v270_v45, %v269_v36  ;;  %v276_v60 = vadd.f32 %v275_v51, %v274_v42  ;;  %v191_v61 = vsel %vm163_vm0, %v103_v43, 0.0  ;;  %v107_v42 = vld [vmem:[#allocation2 + $0x50] sm:$0xff] }
  0x4a   :  { %v913_v58 = vsel %vm892_vm1, %v912_v50, %v340_v40  ;;  %v914_v59 = vrot.slane %v342_v49, 6  ;;  %v188_v0 = vadd.f32 %v187_v55, %v186_v46  ;;  %3678 = vmatprep.mubr.msk.f32.mxu1 %vm163_vm0, %v157_v56  ;;  %v138_v2 = vadd.f32 %v4147_v21, %v104_v57 }
  0x4b   :  { %v310_v62 = vmul.f32 0.0625, %v181_v53  ;;  %v320_v63 = vmul.f32 0.0625, %v271_v54  ;;  %v4214_v4 = vadd.f32 %v4197_v26, %v309_v48  ;;  %v277_v5 = vrot.slane %v276_v60, 2 }
  0x4c   :  { %v192_v7 = vsel %vm163_vm0, %v104_v57, 0.0  ;;  %v158_v8 = vadd.f32 %v4147_v21, %v124_v3  ;;  %v4219_v14 = vsel %vm895_vm2, %v914_v59, %v913_v58  ;;  %v189_v9 = vrot.slane %v188_v0, 1  ;;  %3649 = vmatmul.mubr.msk.f32.gmra.mxu0 %vm163_vm0, %v138_v2 }
  0x4d   :  { %v281_v15 = vsel %vm163_vm0, %v123_v52, 0.0  ;;  %v193_v16 = vadd.f32 %v192_v7, %v191_v61  ;;  %v4224_v18 = vadd.f32 %v4197_v26, %v310_v62  ;;  %v278_v19 = vadd.f32 %v277_v5, %v276_v60  ;;  %v108_v52 = vld [vmem:[#allocation2 + $0x58] sm:$0xff] }
  0x4e   :  { %v282_v20 = vsel %vm163_vm0, %v124_v3, 0.0  ;;  %3679 = vmatmul.mubr.msk.f32.gmra.mxu1 %vm163_vm0, %v158_v8  ;;  %v139_v22 = vadd.f32 %v4126_v6, %v105_v10  ;;  %v4230_v24 = vadd.f32 %v4197_v26, %v320_v63  ;;  %v190_v25 = vadd.f32 %v189_v9, %v188_v0  ;;  %v128_v61 = vld [vmem:[#allocation2 + $0xf8] sm:$0xff]  ;;  %v110_v9 = vld [vmem:[#allocation2 + $0x68] sm:$0xff] }
  0x4f   :  { %v194_v27 = vrot.slane %v193_v16, 4  ;;  %v200_v28 = vsel %vm163_vm0, %v105_v10, 0.0  ;;  %v279_v29 = vrot.slane %v278_v19, 1  ;;  %v283_v30 = vadd.f32 %v282_v20, %v281_v15  ;;  %v109_v10 = vld [vmem:[#allocation2 + $0x60] sm:$0xff] }
  0x50   :  { %3651 = vmatprep.mubr.msk.f32.mxu0 %vm163_vm0, %v139_v22  ;;  %v159_v31 = vadd.f32 %v4126_v6, %v125_v17  ;;  %v290_v32 = vsel %vm163_vm0, %v125_v17, 0.0  ;;  %v311_v34 = vmul.f32 0.0625, %v190_v25  ;;  %v140_v36 = vadd.f32 %v4147_v21, %v106_v23 }
  0x51   :  { %v195_v35 = vadd.f32 %v194_v27, %v193_v16  ;;  %v201_v37 = vsel %vm163_vm0, %v106_v23, 0.0  ;;  %v280_v38 = vadd.f32 %v279_v29, %v278_v19  ;;  %v284_v39 = vrot.slane %v283_v30, 4  ;;  %v111_v27 = vld [vmem:[#allocation2 + $0x70] sm:$0xff] }
  0x52   :  { %3681 = vmatprep.mubr.msk.f32.mxu1 %vm163_vm0, %v159_v31  ;;  %v202_v40 = vadd.f32 %v201_v37, %v200_v28  ;;  %v160_v41 = vadd.f32 %v4147_v21, %v126_v33  ;;  %v891_v43 = vrot.slane %v4224_v18, 7  ;;  %3652 = vmatmul.mubr.msk.f32.gmra.mxu0 %vm163_vm0, %v140_v36  ;;  %v291_v45 = vsel %vm163_vm0, %v126_v33, 0.0  ;;  %v4263_v28 = vld [vmem:[#allocation2 + $0x78] sm:$0xff] }
  0x53   :  { %v196_v44 = vrot.slane %v195_v35, 2  ;;  %v141_v46 = vadd.f32 %v4126_v6, %v107_v42  ;;  %v321_v48 = vmul.f32 0.0625, %v280_v38  ;;  %v285_v49 = vadd.f32 %v284_v39, %v283_v30 }
  0x54   :  { %v203_v50 = vrot.slane %v202_v40, 4  ;;  %v292_v51 = vadd.f32 %v291_v45, %v290_v32  ;;  %3682 = vmatmul.mubr.msk.f32.gmra.mxu1 %vm163_vm0, %v160_v41  ;;  %v4246_v53 = vadd.f32 %v4197_v26, %v311_v34  ;;  %v209_v55 = vsel %vm163_vm0, %v107_v42, 0.0 }
  0x55   :  { %v197_v54 = vadd.f32 %v196_v44, %v195_v35  ;;  %3654 = vmatprep.mubr.msk.f32.mxu0 %vm163_vm0, %v141_v46  ;;  %v161_v56 = vadd.f32 %v4126_v6, %v127_v47  ;;  %v286_v57 = vrot.slane %v285_v49, 2  ;;  %v299_v60 = vsel %vm163_vm0, %v127_v47, 0.0 }
  0x56   :  { %v204_v58 = vadd.f32 %v203_v50, %v202_v40  ;;  %v293_v59 = vrot.slane %v292_v51, 4  ;;  %v142_v63 = vadd.f32 %v4147_v21, %v108_v52  ;;  %v210_v0 = vsel %vm163_vm0, %v108_v52, 0.0 }
  0x57   :  { %v198_v62 = vrot.slane %v197_v54, 1  ;;  %3684 = vmatprep.mubr.msk.f32.mxu1 %vm163_vm0, %v161_v56  ;;  %v162_v2 = vadd.f32 %v4147_v21, %v128_v61  ;;  %v4257_v3 = vadd.f32 %v4197_v26, %v321_v48  ;;  %v287_v5 = vadd.f32 %v286_v57, %v285_v49 }
  0x58   :  { %v205_v7 = vrot.slane %v204_v58, 2  ;;  %v294_v8 = vadd.f32 %v293_v59, %v292_v51  ;;  %v211_v16 = vadd.f32 %v210_v0, %v209_v55  ;;  %3655 = vmatmul.mubr.msk.f32.gmra.mxu0 %vm163_vm0, %v142_v63  ;;  %v300_v17 = vsel %vm163_vm0, %v128_v61, 0.0 }
  0x59   :  { %v199_v15 = vadd.f32 %v198_v62, %v197_v54  ;;  %3685 = vmatmul.mubr.msk.f32.gmra.mxu1 %vm163_vm0, %v162_v2  ;;  %v143_v19 = vadd.f32 %v4126_v6, %v109_v10  ;;  %v288_v20 = vrot.slane %v287_v5, 1  ;;  %v301_v25 = vadd.f32 %v300_v17, %v299_v60 }
  0x5a   :  { %v206_v22 = vadd.f32 %v205_v7, %v204_v58  ;;  %v295_v23 = vrot.slane %v294_v8, 2  ;;  %v212_v30 = vrot.slane %v211_v16, 4  ;;  %v218_v31 = vsel %vm163_vm0, %v109_v10, 0.0 }
  0x5b   :  { %v312_v29 = vmul.f32 0.0625, %v199_v15  ;;  %v219_v32 = vsel %vm163_vm0, %v110_v9, 0.0  ;;  %3657 = vmatprep.mubr.msk.f32.mxu0 %vm163_vm0, %v143_v19  ;;  %v289_v33 = vadd.f32 %v288_v20, %v287_v5  ;;  %v302_v36 = vrot.slane %v301_v25, 4 }
  0x5c   :  { %v207_v34 = vrot.slane %v206_v22, 1  ;;  %v296_v35 = vadd.f32 %v295_v23, %v294_v8  ;;  %v213_v37 = vadd.f32 %v212_v30, %v211_v16  ;;  %v220_v38 = vadd.f32 %v219_v32, %v218_v31 }
  0x5d   :  { %v227_v39 = vsel %vm163_vm0, %v111_v27, 0.0  ;;  %v228_v40 = vsel %vm163_vm0, %v4263_v28, 0.0  ;;  %v322_v41 = vmul.f32 0.0625, %v289_v33  ;;  %v303_v45 = vadd.f32 %v302_v36, %v301_v25 }
  0x5e   :  { %v208_v42 = vadd.f32 %v207_v34, %v206_v22  ;;  %v297_v44 = vrot.slane %v296_v35, 1  ;;  %v214_v46 = vrot.slane %v213_v37, 2  ;;  %v221_v47 = vrot.slane %v220_v38, 4 }
  0x5f   :  { %v229_v48 = vadd.f32 %v228_v40, %v227_v39  ;;  %v335_v49 = vadd.f32 %v4197_v26, %v312_v29  ;;  %v304_v52 = vrot.slane %v303_v45, 2  ;;  %v893_v54 = vsel %vm892_vm1, %v891_v43, %v4214_v4 }
  0x60   :  { %v313_v50 = vmul.f32 0.0625, %v208_v42  ;;  %v298_v51 = vadd.f32 %v297_v44, %v296_v35  ;;  %v215_v55 = vadd.f32 %v214_v46, %v213_v37  ;;  %v222_v56 = vadd.f32 %v221_v47, %v220_v38 }
  0x61   :  { %v230_v57 = vrot.slane %v229_v48, 4  ;;  %v894_v58 = vrot.slane %v4246_v53, 6  ;;  %v916_v59 = vrot.slane %v4230_v24, 5  ;;  %v305_v61 = vadd.f32 %v304_v52, %v303_v45 }
  0x62   :  { %v323_v60 = vmul.f32 0.0625, %v298_v51  ;;  %v336_v62 = vadd.f32 %v4197_v26, %v313_v50  ;;  %v216_v63 = vrot.slane %v215_v55, 1  ;;  %v223_v0 = vrot.slane %v222_v56, 2  ;;  %v4340_v50 = vld [vmem:[%s5381_s10] sm:$0xff] }
  0x63   :  { %v231_v2 = vadd.f32 %v230_v57, %v229_v48  ;;  %v897_v5 = vrot.slane %v335_v49, 5  ;;  %v918_v18 = vrot.slane %v4257_v3, 4  ;;  %v306_v7 = vrot.slane %v305_v61, 1  ;;  %v4350_v51 = vld [vmem:[%s5377_s6] ss:$0 sm:$0xff] }
  0x64   :  { %v896_v4 = vsel %vm895_vm2, %v894_v58, %v893_v54  ;;  %v144_v43 = vadd.f32 %v4147_v21, %v110_v9  ;;  %v224_v8 = vadd.f32 %v223_v0, %v222_v56  ;;  %v217_v53 = vadd.f32 %v216_v63, %v215_v55 }
  0x65   :  { %v232_v10 = vrot.slane %v231_v2, 2  ;;  %v345_v24 = vadd.f32 %v4197_v26, %v322_v41  ;;  %v900_v15 = vrot.slane %v336_v62, 4  ;;  %v307_v16 = vadd.f32 %v306_v7, %v305_v61 }
  0x66   :  { %3658 = vmatmul.mubr.msk.f32.gmra.mxu0 %vm163_vm0, %v144_v43  ;;  %v346_v17 = vadd.f32 %v4197_v26, %v323_v60  ;;  %v917_v19 = vsel %vm898_vm3, %v916_v59, %v4219_v14  ;;  %v225_v3 = vrot.slane %v224_v8, 1  ;;  %v314_v22 = vmul.f32 0.0625, %v217_v53 }
  0x67   :  { %v233_v20 = vadd.f32 %v232_v10, %v231_v2  ;;  %v899_v23 = vsel %vm898_vm3, %v897_v5, %v896_v4  ;;  %v324_v9 = vmul.f32 0.0625, %v307_v16  ;;  %v919_v25 = vsel %vm901_vm4, %v918_v18, %v917_v19 }
  0x68   :  { %v920_v29 = vrot.slane %v345_v24, 3  ;;  %v145_v30 = vadd.f32 %v4126_v6, %v111_v27  ;;  %v226_v31 = vadd.f32 %v225_v3, %v224_v8  ;;  %v337_v33 = vadd.f32 %v4197_v26, %v314_v22 }
  0x69   :  { %v234_v32 = vrot.slane %v233_v20, 1  ;;  %v146_v34 = vadd.f32 %v4147_v21, %v4263_v28  ;;  %v902_v14 = vsel %vm901_vm4, %v900_v15, %v899_v23  ;;  %v347_v35 = vadd.f32 %v4197_v26, %v324_v9 }
  0x6a   :  { %v922_v36 = vrot.slane %v346_v17, 2  ;;  %3660 = vmatprep.mubr.msk.f32.mxu0 %vm163_vm0, %v145_v30  ;;  %v315_v38 = vmul.f32 0.0625, %v226_v31  ;;  %v903_v39 = vrot.slane %v337_v33, 3  ;;  %v148_v27 = vadd.f32 %v4147_v21, %v4132_v11 }
  0x6b   :  { %v235_v37 = vadd.f32 %v234_v32, %v233_v20  ;;  %3661 = vmatmul.mubr.msk.f32.gmra.mxu0 %vm163_vm0, %v146_v34  ;;  %v921_v40 = vsel %vm904_vm5, %v920_v29, %v919_v25  ;;  %v149_v28 = vadd.f32 %v4126_v6, %v4134_v12  ;;  %vm910_vm7 = vcmask 1047559  }
  0x6c   :  { %3663 = vmatprep.mubr.msk.f32.mxu0 %vm163_vm0, %v4177_v1  ;;  %v338_v42 = vadd.f32 %v4197_v26, %v315_v38  ;;  %v905_v44 = vsel %vm904_vm5, %v903_v39, %v902_v14  ;;  %v924_v45 = vrot.slane %v347_v35, 1  ;;  %v923_v11 = vsel %vm907_vm6, %v922_v36, %v921_v40 }
  0x6d   :  { %v316_v41 = vmul.f32 0.0625, %v235_v37  ;;  %v150_v1 = vadd.f32 %v4147_v21, %v4136_v13  ;;  %v4326_v13 = vld [vmem:[%s5381_s10 + $0x10] sm:$0xff]  ;;  %v4333_v21 = vld [vmem:[%s5381_s10 + $0x8] sm:$0xff]  ;;  %vm680_vm8 = vcmask 523264   ;;  %vm1673_vm9 = vcmask 31744  }
  0x6e   :  { %v906_v47 = vrot.slane %v338_v42, 2  ;;  %v925_v48 = vsel %vm910_vm7, %v924_v45, %v923_v11  ;;  %vm2323_vm10 = vcmask 1043456  }
  0x6f   :  { %v339_v46 = vadd.f32 %v4197_v26, %v316_v41  ;;  %3664 = vmatmul.mubr.msk.f32.gmra.mxu0 %vm163_vm0, %v148_v27  ;;  %v4321_v26 = vld [vmem:[%s5381_s10 + $0x18] sm:$0xff]  ;;  %s4034_s10 = smov 96  }
  0x70   :  { %3666 = vmatprep.mubr.msk.f32.mxu0 %vm163_vm0, %v149_v28  ;;  %v908_v6 = vsel %vm907_vm6, %v906_v47, %v905_v44  ;;  %3698 = vmatprep.subr.mxu1 %v4321_v26 }
  0x71   :  { %v909_v12 = vrot.slane %v339_v46, 1 }
  0x73   :  { %v911_v49 = vsel %vm910_vm7, %v909_v12, %v908_v6  ;;  %3667 = vmatmul.mubr.msk.f32.gmra.mxu0 %vm163_vm0, %v150_v1 }
  0x74   :  { %3695 = vmatprep.mubr.msk.f32.mxu1 %vm163_vm0, %v911_v49 }
  0x75   :  { %3696 = vmatmul.mubr.msk.f32.vlgmr.msra.gmra.mxu1 %vm163_vm0, %v925_v48 }
  0x76   :  { %3699 = vmatpush3.msra.mxu1 %v4321_v26 }
  0x77   :  { %3700 = vmatprep.subr.mxu1 %v4326_v13 }
  0x78   :  { %3701 = vmatpush3.msra.mxu1 %v4326_v13 }
  0x79   :  { %3702 = vmatprep.subr.mxu1 %v4333_v21 }
  0x7a   :  { %3703 = vmatpush3.msra.mxu1 %v4333_v21 }
  0x7b   :  { %3704 = vmatprep.subr.mxu1 %v4340_v50 }
  0x7c   :  { %3705 = vmatpush3.msra.mxu1 %v4340_v50 }
  0x7d   :  { %3709 = vmatprep.subr.mxu1 %v4321_v26 }
  0xfb   :  { %v3641_v52 = vpop.f32.mrf.mxu0  ;;  %v3671_v54 = vpop.f32.mrf.mxu1 }
  0xfc   :  { %v4353_v55 = vadd.f32 %v3641_v52, %v4350_v51  ;;  %v4356_v56 = vadd.f32 %v3671_v54, %v4350_v51 }
  0xfd   :  { %v521_v57 = vpop.f32.mrf.mxu0  ;;  %v621_v58 = vpop.f32.mrf.mxu1 }
  0xfe   :  { %5399 = vst [vmem:[#allocation15_spill] sm:$0xff] %v4356_v56  ;;  %3017 = vrot.lane.b32.xlu1 %v4356_v56, %s4034_s10  ;;  %2977 = vrot.lane.b32.xlu0 %v4353_v55, %s4034_s10  ;;  %v4363_v60 = vadd.f32 %v4350_v51, %v521_v57  ;;  %v4369_v0 = vadd.f32 %v4350_v51, %v621_v58  ;;  %v682_v25 = vsel %vm680_vm8, %v4353_v55, 0.0  ;;  %v772_v29 = vsel %vm680_vm8, %v4356_v56, 0.0 }
  0xff   :  { %v3644_v59 = vpop.f32.mrf.mxu0  ;;  %v3674_v62 = vpop.f32.mrf.mxu1 }
 0x100   :  { %v4366_v61 = vadd.f32 %v3644_v59, %v4350_v51  ;;  %5400 = vst [vmem:[#allocation16_spill] sm:$0xff] %v4369_v0  ;;  %v4372_v2 = vadd.f32 %v3674_v62, %v4350_v51  ;;  %v681_v20 = vsel %vm680_vm8, %v4363_v60, 0.0  ;;  %v771_v31 = vsel %vm680_vm8, %v4369_v0, 0.0 }
 0x101   :  { %v531_v63 = vpop.f32.mrf.mxu0  ;;  %v631_v5 = vpop.f32.mrf.mxu1  ;;  %v683_v30 = vadd.f32 %v682_v25, %v681_v20  ;;  %v773_v37 = vadd.f32 %v772_v29, %v771_v31 }
 0x102   :  { %5401 = vst [vmem:[#allocation17_spill] sm:$0xff] %v4372_v2  ;;  %2981 = vrot.lane.b32.xlu1 %v4366_v61, %s4034_s10  ;;  %2975 = vrot.lane.b32.xlu0 %v4363_v60, %s4034_s10  ;;  %v4379_v7 = vadd.f32 %v4350_v51, %v631_v5  ;;  %v4386_v4 = vadd.f32 %v4350_v51, %v531_v63  ;;  %v691_v22 = vsel %vm680_vm8, %v4366_v61, 0.0  ;;  %v781_v45 = vsel %vm680_vm8, %v4372_v2, 0.0 }
 0x103   :  { %v3647_v18 = vpop.f32.mrf.mxu0  ;;  %v684_v40 = vrot.slane %v683_v30, 4  ;;  %v774_v6 = vrot.slane %v773_v37, 4 }
 0x104   :  { %5402 = vst [vmem:[#allocation18_spill] sm:$0xff] %v4379_v7  ;;  %v3677_v43 = vpop.f32.mrf.mxu1  ;;  %v4393_v53 = vadd.f32 %v3647_v18, %v4350_v51  ;;  %v690_v16 = vsel %vm680_vm8, %v4386_v4, 0.0  ;;  %v780_v47 = vsel %vm680_vm8, %v4379_v7, 0.0 }
 0x105   :  { %v541_v8 = vpop.f32.mrf.mxu0  ;;  %v4401_v17 = vadd.f32 %v3677_v43, %v4350_v51  ;;  %v692_v23 = vadd.f32 %v691_v22, %v690_v16  ;;  %v685_v49 = vadd.f32 %v684_v40, %v683_v30  ;;  %v782_v59 = vadd.f32 %v781_v45, %v780_v47 }
 0x106   :  { %3021 = vrot.lane.b32.xlu1 %v4372_v2, %s4034_s10  ;;  %3015 = vrot.lane.b32.xlu0 %v4369_v0, %s4034_s10  ;;  %v4396_v10 = vadd.f32 %v4350_v51, %v541_v8  ;;  %v641_v24 = vpop.f32.mrf.mxu1  ;;  %v700_v28 = vsel %vm680_vm8, %v4393_v53, 0.0 }
 0x107   :  { %5403 = vst [vmem:[#allocation19_spill] sm:$0xff] %v4401_v17  ;;  %v4404_v19 = vadd.f32 %v4350_v51, %v641_v24  ;;  %v693_v14 = vrot.slane %v692_v23, 4  ;;  %v790_v62 = vsel %vm680_vm8, %v4401_v17, 0.0  ;;  %v686_v16 = vrot.slane %v685_v49, 2 }
 0x108   :  { %v699_v38 = vsel %vm680_vm8, %v4396_v10, 0.0 }
 0x109   :  { %5404 = vst [vmem:[#allocation20_spill] sm:$0xff] %v4404_v19  ;;  %v694_v46 = vadd.f32 %v693_v14, %v692_v23  ;;  %v701_v11 = vadd.f32 %v700_v28, %v699_v38  ;;  %v789_v63 = vsel %vm680_vm8, %v4404_v19, 0.0  ;;  %v687_v38 = vadd.f32 %v686_v16, %v685_v49 }
 0x10a   :  { %2979 = vrot.lane.b32.xlu1 %v4386_v4, %s4034_s10  ;;  %3019 = vrot.lane.b32.xlu0 %v4379_v7, %s4034_s10  ;;  %v791_v25 = vadd.f32 %v790_v62, %v789_v63 }
 0x10b   :  { %v695_v18 = vrot.slane %v694_v46, 2  ;;  %v702_v43 = vrot.slane %v701_v11, 4  ;;  %v688_v63 = vrot.slane %v687_v38, 1 }
 0x10c   :  { %v3650_v15 = vpop.f32.mrf.mxu0  ;;  %v792_v45 = vrot.slane %v791_v25, 4 }
 0x10d   :  { %v4425_v33 = vadd.f32 %v3650_v15, %v4350_v51  ;;  %v775_v15 = vadd.f32 %v774_v6, %v773_v37  ;;  %v696_v30 = vadd.f32 %v695_v18, %v694_v46  ;;  %v703_v31 = vadd.f32 %v702_v43, %v701_v11 }
 0x10e   :  { %2985 = vrot.lane.b32.xlu1 %v4393_v53, %s4034_s10  ;;  %2983 = vrot.lane.b32.xlu0 %v4396_v10, %s4034_s10  ;;  %v551_v3 = vpop.f32.mrf.mxu0  ;;  %v3680_v9 = vpop.f32.mrf.mxu1  ;;  %v4505_v43 = vadd.f32 %v792_v45, %v791_v25 }
 0x10f   :  { %v4428_v34 = vadd.f32 %v4350_v51, %v551_v3  ;;  %v4433_v39 = vadd.f32 %v3680_v9, %v4350_v51  ;;  %v709_v12 = vsel %vm680_vm8, %v4425_v33, 0.0  ;;  %v783_v9 = vrot.slane %v782_v59, 4 }
 0x110   :  { %v651_v35 = vpop.f32.mrf.mxu1  ;;  %v776_v14 = vrot.slane %v775_v15, 2  ;;  %v697_v46 = vrot.slane %v696_v30, 1  ;;  %v704_v47 = vrot.slane %v703_v31, 2 }
 0x111   :  { %5405 = vst [vmem:[#allocation21_spill] sm:$0xff] %v4433_v39  ;;  %v4436_v27 = vadd.f32 %v4350_v51, %v651_v35  ;;  %v708_v41 = vsel %vm680_vm8, %v4428_v34, 0.0 }
 0x112   :  { %3025 = vrot.lane.b32.xlu1 %v4401_v17, %s4034_s10  ;;  %3023 = vrot.lane.b32.xlu0 %v4404_v19, %s4034_s10  ;;  %v3653_v32 = vpop.f32.mrf.mxu0  ;;  %v710_v52 = vadd.f32 %v709_v12, %v708_v41  ;;  %v4490_v41 = vadd.f32 %v783_v9, %v782_v59  ;;  %v4492_v6 = vadd.f32 %v776_v14, %v775_v15 }
 0x113   :  { %5406 = vst [vmem:[#allocation22_spill] sm:$0xff] %v4436_v27  ;;  %v4447_v42 = vadd.f32 %v3653_v32, %v4350_v51  ;;  %v698_v16 = vadd.f32 %v697_v46, %v696_v30  ;;  %v798_v9 = vsel %vm680_vm8, %v4436_v27, 0.0  ;;  %v4539_v46 = vadd.f32 %v688_v63, %v687_v38 }
 0x114   :  { %v561_v36 = vpop.f32.mrf.mxu0  ;;  %v3683_v54 = vpop.f32.mrf.mxu1  ;;  %v711_v3 = vrot.slane %v710_v52, 4 }
 0x115   :  { %v4450_v44 = vadd.f32 %v4350_v51, %v561_v36  ;;  %v718_v5 = vsel %vm680_vm8, %v4447_v42, 0.0  ;;  %v4035_v36 = vmov 1966171168   ;;  %v4495_v12 = vadd.f32 %v3683_v54, %v4350_v51 }
 0x116   :  { %2989 = vrot.lane.b32.xlu1 %v4425_v33, %s4034_s10  ;;  %2987 = vrot.lane.b32.xlu0 %v4428_v34, %s4034_s10  ;;  %v661_v20 = vpop.f32.mrf.mxu1  ;;  %v4484_v37 = vunpack.c.l.s4 %v4035_v36  ;;  %v712_v40 = vadd.f32 %v711_v3, %v710_v52  ;;  %v705_v3 = vadd.f32 %v704_v47, %v703_v31  ;;  %v826_v47 = vmul.f32 0.0625, %v698_v16 }
 0x117   :  { %v717_v48 = vsel %vm680_vm8, %v4450_v44, 0.0  ;;  %v4499_v52 = vadd.f32 %v4350_v51, %v661_v20  ;;  %v808_v25 = vsel %vm680_vm8, %v4495_v12, 0.0 }
 0x118   :  { %v3656_v1 = vpop.f32.mrf.mxu0  ;;  %v719_v8 = vadd.f32 %v718_v5, %v717_v48  ;;  %v713_v49 = vrot.slane %v712_v40, 2 }
 0x119   :  { %v4465_v57 = vadd.f32 %v3656_v1, %v4350_v51  ;;  %v3686_v28 = vpop.f32.mrf.mxu1  ;;  %v807_v30 = vsel %vm680_vm8, %v4499_v52, 0.0 }
 0x11a   :  { %3029 = vrot.lane.b32.xlu1 %v4433_v39, %s4034_s10  ;;  %3027 = vrot.lane.b32.xlu0 %v4436_v27, %s4034_s10  ;;  %v571_v58 = vpop.f32.mrf.mxu0  ;;  %v720_v32 = vrot.slane %v719_v8, 4  ;;  %v4508_v54 = vadd.f32 %v3686_v28, %v4350_v51 }
 0x11b   :  { %v4474_v24 = vadd.f32 %v4350_v51, %v571_v58  ;;  %v727_v22 = vsel %vm680_vm8, %v4465_v57, 0.0  ;;  %v671_v59 = vpop.f32.mrf.mxu1 }
 0x11c   :  { %v721_v11 = vadd.f32 %v720_v32, %v719_v8  ;;  %5407 = vst [vmem:[#allocation23_spill] sm:$0xff] %v4508_v54  ;;  %v4511_v8 = vadd.f32 %v4350_v51, %v671_v59  ;;  %v714_v32 = vadd.f32 %v713_v49, %v712_v40  ;;  %v817_v36 = vsel %vm680_vm8, %v4508_v54, 0.0 }
 0x11d   :  { %v726_v23 = vsel %vm680_vm8, %v4474_v24, 0.0 }
 0x11e   :  { %2993 = vrot.lane.b32.xlu1 %v4447_v42, %s4034_s10  ;;  %2991 = vrot.lane.b32.xlu0 %v4450_v44, %s4034_s10  ;;  %v728_v29 = vadd.f32 %v727_v22, %v726_v23  ;;  %5408 = vst [vmem:[#allocation24_spill] sm:$0xff] %v4511_v8  ;;  %v722_v22 = vrot.slane %v721_v11, 2  ;;  %v799_v23 = vsel %vm680_vm8, %v4433_v39, 0.0  ;;  %v816_v28 = vsel %vm680_vm8, %v4511_v8, 0.0 }
 0x11f   :  { %v818_v39 = vadd.f32 %v817_v36, %v816_v28 }
 0x120   :  { %v729_v35 = vrot.slane %v728_v29, 4  ;;  %v723_v49 = vadd.f32 %v722_v22, %v721_v11  ;;  %v4550_v11 = vld [vmem:[%s5378_s7] ss:$0 sm:$0xff] }
 0x122   :  { %2997 = vrot.lane.b32.xlu1 %v4465_v57, %s4034_s10  ;;  %2995 = vrot.lane.b32.xlu0 %v4474_v24, %s4034_s10  ;;  %v730_v48 = vadd.f32 %v729_v35, %v728_v29 }
 0x124   :  { %v731_v29 = vrot.slane %v730_v48, 2 }
 0x126   :  { %v3659_v58 = vpop.f32.mrf.mxu0  ;;  %v732_v62 = vadd.f32 %v731_v29, %v730_v48 }
 0x127   :  { %v4502_v5 = vadd.f32 %v3659_v58, %v4350_v51  ;;  %v706_v58 = vrot.slane %v705_v3, 1 }
 0x128   :  { %v581_v15 = vpop.f32.mrf.mxu0  ;;  %v733_v36 = vrot.slane %v732_v62, 1 }
 0x129   :  { %v4514_v20 = vadd.f32 %v4350_v51, %v581_v15  ;;  %3001 = vrot.lane.b32.xlu1 %v4502_v5, %s4034_s10  ;;  %v736_v31 = vsel %vm680_vm8, %v4502_v5, 0.0  ;;  %v800_v15 = vadd.f32 %v799_v23, %v798_v9  ;;  %v4562_v23 = vadd.f32 %v4550_v11, %v826_v47 }
 0x12a   :  { %v707_v9 = vadd.f32 %v706_v58, %v705_v3  ;;  %v734_v7 = vadd.f32 %v733_v36, %v732_v62 }
 0x12b   :  { %v735_v14 = vsel %vm680_vm8, %v4514_v20, 0.0  ;;  %v3662_v35 = vpop.f32.mrf.mxu0  ;;  %2999 = vrot.lane.b32.xlu0 %v4514_v20, %s4034_s10 }
 0x12c   :  { %v737_v40 = vadd.f32 %v736_v31, %v735_v14  ;;  %v4537_v45 = vadd.f32 %v3662_v35, %v4350_v51  ;;  %v715_v14 = vrot.slane %v714_v32, 1  ;;  %v809_v35 = vadd.f32 %v808_v25, %v807_v30 }
 0x12d   :  { %v591_v59 = vpop.f32.mrf.mxu0  ;;  %v724_v25 = vrot.slane %v723_v49, 1  ;;  %v819_v31 = vrot.slane %v818_v39, 4 }
 0x12e   :  { %5409 = vst [vmem:[#allocation25_spill] sm:$0xff] %v4537_v45  ;;  %v738_v1 = vrot.slane %v737_v40, 4  ;;  %v4542_v18 = vadd.f32 %v4350_v51, %v591_v59  ;;  %3005 = vrot.lane.b32.xlu1 %v4537_v45, %s4034_s10  ;;  %v745_v48 = vsel %vm680_vm8, %v4537_v45, 0.0  ;;  %v716_v59 = vadd.f32 %v715_v14, %v714_v32 }
 0x12f   :  { %v3665_v38 = vpop.f32.mrf.mxu0  ;;  %v820_v45 = vadd.f32 %v819_v31, %v818_v39 }
 0x130   :  { %v739_v63 = vadd.f32 %v738_v1, %v737_v40  ;;  %v744_v16 = vsel %vm680_vm8, %v4542_v18, 0.0  ;;  %v4557_v22 = vadd.f32 %v3665_v38, %v4350_v51  ;;  %3003 = vrot.lane.b32.xlu0 %v4542_v18, %s4034_s10  ;;  %v801_v1 = vrot.slane %v800_v15, 4 }
 0x131   :  { %v746_v29 = vadd.f32 %v745_v48, %v744_v16  ;;  %v601_v30 = vpop.f32.mrf.mxu0  ;;  %v810_v38 = vrot.slane %v809_v35, 4  ;;  %v827_v16 = vmul.f32 0.0625, %v707_v9  ;;  %v828_v56 = vmul.f32 0.0625, %v716_v59 }
 0x132   :  { %5410 = vst [vmem:[#allocation26_spill] sm:$0xff] %v4557_v22  ;;  %v740_v28 = vrot.slane %v739_v63, 2  ;;  %v4565_v40 = vadd.f32 %v4350_v51, %v601_v30  ;;  %3009 = vrot.lane.b32.xlu1 %v4557_v22, %s4034_s10  ;;  %v754_v3 = vsel %vm680_vm8, %v4557_v22, 0.0  ;;  %v725_v30 = vadd.f32 %v724_v25, %v723_v49 }
 0x133   :  { %v747_v27 = vrot.slane %v746_v29, 4  ;;  %v3668_v17 = vpop.f32.mrf.mxu0  ;;  %v802_v2 = vadd.f32 %v801_v1, %v800_v15  ;;  %v850_v39 = vadd.f32 %v4550_v11, %v827_v16  ;;  %v830_v25 = vmul.f32 0.0625, %v734_v7 }
 0x134   :  { %5411 = vst [vmem:[#allocation27_spill] sm:$0xff] %v4565_v40  ;;  %v741_v47 = vadd.f32 %v740_v28, %v739_v63  ;;  %v753_v58 = vsel %vm680_vm8, %v4565_v40, 0.0  ;;  %v4574_v48 = vadd.f32 %v3668_v17, %v4350_v51  ;;  %3007 = vrot.lane.b32.xlu0 %v4565_v40, %s4034_s10  ;;  %v811_v17 = vadd.f32 %v810_v38, %v809_v35 }
 0x135   :  { %v748_v32 = vadd.f32 %v747_v27, %v746_v29  ;;  %v755_v14 = vadd.f32 %v754_v3, %v753_v58  ;;  %v611_v19 = vpop.f32.mrf.mxu0  ;;  %v5412_v35 = vrot.slane %v4490_v41, 2  ;;  %v803_v31 = vrot.slane %v802_v2, 2  ;;  %v4596_v1 = vpop.f32.mrf.mxu1 }
 0x136   :  { %v742_v63 = vrot.slane %v741_v47, 1  ;;  %v4579_v28 = vadd.f32 %v4350_v51, %v611_v19  ;;  %3013 = vrot.lane.b32.xlu1 %v4574_v48, %s4034_s10  ;;  %v763_v27 = vsel %vm680_vm8, %v4574_v48, 0.0  ;;  %v829_v51 = vmul.f32 0.0625, %v725_v30 }
 0x137   :  { %v749_v0 = vrot.slane %v748_v32, 2  ;;  %v756_v22 = vrot.slane %v755_v14, 4  ;;  %v786_v9 = vadd.f32 %v5412_v35, %v4490_v41  ;;  %v825_v29 = vmul.f32 0.0625, %v4539_v46 }
 0x138   :  { %v743_v40 = vadd.f32 %v742_v63, %v741_v47  ;;  %v762_v49 = vsel %vm680_vm8, %v4579_v28, 0.0  ;;  %3011 = vrot.lane.b32.xlu0 %v4579_v28, %s4034_s10  ;;  %v851_v41 = vadd.f32 %v4550_v11, %v828_v56  ;;  %v812_v47 = vrot.slane %v811_v17, 2  ;;  %v996_v63 = vpop.f32.mrf.mxu1 }
 0x139   :  { %v750_v19 = vadd.f32 %v749_v0, %v748_v32  ;;  %v757_v62 = vadd.f32 %v756_v22, %v755_v14  ;;  %v764_v15 = vadd.f32 %v763_v27, %v762_v49  ;;  %v5413_v22 = vrot.slane %v4505_v43, 2 }
 0x13a   :  { %3033 = vrot.lane.b32.xlu1 %v4495_v12, %s4034_s10  ;;  %v831_v36 = vmul.f32 0.0625, %v743_v40  ;;  %v1027_v7 = vrot.slane %v4562_v23, 7  ;;  %v852_v46 = vadd.f32 %v4550_v11, %v829_v51  ;;  %v821_v58 = vrot.slane %v820_v45, 2 }
 0x13b   :  { %v751_v59 = vrot.slane %v750_v19, 1  ;;  %v758_v0 = vrot.slane %v757_v62, 2  ;;  %v795_v38 = vadd.f32 %v5413_v22, %v4505_v43  ;;  %v765_v3 = vrot.slane %v764_v15, 4 }
 0x13c   :  { %3031 = vrot.lane.b32.xlu0 %v4499_v52, %s4034_s10  ;;  %v778_v40 = vrot.slane %v4492_v6, 1  ;;  %v1029_v30 = vrot.slane %v850_v39, 6  ;;  %v804_v32 = vadd.f32 %v803_v31, %v802_v2  ;;  %v853_v14 = vadd.f32 %v4550_v11, %v830_v25 }
 0x13d   :  { %v752_v16 = vadd.f32 %v751_v59, %v750_v19  ;;  %v848_v56 = vadd.f32 %v4550_v11, %v825_v29  ;;  %v854_v43 = vadd.f32 %v4550_v11, %v831_v36  ;;  %v759_v23 = vadd.f32 %v758_v0, %v757_v62  ;;  %v3429_v29 = vld [vmem:[%s5376_s5] ss:$0 sm:$0xff] }
 0x13e   :  { %3037 = vrot.lane.b32.xlu1 %v4508_v54, %s4034_s10  ;;  %v787_v49 = vrot.slane %v786_v9, 1  ;;  %v1031_v51 = vrot.slane %v851_v41, 5  ;;  %v813_v35 = vadd.f32 %v812_v47, %v811_v17  ;;  %v766_v19 = vadd.f32 %v765_v3, %v764_v15 }
 0x13f   :  { %v832_v27 = vmul.f32 0.0625, %v752_v16  ;;  %v1028_v2 = vsel %vm892_vm1, %v1027_v7, %v848_v56  ;;  %v796_v39 = vrot.slane %v795_v38, 1  ;;  %v1033_v31 = vrot.slane %v852_v46, 4 }
 0x140   :  { %3035 = vrot.lane.b32.xlu0 %v4511_v8, %s4034_s10  ;;  %v822_v25 = vadd.f32 %v821_v58, %v820_v45  ;;  %v1030_v36 = vsel %vm895_vm2, %v1029_v30, %v1028_v2  ;;  %v805_v59 = vrot.slane %v804_v32, 1  ;;  %v1035_v62 = vrot.slane %v853_v14, 3 }
 0x141   :  { %v997_v0 = vadd.f32 %v3429_v29, %v996_v63  ;;  %v1037_v22 = vrot.slane %v854_v43, 2  ;;  %v760_v17 = vrot.slane %v759_v23, 1  ;;  %v767_v15 = vrot.slane %v766_v19, 2 }
 0x142   :  { %v855_v41 = vadd.f32 %v4550_v11, %v832_v27  ;;  %v779_v47 = vadd.f32 %v778_v40, %v4492_v6  ;;  %v814_v3 = vrot.slane %v813_v35, 1  ;;  %v5414_v7 = vlaneseq }
 0x143   :  { %v1032_v45 = vsel %vm898_vm3, %v1031_v51, %v1030_v36  ;;  %v788_v58 = vadd.f32 %v787_v49, %v786_v9  ;;  %v768_v16 = vadd.f32 %v767_v15, %v766_v19  ;;  %v823_v30 = vrot.slane %v822_v25, 1 }
 0x144   :  { %v1147_v46 = vshrl.u32 %v5414_v7, 7  ;;  %v1034_v56 = vsel %vm901_vm4, %v1033_v31, %v1032_v45  ;;  %v797_v2 = vadd.f32 %v796_v39, %v795_v38  ;;  %v806_v14 = vadd.f32 %v805_v59, %v804_v32 }
 0x145   :  { %v1036_v43 = vsel %vm904_vm5, %v1035_v62, %v1034_v56  ;;  %v1039_v63 = vrot.slane %v855_v41, 1  ;;  %v4625_v54 = vmul.f32 0.35355338, %v997_v0  ;;  %v761_v27 = vadd.f32 %v760_v17, %v759_v23 }
 0x146   :  { %v769_v8 = vrot.slane %v768_v16, 1  ;;  %v1038_v6 = vsel %vm907_vm6, %v1037_v22, %v1036_v43  ;;  %v835_v40 = vmul.f32 0.0625, %v779_v47  ;;  %v815_v51 = vadd.f32 %v814_v3, %v813_v35 }
 0x147   :  { %v1040_v7 = vsel %vm910_vm7, %v1039_v63, %v1038_v6  ;;  %v836_v9 = vmul.f32 0.0625, %v788_v58  ;;  %v824_v38 = vadd.f32 %v823_v30, %v822_v25  ;;  %v837_v32 = vmul.f32 0.0625, %v797_v2 }
 0x148   :  { %v770_v49 = vadd.f32 %v769_v8, %v768_v16  ;;  %v1057_v19 = vmul.f32 %v1040_v7, %v4625_v54  ;;  %2935 = vrot.lane.b32.xlu0 %v1040_v7, %s4034_s10  ;;  %v838_v39 = vmul.f32 0.0625, %v806_v14  ;;  %v5415_v31 = vunpack.c.0.s8 %v4484_v37 }
 0x149   :  { %v833_v23 = vmul.f32 0.0625, %v761_v27  ;;  %v858_v62 = vadd.f32 %v4550_v11, %v835_v40  ;;  %v839_v35 = vmul.f32 0.0625, %v815_v51  ;;  %v859_v8 = vadd.f32 %v4550_v11, %v836_v9 }
 0x14a   :  { %v4633_v36 = vsub.s32 %v5415_v31, %v1147_v46  ;;  %v834_v59 = vmul.f32 0.0625, %v770_v49  ;;  %3706 = vmatprep.mubr.msk.f32.mxu1 %vm163_vm0, %v1057_v19  ;;  %v840_v22 = vmul.f32 0.0625, %v824_v38  ;;  %v860_v17 = vadd.f32 %v4550_v11, %v837_v32 }
 0x14b   :  { %v856_v37 = vadd.f32 %v4550_v11, %v833_v23  ;;  %v861_v41 = vadd.f32 %v4550_v11, %v838_v39  ;;  %v1043_v47 = vrot.slane %v858_v62, 6  ;;  %v862_v3 = vadd.f32 %v4550_v11, %v839_v35 }
 0x14c   :  { %v1149_v0 = vrot.slane %v4625_v54, %v4633_v36  ;;  %v857_v25 = vadd.f32 %v4550_v11, %v834_v59  ;;  %v1045_v45 = vrot.slane %v859_v8, 5  ;;  %v863_v16 = vadd.f32 %v4550_v11, %v840_v22 }
 0x14d   :  { %v1002_v30 = vadd.f32 %v4596_v1, %v3429_v29  ;;  %v1047_v14 = vrot.slane %v860_v17, 4  ;;  %v4650_v43 = vsub.s32 0, %v1147_v46  ;;  %v1049_v27 = vrot.slane %v861_v41, 3 }
 0x14e   :  { %v1041_v15 = vrot.slane %v857_v25, 7  ;;  %v1165_v58 = vrot.slane %v1149_v0, %v4633_v36  ;;  %v1051_v40 = vrot.slane %v862_v3, 2  ;;  %v1157_v7 = vcombine.high %v1149_v0, %v1149_v0 }
 0x14f   :  { %v1053_v9 = vrot.slane %v863_v16, 1  ;;  %v4656_v49 = vmul.f32 0.35355338, %v1002_v30  ;;  %v1142_v32 = vcombine.high %v4625_v54, %v4625_v54 }
 0x150   :  { %v1042_v56 = vsel %vm892_vm1, %v1041_v15, %v856_v37  ;;  %v1243_v11 = vrot.slane %v1165_v58, %v4650_v43  ;;  %v1179_v19 = vrot.slane %v1157_v7, %v4633_v36  ;;  %v1187_v39 = vcombine.high %v1165_v58, %v1165_v58 }
 0x151   :  { %v1044_v2 = vsel %vm895_vm2, %v1043_v47, %v1042_v56  ;;  %v5417_v56 = vld [vmem:[#allocation27_spill] sm:$0xff] }
 0x152   :  { %v1046_v63 = vsel %vm898_vm3, %v1045_v45, %v1044_v2  ;;  %v1320_v38 = vmul.f32 %v1243_v11, %v4363_v60  ;;  %v1247_v31 = vrot.slane %v1179_v19, %v4650_v43  ;;  %v1321_v60 = vmul.f32 %v1243_v11, %v4353_v55  ;;  %v5419_v11 = vld [vmem:[#allocation16_spill] sm:$0xff] }
 0x153   :  { %v1048_v6 = vsel %vm901_vm4, %v1047_v14, %v1046_v63  ;;  %v1251_v54 = vrot.slane %v1187_v39, %v4650_v43  ;;  %v1189_v59 = vcombine.high %v1179_v19, %v1179_v19 }
 0x154   :  { %v1050_v51 = vsel %vm904_vm5, %v1049_v27, %v1048_v6  ;;  %v1322_v23 = vmul.f32 %v1247_v31, %v4386_v4 }
 0x155   :  { %v1052_v1 = vsel %vm907_vm6, %v1051_v40, %v1050_v51  ;;  %v1324_v62 = vmul.f32 %v1251_v54, %v4396_v10  ;;  %v1255_v35 = vrot.slane %v1189_v59, %v4650_v43 }
 0x156   :  { %v1054_v29 = vsel %vm910_vm7, %v1053_v9, %v1052_v1 }
 0x157   :  { %v1058_v46 = vmul.f32 %v1054_v29, %v4656_v49  ;;  %2937 = vrot.lane.b32.xlu1 %v1054_v29, %s4034_s10  ;;  %v1326_v8 = vmul.f32 %v1255_v35, %v4428_v34 }
 0x159   :  { %3707 = vmatmul.mubr.msk.f32.vlgmr.msra.gmra.mxu1 %vm163_vm0, %v1058_v46  ;;  %v5421_v46 = vld [vmem:[#allocation18_spill] sm:$0xff] }
 0x15a   :  { %3710 = vmatpush3.msra.mxu1 %v4321_v26  ;;  %3717 = vmatprep.mubr.msk.f32.mxu1 %vm163_vm0, %v1320_v38  ;;  %v1156_v26 = vrot.slane %v1142_v32, %v4633_v36 }
 0x15b   :  { %3711 = vmatprep.subr.mxu1 %v4326_v13 }
 0x15c   :  { %3712 = vmatpush3.msra.mxu1 %v4326_v13  ;;  %v1323_v13 = vmul.f32 %v1247_v31, %v4366_v61  ;;  %v1172_v55 = vrot.slane %v1156_v26, %v4633_v36  ;;  %v1327_v61 = vmul.f32 %v1255_v35, %v4425_v33  ;;  %v1198_v33 = vrot.slane %v4656_v49, %v4633_v36  ;;  %v5423_v31 = vld [vmem:[#allocation20_spill] sm:$0xff]  ;;  %v5426_v35 = vld [vmem:[#allocation21_spill] sm:$0xff] }
 0x15d   :  { %3713 = vmatprep.subr.mxu1 %v4333_v21 }
 0x15e   :  { %3714 = vmatpush3.msra.mxu1 %v4333_v21  ;;  %v1158_v21 = vcombine.high %v1156_v26, %v1156_v26  ;;  %v1259_v0 = vrot.slane %v1172_v55, %v4650_v43  ;;  %v1188_v22 = vcombine.high %v1172_v55, %v1172_v55  ;;  %v1206_v47 = vcombine.high %v1198_v33, %v1198_v33 }
 0x15f   :  { %3715 = vmatprep.subr.mxu1 %v4340_v50 }
 0x160   :  { %3716 = vmatpush3.msra.mxu1 %v4340_v50  ;;  %v1325_v50 = vmul.f32 %v1251_v54, %v4393_v53  ;;  %v1186_v4 = vrot.slane %v1158_v21, %v4633_v36  ;;  %v1328_v10 = vmul.f32 %v1259_v0, %v4450_v44  ;;  %v1329_v53 = vmul.f32 %v1259_v0, %v4447_v42  ;;  %v5424_v54 = vld [vmem:[#allocation19_spill] sm:$0xff] }
 0x161   :  { %3718 = vmatmul.mubr.msk.f32.vlgmr.msra.gmra.mxu1 %vm163_vm0, %v1321_v60  ;;  %v1267_v37 = vrot.slane %v1188_v22, %v4650_v43  ;;  %v1214_v42 = vrot.slane %v1198_v33, %v4633_v36  ;;  %v1228_v2 = vrot.slane %v1206_v47, %v4633_v36 }
 0x162   :  { %3720 = vmatprep.mubr.msk.f32.mxu1 %vm163_vm0, %v1322_v23  ;;  %v1263_v25 = vrot.slane %v1186_v4, %v4650_v43  ;;  %v1190_v34 = vcombine.high %v1186_v4, %v1186_v4 }
 0x163   :  { %v1332_v41 = vmul.f32 %v1267_v37, %v4514_v20  ;;  %v1275_v45 = vrot.slane %v1214_v42, %v4650_v43  ;;  %v1191_v20 = vcombine.high %v4656_v49, %v4656_v49  ;;  %v1236_v16 = vcombine.high %v1214_v42, %v1214_v42 }
 0x164   :  { %v1330_v17 = vmul.f32 %v1263_v25, %v4474_v24  ;;  %v1331_v44 = vmul.f32 %v1263_v25, %v4465_v57  ;;  %v1271_v15 = vrot.slane %v1190_v34, %v4650_v43  ;;  %v1333_v24 = vmul.f32 %v1267_v37, %v4502_v5  ;;  %v5416_v57 = vld [vmem:[#allocation25_spill] sm:$0xff]  ;;  %v5428_v25 = vld [vmem:[#allocation23_spill] sm:$0xff] }
 0x165   :  { %3721 = vmatmul.mubr.msk.f32.gmra.mxu1 %vm163_vm0, %v1323_v13  ;;  %v1336_v30 = vmul.f32 %v1275_v45, %v5417_v56  ;;  %v1279_v5 = vrot.slane %v1228_v2, %v4650_v43  ;;  %v1205_v63 = vrot.slane %v1191_v20, %v4633_v36  ;;  %v1238_v27 = vcombine.high %v1228_v2, %v1228_v2  ;;  %v5425_v13 = vld [vmem:[#allocation22_spill] sm:$0xff] }
 0x166   :  { %3723 = vmatprep.mubr.msk.f32.mxu1 %vm163_vm0, %v1324_v62  ;;  %v1334_v3 = vmul.f32 %v1271_v15, %v4542_v18  ;;  %v1335_v58 = vmul.f32 %v1271_v15, %v5416_v57  ;;  %v5418_v18 = vld [vmem:[#allocation26_spill] sm:$0xff]  ;;  %v1283_v40 = vrot.slane %v1236_v16, %v4650_v43 }
 0x167   :  { %v1337_v14 = vmul.f32 %v1275_v45, %v5418_v18  ;;  %v1338_v6 = vmul.f32 %v1279_v5, %v4579_v28  ;;  %v1339_v7 = vmul.f32 %v1279_v5, %v4574_v48  ;;  %v1207_v51 = vcombine.high %v1205_v63, %v1205_v63  ;;  %v5420_v28 = vld [vmem:[#allocation15_spill] sm:$0xff]  ;;  %v5422_v48 = vld [vmem:[#allocation17_spill] sm:$0xff] }
 0x168   :  { %v1221_v9 = vrot.slane %v1205_v63, %v4633_v36  ;;  %v1340_v49 = vmul.f32 %v1283_v40, %v5419_v11  ;;  %v1287_v1 = vrot.slane %v1238_v27, %v4650_v43  ;;  %v1341_v29 = vmul.f32 %v1283_v40, %v5420_v28 }
 0x169   :  { %3724 = vmatmul.mubr.msk.f32.gmra.mxu1 %vm163_vm0, %v1325_v50  ;;  %v1235_v32 = vrot.slane %v1207_v51, %v4633_v36 }
 0x16a   :  { %3726 = vmatprep.mubr.msk.f32.mxu1 %vm163_vm0, %v1326_v8  ;;  %v1342_v19 = vmul.f32 %v1287_v1, %v5421_v46  ;;  %v1291_v38 = vrot.slane %v1221_v9, %v4650_v43  ;;  %v1343_v39 = vmul.f32 %v1287_v1, %v5422_v48  ;;  %v1237_v23 = vcombine.high %v1221_v9, %v1221_v9 }
 0x16b   :  { %v1295_v26 = vrot.slane %v1235_v32, %v4650_v43  ;;  %v1239_v62 = vcombine.high %v1235_v32, %v1235_v32 }
 0x16c   :  { %v1344_v60 = vmul.f32 %v1291_v38, %v5423_v31  ;;  %v1345_v59 = vmul.f32 %v1291_v38, %v5424_v54  ;;  %v1299_v55 = vrot.slane %v1237_v23, %v4650_v43 }
 0x16d   :  { %3727 = vmatmul.mubr.msk.f32.gmra.mxu1 %vm163_vm0, %v1327_v61  ;;  %v1346_v21 = vmul.f32 %v1295_v26, %v5425_v13  ;;  %v1347_v50 = vmul.f32 %v1295_v26, %v5426_v35  ;;  %v1303_v8 = vrot.slane %v1239_v62, %v4650_v43  ;;  %v5427_v61 = vld [vmem:[#allocation24_spill] sm:$0xff] }
 0x16e   :  { %3729 = vmatprep.mubr.msk.f32.mxu1 %vm163_vm0, %v1328_v10  ;;  %v1348_v4 = vmul.f32 %v1299_v55, %v4499_v52  ;;  %v1349_v0 = vmul.f32 %v1299_v55, %v4495_v12 }
 0x16f   :  { %v1350_v10 = vmul.f32 %v1303_v8, %v5427_v61  ;;  %v1351_v22 = vmul.f32 %v1303_v8, %v5428_v25 }
 0x171   :  { %3730 = vmatmul.mubr.msk.f32.gmra.mxu1 %vm163_vm0, %v1329_v53 }
 0x172   :  { %3732 = vmatprep.mubr.msk.f32.mxu1 %vm163_vm0, %v1330_v17 }
 0x175   :  { %3733 = vmatmul.mubr.msk.f32.gmra.mxu1 %vm163_vm0, %v1331_v44 }
 0x176   :  { %3735 = vmatprep.mubr.msk.f32.mxu1 %vm163_vm0, %v1332_v41 }
 0x179   :  { %3736 = vmatmul.mubr.msk.f32.gmra.mxu1 %vm163_vm0, %v1333_v24 }
 0x17a   :  { %3738 = vmatprep.mubr.msk.f32.mxu1 %vm163_vm0, %v1334_v3 }
 0x17d   :  { %3739 = vmatmul.mubr.msk.f32.gmra.mxu1 %vm163_vm0, %v1335_v58 }
 0x17e   :  { %3741 = vmatprep.mubr.msk.f32.mxu1 %vm163_vm0, %v1336_v30 }
 0x181   :  { %3742 = vmatmul.mubr.msk.f32.gmra.mxu1 %vm163_vm0, %v1337_v14 }
 0x182   :  { %3744 = vmatprep.mubr.msk.f32.mxu1 %vm163_vm0, %v1338_v6 }
 0x185   :  { %3745 = vmatmul.mubr.msk.f32.gmra.mxu1 %vm163_vm0, %v1339_v7 }
 0x186   :  { %3747 = vmatprep.mubr.msk.f32.mxu1 %vm163_vm0, %v1340_v49 }
 0x189   :  { %3748 = vmatmul.mubr.msk.f32.gmra.mxu1 %vm163_vm0, %v1341_v29 }
 0x18a   :  { %3750 = vmatprep.mubr.msk.f32.mxu1 %vm163_vm0, %v1342_v19 }
 0x18d   :  { %3751 = vmatmul.mubr.msk.f32.gmra.mxu1 %vm163_vm0, %v1343_v39 }
 0x18e   :  { %3753 = vmatprep.mubr.msk.f32.mxu1 %vm163_vm0, %v1344_v60 }
 0x191   :  { %3754 = vmatmul.mubr.msk.f32.gmra.mxu1 %vm163_vm0, %v1345_v59 }
 0x192   :  { %3756 = vmatprep.mubr.msk.f32.mxu1 %vm163_vm0, %v1346_v21 }
 0x195   :  { %3757 = vmatmul.mubr.msk.f32.gmra.mxu1 %vm163_vm0, %v1347_v50 }
 0x196   :  { %3759 = vmatprep.mubr.msk.f32.mxu1 %vm163_vm0, %v1348_v4 }
 0x199   :  { %3760 = vmatmul.mubr.msk.f32.gmra.mxu1 %vm163_vm0, %v1349_v0 }
 0x19a   :  { %3762 = vmatprep.mubr.msk.f32.mxu1 %vm163_vm0, %v1350_v10 }
 0x19d   :  { %3763 = vmatmul.mubr.msk.f32.gmra.mxu1 %vm163_vm0, %v1351_v22 }
 0x219   :  { %v4764_v53 = vpop.f32.mrf.mxu1 }
 0x21b   :  { %v4766_v52 = vpop.f32.mrf.mxu1 }
 0x221   :  { %v4768_v34 = vpop.f32.mrf.mxu1 }
 0x222   :  { %v1675_v45 = vsel %vm1673_vm9, %v4768_v34, -inf }
 0x223   :  { %v4770_v17 = vpop.f32.mrf.mxu1 }
 0x224   :  { %v1674_v41 = vsel %vm1673_vm9, %v4770_v17, -inf }
 0x225   :  { %v4772_v37 = vpop.f32.mrf.mxu1  ;;  %v1676_v20 = vmax.f32 %v1674_v41, %v1675_v45 }
 0x226   :  { %v1684_v15 = vsel %vm1673_vm9, %v4772_v37, -inf }
 0x227   :  { %v4774_v12 = vpop.f32.mrf.mxu1  ;;  %v1677_v63 = vrot.slane %v1676_v20, 4 }
 0x228   :  { %v1683_v33 = vsel %vm1673_vm9, %v4774_v12, -inf }
 0x229   :  { %v4778_v44 = vpop.f32.mrf.mxu1  ;;  %v1685_v42 = vmax.f32 %v1683_v33, %v1684_v15  ;;  %v1678_v1 = vmax.f32 %v1676_v20, %v1677_v63 }
 0x22a   :  { %v1693_v47 = vsel %vm1673_vm9, %v4778_v44, -inf }
 0x22b   :  { %v4784_v24 = vpop.f32.mrf.mxu1  ;;  %v1686_v16 = vrot.slane %v1685_v42, 4  ;;  %v1679_v26 = vrot.slane %v1678_v1, 2 }
 0x22c   :  { %v1692_v3 = vsel %vm1673_vm9, %v4784_v24, -inf }
 0x22d   :  { %v1694_v57 = vmax.f32 %v1692_v3, %v1693_v47  ;;  %v4792_v58 = vpop.f32.mrf.mxu1  ;;  %v1687_v27 = vmax.f32 %v1685_v42, %v1686_v16  ;;  %v1680_v0 = vmax.f32 %v1678_v1, %v1679_v26 }
 0x22e   :  { %v1702_v30 = vsel %vm1673_vm9, %v4792_v58, -inf }
 0x22f   :  { %v4794_v56 = vpop.f32.mrf.mxu1  ;;  %v1695_v5 = vrot.slane %v1694_v57, 4  ;;  %v1688_v29 = vrot.slane %v1687_v27, 2  ;;  %v1681_v16 = vrot.slane %v1680_v0, 1 }
 0x230   :  { %v1701_v2 = vsel %vm1673_vm9, %v4794_v56, -inf }
 0x231   :  { %v1703_v18 = vmax.f32 %v1701_v2, %v1702_v30  ;;  %v4800_v14 = vpop.f32.mrf.mxu1  ;;  %v1696_v9 = vmax.f32 %v1694_v57, %v1695_v5  ;;  %v1689_v54 = vmax.f32 %v1687_v27, %v1688_v29 }
 0x232   :  { %v1711_v7 = vsel %vm1673_vm9, %v4800_v14, -inf }
 0x233   :  { %v1704_v6 = vrot.slane %v1703_v18, 4  ;;  %v4802_v40 = vpop.f32.mrf.mxu1  ;;  %v1697_v48 = vrot.slane %v1696_v9, 2  ;;  %v1690_v10 = vrot.slane %v1689_v54, 1 }
 0x234   :  { %v1710_v51 = vsel %vm1673_vm9, %v4802_v40, -inf }
 0x235   :  { %v1712_v11 = vmax.f32 %v1710_v51, %v1711_v7  ;;  %v4808_v49 = vpop.f32.mrf.mxu1  ;;  %v1705_v28 = vmax.f32 %v1703_v18, %v1704_v6  ;;  %v1698_v35 = vmax.f32 %v1696_v9, %v1697_v48  ;;  %v1691_v2 = vmax.f32 %v1689_v54, %v1690_v10  ;;  %v4839_v6 = vld [vmem:[%s5382_s11] sm:$0xf] }
 0x236   :  { %v1720_v38 = vsel %vm1673_vm9, %v4808_v49, -inf  ;;  %3765 = vmatprep.subr.msk.mxu0 %vm2323_vm10, %v4839_v6 }
 0x237   :  { %v1713_v46 = vrot.slane %v1712_v11, 4  ;;  %v4810_v19 = vpop.f32.mrf.mxu1  ;;  %v1706_v23 = vrot.slane %v1705_v28, 2  ;;  %v1699_v47 = vrot.slane %v1698_v35, 1  ;;  %3766 = vmatpush3.msk.msra.mxu0 %vm2323_vm10, %v4839_v6 }
 0x238   :  { %v1719_v32 = vsel %vm1673_vm9, %v4810_v19, -inf  ;;  %3770 = vmatprep.subr.msk.mxu0 %vm2323_vm10, %v4839_v6 }
 0x239   :  { %v1714_v39 = vmax.f32 %v1712_v11, %v1713_v46  ;;  %v1721_v31 = vmax.f32 %v1719_v32, %v1720_v38  ;;  %v4816_v60 = vpop.f32.mrf.mxu1  ;;  %v1707_v61 = vmax.f32 %v1705_v28, %v1706_v23  ;;  %v1700_v11 = vmax.f32 %v1698_v35, %v1699_v47 }
 0x23a   :  { %v1729_v55 = vsel %vm1673_vm9, %v4816_v60, -inf  ;;  %v1682_v38 = vmax.f32 %v1680_v0, %v1681_v16 }
 0x23b   :  { %v1715_v59 = vrot.slane %v1714_v39, 2  ;;  %v1722_v13 = vrot.slane %v1721_v31, 4  ;;  %v4818_v21 = vpop.f32.mrf.mxu1  ;;  %v1708_v30 = vrot.slane %v1707_v61, 1 }
 0x23c   :  { %v1728_v62 = vsel %vm1673_vm9, %v4818_v21, -inf  ;;  %v1834_v54 = vsel %vm892_vm1, %v1691_v2, %v1682_v38 }
 0x23d   :  { %v1723_v50 = vmax.f32 %v1721_v31, %v1722_v13  ;;  %v1730_v4 = vmax.f32 %v1728_v62, %v1729_v55  ;;  %v4824_v8 = vpop.f32.mrf.mxu1  ;;  %v1716_v25 = vmax.f32 %v1714_v39, %v1715_v59  ;;  %v1709_v32 = vmax.f32 %v1707_v61, %v1708_v30 }
 0x23e   :  { %v1738_v41 = vsel %vm1673_vm9, %v4824_v8, -inf  ;;  %v1835_v62 = vsel %vm895_vm2, %v1700_v11, %v1834_v54 }
 0x23f   :  { %v1724_v22 = vrot.slane %v1723_v50, 2  ;;  %v1731_v33 = vrot.slane %v1730_v4, 4  ;;  %v4826_v15 = vpop.f32.mrf.mxu1  ;;  %v1717_v5 = vrot.slane %v1716_v25, 1  ;;  %v1836_v61 = vsel %vm898_vm3, %v1709_v32, %v1835_v62 }
 0x240   :  { %v1737_v42 = vsel %vm1673_vm9, %v4826_v15, -inf }
 0x241   :  { %v1725_v3 = vmax.f32 %v1723_v50, %v1724_v22  ;;  %v1732_v45 = vmax.f32 %v1730_v4, %v1731_v33  ;;  %v1739_v57 = vmax.f32 %v1737_v42, %v1738_v41  ;;  %v4832_v20 = vpop.f32.mrf.mxu1  ;;  %v1718_v48 = vmax.f32 %v1716_v25, %v1717_v5 }
 0x242   :  { %v1747_v51 = vsel %vm1673_vm9, %v4832_v20, -inf }
 0x243   :  { %v1733_v18 = vrot.slane %v1732_v45, 2  ;;  %v1740_v63 = vrot.slane %v1739_v57, 4  ;;  %v4834_v27 = vpop.f32.mrf.mxu1  ;;  %v1726_v7 = vrot.slane %v1725_v3, 1  ;;  %v1837_v25 = vsel %vm901_vm4, %v1718_v48, %v1836_v61 }
 0x244   :  { %v1746_v9 = vsel %vm1673_vm9, %v4834_v27, -inf }
 0x245   :  { %v1734_v1 = vmax.f32 %v1732_v45, %v1733_v18  ;;  %v1741_v28 = vmax.f32 %v1739_v57, %v1740_v63  ;;  %v1748_v29 = vmax.f32 %v1746_v9, %v1747_v51  ;;  %v4845_v46 = vpop.f32.mrf.mxu1  ;;  %v1727_v59 = vmax.f32 %v1725_v3, %v1726_v7 }
 0x246   :  { %v1756_v13 = vsel %vm1673_vm9, %v4845_v46, -inf }
 0x247   :  { %v1735_v39 = vrot.slane %v1734_v1, 1  ;;  %v1742_v31 = vrot.slane %v1741_v28, 2  ;;  %v1749_v26 = vrot.slane %v1748_v29, 4  ;;  %v4851_v23 = vpop.f32.mrf.mxu1  ;;  %v1838_v47 = vsel %vm904_vm5, %v1727_v59, %v1837_v25 }
 0x248   :  { %v1755_v55 = vsel %vm1673_vm9, %v4851_v23, -inf }
 0x249   :  { %v1743_v35 = vmax.f32 %v1741_v28, %v1742_v31  ;;  %v1750_v50 = vmax.f32 %v1748_v29, %v1749_v26  ;;  %v1757_v4 = vmax.f32 %v1755_v55, %v1756_v13  ;;  %v4861_v0 = vpop.f32.mrf.mxu1  ;;  %v1736_v10 = vmax.f32 %v1734_v1, %v1735_v39 }
 0x24a   :  { %v1765_v3 = vsel %vm1673_vm9, %v4861_v0, -inf }
 0x24b   :  { %v1744_v22 = vrot.slane %v1743_v35, 1  ;;  %v1751_v33 = vrot.slane %v1750_v50, 2  ;;  %v1758_v41 = vrot.slane %v1757_v4, 4  ;;  %v4865_v42 = vpop.f32.mrf.mxu1  ;;  %v1839_v18 = vsel %vm907_vm6, %v1736_v10, %v1838_v47 }
 0x24c   :  { %v1764_v45 = vsel %vm1673_vm9, %v4865_v42, -inf }
 0x24d   :  { %v1745_v57 = vmax.f32 %v1743_v35, %v1744_v22  ;;  %v1752_v16 = vmax.f32 %v1750_v50, %v1751_v33  ;;  %v1759_v30 = vmax.f32 %v1757_v4, %v1758_v41  ;;  %v1766_v2 = vmax.f32 %v1764_v45, %v1765_v3  ;;  %v4872_v5 = vpop.f32.mrf.mxu1 }
 0x24e   :  { %v1774_v1 = vsel %vm1673_vm9, %v4872_v5, -inf }
 0x24f   :  { %v1840_v63 = vsel %vm910_vm7, %v1745_v57, %v1839_v18  ;;  %v1760_v7 = vrot.slane %v1759_v30, 2  ;;  %v1767_v51 = vrot.slane %v1766_v2, 4  ;;  %v4876_v9 = vpop.f32.mrf.mxu1  ;;  %v1753_v29 = vrot.slane %v1752_v16, 1 }
 0x250   :  { %v1850_v11 = vmax.f32 %v4766_v52, %v1840_v63  ;;  %v1773_v28 = vsel %vm1673_vm9, %v4876_v9, -inf }
 0x251   :  { %v1761_v38 = vmax.f32 %v1759_v30, %v1760_v7  ;;  %v1768_v32 = vmax.f32 %v1766_v2, %v1767_v51  ;;  %v1775_v48 = vmax.f32 %v1773_v28, %v1774_v1  ;;  %v4883_v39 = vpop.f32.mrf.mxu1  ;;  %v1754_v4 = vmax.f32 %v1752_v16, %v1753_v29 }
 0x252   :  { %v1852_v31 = vsub.f32 %v4766_v52, %v1850_v11  ;;  %v1860_v26 = vcombine.high %v1850_v11, %v1850_v11  ;;  %v1867_v54 = vrot.slane %v1850_v11, %v4633_v36  ;;  %v4893_v10 = vsel %vm1673_vm9, %v4883_v39, -inf }
 0x253   :  { %v1762_v59 = vrot.slane %v1761_v38, 1  ;;  %v1769_v13 = vrot.slane %v1768_v32, 2  ;;  %v4887_v55 = vpop.f32.mrf.mxu1  ;;  %v1776_v61 = vrot.slane %v1775_v48, 4 }
 0x254   :  { %v1874_v62 = vrot.slane %v1860_v26, %v4633_v36  ;;  %v1875_v35 = vcombine.high %v1867_v54, %v1867_v54  ;;  %v1883_v50 = vrot.slane %v1867_v54, %v4633_v36  ;;  %v4897_v52 = vmul.f32 1.442695, %v1852_v31 }
 0x255   :  { %v4895_v25 = vpop.f32.mrf.mxu1  ;;  %v1763_v45 = vmax.f32 %v1761_v38, %v1762_v59  ;;  %v1770_v57 = vmax.f32 %v1768_v32, %v1769_v13  ;;  %v1777_v11 = vmax.f32 %v1775_v48, %v1776_v61  ;;  %v1782_v1 = vsel %vm1673_vm9, %v4887_v55, -inf }
 0x256   :  { %v1876_v22 = vcombine.high %v1874_v62, %v1874_v62  ;;  %v1890_v33 = vrot.slane %v1874_v62, %v4633_v36  ;;  %v1897_v41 = vrot.slane %v1875_v35, %v4633_v36  ;;  %v1905_v47 = vcombine.high %v1883_v50, %v1883_v50 }
 0x257   :  { %v1961_v3 = vrot.slane %v1883_v50, %v4650_v43  ;;  %v4902_v16 = vpop.f32.mrf.mxu1  ;;  %v4924_v35 = vsel %vm892_vm1, %v1763_v45, %v1754_v4  ;;  %v1771_v50 = vrot.slane %v1770_v57, 1 }
 0x258   :  { %v1904_v30 = vrot.slane %v1876_v22, %v4633_v36  ;;  %v1906_v2 = vcombine.high %v1890_v33, %v1890_v33  ;;  %v1907_v18 = vcombine.high %v1897_v41, %v1897_v41  ;;  %v1965_v63 = vrot.slane %v1897_v41, %v4650_v43 }
 0x259   :  { %v1969_v7 = vrot.slane %v1905_v47, %v4650_v43  ;;  %v1977_v51 = vrot.slane %v1890_v33, %v4650_v43  ;;  %v4910_v28 = vpop.f32.mrf.mxu1  ;;  %v2038_v31 = vsub.f32 %v4770_v17, %v1961_v3  ;;  %v2039_v54 = vsub.f32 %v4768_v34, %v1961_v3 }
 0x25a   :  { %v1908_v29 = vcombine.high %v1904_v30, %v1904_v30  ;;  %v1973_v38 = vrot.slane %v1907_v18, %v4650_v43  ;;  %v1981_v32 = vrot.slane %v1904_v30, %v4650_v43  ;;  %v1985_v26 = vrot.slane %v1906_v2, %v4650_v43 }
 0x25b   :  { %v2040_v59 = vsub.f32 %v4774_v12, %v1965_v63  ;;  %v2041_v48 = vsub.f32 %v4772_v37, %v1965_v63  ;;  %v2042_v62 = vsub.f32 %v4784_v24, %v1969_v7  ;;  %v4926_v61 = vpop.f32.mrf.mxu1  ;;  %v2043_v17 = vsub.f32 %v4778_v44, %v1969_v7 }
 0x25c   :  { %v4920_v13 = vrot.slane %v1908_v29, %v4650_v43  ;;  %v2044_v22 = vsub.f32 %v4794_v56, %v1973_v38  ;;  %v2045_v34 = vsub.f32 %v4792_v58, %v1973_v38  ;;  %v2046_v12 = vsub.f32 %v4802_v40, %v1977_v51 }
 0x25d   :  { %v2047_v37 = vsub.f32 %v4800_v14, %v1977_v51  ;;  %v2048_v33 = vsub.f32 %v4810_v19, %v1981_v32  ;;  %v2049_v24 = vsub.f32 %v4808_v49, %v1981_v32  ;;  %v2070_v41 = vmul.f32 1.442695, %v2038_v31  ;;  %v4939_v40 = vpop.f32.mrf.mxu1 }
 0x25e   :  { %v2050_v4 = vsub.f32 %v4818_v21, %v1985_v26  ;;  %v2072_v47 = vmul.f32 1.442695, %v2039_v54  ;;  %v2074_v3 = vmul.f32 1.442695, %v2040_v59  ;;  %v2076_v45 = vmul.f32 1.442695, %v2041_v48 }
 0x25f   :  { %v2051_v44 = vsub.f32 %v4816_v60, %v1985_v26  ;;  %v2052_v56 = vsub.f32 %v4826_v15, %v4920_v13  ;;  %3848 = vpow2.f32 %v2070_v41  ;;  %v2078_v58 = vmul.f32 1.442695, %v2042_v62  ;;  %v4944_v29 = vpop.f32.mrf.mxu1 }
 0x260   :  { %v2053_v14 = vsub.f32 %v4824_v8, %v4920_v13  ;;  %3850 = vpow2.f32 %v2072_v47  ;;  %v2080_v49 = vmul.f32 1.442695, %v2043_v17  ;;  %v1772_v19 = vmax.f32 %v1770_v57, %v1771_v50 }
 0x261   :  { %3852 = vpow2.f32 %v2074_v3  ;;  %v2082_v21 = vmul.f32 1.442695, %v2044_v22  ;;  %v2084_v30 = vmul.f32 1.442695, %v2045_v34  ;;  %v2086_v2 = vmul.f32 1.442695, %v2046_v12 }
 0x262   :  { %3854 = vpow2.f32 %v2076_v45  ;;  %v2088_v18 = vmul.f32 1.442695, %v2047_v37  ;;  %v2090_v60 = vmul.f32 1.442695, %v2048_v33  ;;  %v2092_v63 = vmul.f32 1.442695, %v2049_v24 }
 0x263   :  { %3856 = vpow2.f32 %v2078_v58  ;;  %v2094_v15 = vmul.f32 1.442695, %v2050_v4  ;;  %v1778_v7 = vrot.slane %v1777_v11, 2  ;;  %v1784_v51 = vmax.f32 %v1782_v1, %v4893_v10 }
 0x264   :  { %3858 = vpow2.f32 %v2080_v49  ;;  %v2096_v8 = vmul.f32 1.442695, %v2051_v44  ;;  %v1792_v57 = vsel %vm1673_vm9, %v4895_v25, -inf  ;;  %v1791_v38 = vsel %vm1673_vm9, %v4902_v16, -inf }
 0x265   :  { %3860 = vpow2.f32 %v2082_v21  ;;  %v1779_v32 = vmax.f32 %v1777_v11, %v1778_v7  ;;  %v1785_v31 = vrot.slane %v1784_v51, 4  ;;  %v1793_v26 = vmax.f32 %v1791_v38, %v1792_v57 }
 0x266   :  { %3862 = vpow2.f32 %v2084_v30  ;;  %v1801_v54 = vsel %vm1673_vm9, %v4910_v28, -inf  ;;  %v1800_v10 = vsel %vm1673_vm9, %v4926_v61, -inf  ;;  %v1809_v1 = vsel %vm1673_vm9, %v4944_v29, -inf }
 0x267   :  { %3864 = vpow2.f32 %v2086_v2  ;;  %v1786_v59 = vmax.f32 %v1784_v51, %v1785_v31  ;;  %v1794_v48 = vrot.slane %v1793_v26, 4  ;;  %v1810_v13 = vsel %vm1673_vm9, %v4939_v40, -inf }
 0x268   :  { %3866 = vpow2.f32 %v2088_v18  ;;  %v1780_v11 = vrot.slane %v1779_v32, 1  ;;  %v1802_v62 = vmax.f32 %v1800_v10, %v1801_v54  ;;  %v1811_v50 = vmax.f32 %v1809_v1, %v1810_v13 }
 0x269   :  { %3868 = vpow2.f32 %v2090_v60  ;;  %v2098_v17 = vmul.f32 1.442695, %v2052_v56  ;;  %v1787_v22 = vrot.slane %v1786_v59, 2  ;;  %v1795_v34 = vmax.f32 %v1793_v26, %v1794_v48 }
 0x26a   :  { %3870 = vpow2.f32 %v2092_v63  ;;  %v2100_v12 = vmul.f32 1.442695, %v2053_v14  ;;  %v1803_v37 = vrot.slane %v1802_v62, 4  ;;  %v1812_v33 = vrot.slane %v1811_v50, 4 }
 0x26b   :  { %3872 = vpow2.f32 %v2094_v15  ;;  %v1842_v24 = vsel %vm895_vm2, %v1772_v19, %v4924_v35  ;;  %v1788_v41 = vmax.f32 %v1786_v59, %v1787_v22  ;;  %v1796_v4 = vrot.slane %v1795_v34, 2 }
 0x26c   :  { %v4960_v47 = vpop.eup %3848  ;;  %3874 = vpow2.f32 %v2096_v8  ;;  %v1781_v3 = vmax.f32 %v1779_v32, %v1780_v11  ;;  %v1804_v45 = vmax.f32 %v1802_v62, %v1803_v37  ;;  %v1813_v44 = vmax.f32 %v1811_v50, %v1812_v33 }
 0x26d   :  { %v4962_v58 = vpop.eup %3850  ;;  %3876 = vpow2.f32 %v2098_v17  ;;  %v2134_v56 = vsel %vm1673_vm9, %v4960_v47, 0.0  ;;  %v1789_v14 = vrot.slane %v1788_v41, 1  ;;  %v1797_v49 = vmax.f32 %v1795_v34, %v1796_v4 }
 0x26e   :  { %v4966_v21 = vpop.eup %3852  ;;  %3878 = vpow2.f32 %v2100_v12  ;;  %v2135_v35 = vsel %vm1673_vm9, %v4962_v58, 0.0  ;;  %v1805_v19 = vrot.slane %v1804_v45, 2  ;;  %v1814_v30 = vrot.slane %v1813_v44, 2 }
 0x26f   :  { %v4970_v2 = vpop.eup %3854  ;;  %v2136_v18 = vadd.f32 %v2135_v35, %v2134_v56  ;;  %v2143_v60 = vsel %vm1673_vm9, %v4966_v21, 0.0  ;;  %v1790_v63 = vmax.f32 %v1788_v41, %v1789_v14  ;;  %v1798_v15 = vrot.slane %v1797_v49, 1 }
 0x270   :  { %v4974_v7 = vpop.eup %3856  ;;  %v2144_v51 = vsel %vm1673_vm9, %v4970_v2, 0.0  ;;  %v1843_v8 = vsel %vm898_vm3, %v1781_v3, %v1842_v24  ;;  %v1806_v57 = vmax.f32 %v1804_v45, %v1805_v19  ;;  %v1815_v38 = vmax.f32 %v1813_v44, %v1814_v30 }
 0x271   :  { %v4979_v32 = vpop.eup %3858  ;;  %v2137_v31 = vrot.slane %v2136_v18, 4  ;;  %v2145_v26 = vadd.f32 %v2144_v51, %v2143_v60  ;;  %v2152_v54 = vsel %vm1673_vm9, %v4974_v7, 0.0  ;;  %v1844_v10 = vsel %vm901_vm4, %v1790_v63, %v1843_v8 }
 0x272   :  { %v4984_v1 = vpop.eup %3860  ;;  %v2153_v59 = vsel %vm1673_vm9, %v4979_v32, 0.0  ;;  %v1799_v48 = vmax.f32 %v1797_v49, %v1798_v15  ;;  %v1807_v13 = vrot.slane %v1806_v57, 1  ;;  %v1816_v11 = vrot.slane %v1815_v38, 1 }
 0x273   :  { %v4988_v62 = vpop.eup %3862  ;;  %v2138_v50 = vadd.f32 %v2137_v31, %v2136_v18  ;;  %v2146_v17 = vrot.slane %v2145_v26, 4  ;;  %v2154_v22 = vadd.f32 %v2153_v59, %v2152_v54  ;;  %v2161_v34 = vsel %vm1673_vm9, %v4984_v1, 0.0 }
 0x274   :  { %v4992_v12 = vpop.eup %3864  ;;  %v2162_v37 = vsel %vm1673_vm9, %v4988_v62, 0.0  ;;  %v1845_v33 = vsel %vm904_vm5, %v1799_v48, %v1844_v10  ;;  %v1808_v24 = vmax.f32 %v1806_v57, %v1807_v13  ;;  %v1817_v41 = vmax.f32 %v1815_v38, %v1816_v11 }
 0x275   :  { %v4997_v4 = vpop.eup %3866  ;;  %v2139_v3 = vrot.slane %v2138_v50, 2  ;;  %v2147_v45 = vadd.f32 %v2146_v17, %v2145_v26  ;;  %v2155_v44 = vrot.slane %v2154_v22, 4  ;;  %v2163_v56 = vadd.f32 %v2162_v37, %v2161_v34 }
 0x276   :  { %v4999_v14 = vpop.eup %3868  ;;  %3880 = vpow2.f32 %v4897_v52  ;;  %v2170_v49 = vsel %vm1673_vm9, %v4992_v12, 0.0  ;;  %v2171_v35 = vsel %vm1673_vm9, %v4997_v4, 0.0  ;;  %v1846_v19 = vsel %vm907_vm6, %v1808_v24, %v1845_v33 }
 0x277   :  { %v5007_v30 = vpop.eup %3870  ;;  %v2140_v18 = vadd.f32 %v2139_v3, %v2138_v50  ;;  %v2148_v60 = vrot.slane %v2147_v45, 2  ;;  %v2156_v63 = vadd.f32 %v2155_v44, %v2154_v22  ;;  %v2164_v15 = vrot.slane %v2163_v56, 4 }
 0x278   :  { %5429 = vst [vmem:[#allocation25_spill] sm:$0xff] %v5007_v30  ;;  %v5009_v51 = vpop.eup %3872  ;;  %v2172_v8 = vadd.f32 %v2171_v35, %v2170_v49  ;;  %v2179_v52 = vsel %vm1673_vm9, %v4999_v14, 0.0  ;;  %v2180_v57 = vsel %vm1673_vm9, %v5007_v30, 0.0  ;;  %v1847_v38 = vsel %vm910_vm7, %v1817_v41, %v1846_v19 }
 0x279   :  { %v5016_v31 = vpop.eup %3874  ;;  %v2141_v26 = vrot.slane %v2140_v18, 1  ;;  %v2149_v54 = vadd.f32 %v2148_v60, %v2147_v45  ;;  %v2157_v10 = vrot.slane %v2156_v63, 2  ;;  %v2165_v59 = vadd.f32 %v2164_v15, %v2163_v56 }
 0x27a   :  { %v5018_v48 = vpop.eup %3876  ;;  %v2173_v13 = vrot.slane %v2172_v8, 4  ;;  %v2181_v11 = vadd.f32 %v2180_v57, %v2179_v52  ;;  %v2188_v50 = vsel %vm1673_vm9, %v5009_v51, 0.0  ;;  %v2189_v17 = vsel %vm1673_vm9, %v5016_v31, 0.0 }
 0x27b   :  { %5430 = vst [vmem:[#allocation27_spill] sm:$0xff] %v5018_v48  ;;  %v5024_v22 = vpop.eup %3878  ;;  %v2142_v34 = vadd.f32 %v2141_v26, %v2140_v18  ;;  %v2150_v37 = vrot.slane %v2149_v54, 1  ;;  %v2158_v33 = vadd.f32 %v2157_v10, %v2156_v63  ;;  %v2166_v24 = vrot.slane %v2165_v59, 2 }
 0x27c   :  { %v2174_v41 = vadd.f32 %v2173_v13, %v2172_v8  ;;  %v2182_v3 = vrot.slane %v2181_v11, 4  ;;  %v2190_v45 = vadd.f32 %v2189_v17, %v2188_v50  ;;  %v2197_v44 = vsel %vm1673_vm9, %v5018_v48, 0.0 }
 0x27d   :  { %v2151_v56 = vadd.f32 %v2150_v37, %v2149_v54  ;;  %v2159_v49 = vrot.slane %v2158_v33, 1  ;;  %v2167_v35 = vadd.f32 %v2166_v24, %v2165_v59  ;;  %v2198_v19 = vsel %vm1673_vm9, %v5024_v22, 0.0 }
 0x27e   :  { %v2175_v60 = vrot.slane %v2174_v41, 2  ;;  %v2183_v15 = vadd.f32 %v2182_v3, %v2181_v11  ;;  %v2191_v52 = vrot.slane %v2190_v45, 4  ;;  %v2199_v57 = vadd.f32 %v2198_v19, %v2197_v44 }
 0x27f   :  { %v2160_v18 = vadd.f32 %v2159_v49, %v2158_v33  ;;  %v2168_v26 = vrot.slane %v2167_v35, 1  ;;  %v2294_v63 = vsel %vm892_vm1, %v2151_v56, %v2142_v34  ;;  %v1851_v8 = vmax.f32 %v4764_v53, %v1847_v38 }
 0x280   :  { %v2176_v10 = vadd.f32 %v2175_v60, %v2174_v41  ;;  %v2184_v13 = vrot.slane %v2183_v15, 2  ;;  %v2192_v50 = vadd.f32 %v2191_v52, %v2190_v45  ;;  %v2200_v17 = vrot.slane %v2199_v57, 4 }
 0x281   :  { %v2169_v54 = vadd.f32 %v2168_v26, %v2167_v35  ;;  %v2295_v59 = vsel %vm895_vm2, %v2160_v18, %v2294_v63  ;;  %v1909_v37 = vcombine.high %v1851_v8, %v1851_v8  ;;  %v1916_v34 = vrot.slane %v1851_v8, %v4633_v36 }
 0x282   :  { %v2177_v24 = vrot.slane %v2176_v10, 1  ;;  %v2185_v48 = vadd.f32 %v2184_v13, %v2183_v15  ;;  %v2193_v30 = vrot.slane %v2192_v50, 2  ;;  %v2201_v11 = vadd.f32 %v2200_v17, %v2199_v57 }
 0x283   :  { %v5033_v3 = vpop.eup %3880  ;;  %v2296_v33 = vsel %vm898_vm3, %v2169_v54, %v2295_v59  ;;  %v1923_v38 = vrot.slane %v1909_v37, %v4633_v36  ;;  %v1853_v49 = vsub.f32 %v4764_v53, %v1851_v8  ;;  %v1924_v35 = vcombine.high %v1916_v34, %v1916_v34 }
 0x284   :  { %v2178_v41 = vadd.f32 %v2177_v24, %v2176_v10  ;;  %v2186_v44 = vrot.slane %v2185_v48, 1  ;;  %v2194_v45 = vadd.f32 %v2193_v30, %v2192_v50  ;;  %v2202_v56 = vrot.slane %v2201_v11, 2 }
 0x285   :  { %v1932_v19 = vrot.slane %v1916_v34, %v4633_v36  ;;  %v1925_v18 = vcombine.high %v1923_v38, %v1923_v38  ;;  %v1946_v26 = vrot.slane %v1924_v35, %v4633_v36  ;;  %v1856_v50 = vmul.f32 1.442695, %v1853_v49 }
 0x286   :  { %v2187_v60 = vadd.f32 %v2186_v44, %v2185_v48  ;;  %v2195_v15 = vrot.slane %v2194_v45, 1  ;;  %v2203_v52 = vadd.f32 %v2202_v56, %v2201_v11  ;;  %v2297_v57 = vsel %vm901_vm4, %v2178_v41, %v2296_v33 }
 0x287   :  { %v1954_v63 = vcombine.high %v1932_v19, %v1932_v19  ;;  %v1993_v30 = vrot.slane %v1932_v19, %v4650_v43  ;;  %v1956_v53 = vcombine.high %v1946_v26, %v1946_v26  ;;  %v1997_v8 = vrot.slane %v1946_v26, %v4650_v43 }
 0x288   :  { %v2196_v13 = vadd.f32 %v2195_v15, %v2194_v45  ;;  %v2204_v17 = vrot.slane %v2203_v52, 1  ;;  %v2298_v10 = vsel %vm904_vm5, %v2187_v60, %v2297_v57  ;;  %v1939_v59 = vrot.slane %v1923_v38, %v4633_v36 }
 0x289   :  { %v2001_v37 = vrot.slane %v1954_v63, %v4650_v43  ;;  %v1953_v11 = vrot.slane %v1925_v18, %v4633_v36  ;;  %v2005_v33 = vrot.slane %v1956_v53, %v4650_v43  ;;  %v2054_v34 = vsub.f32 %v4834_v27, %v1993_v30 }
 0x28a   :  { %v2205_v54 = vadd.f32 %v2204_v17, %v2203_v52  ;;  %v2299_v48 = vsel %vm907_vm6, %v2196_v13, %v2298_v10  ;;  %v2055_v44 = vsub.f32 %v4832_v20, %v1993_v30  ;;  %v2056_v45 = vsub.f32 %v4851_v23, %v1997_v8 }
 0x28b   :  { %v2057_v56 = vsub.f32 %v4845_v46, %v1997_v8  ;;  %3882 = vpow2.f32 %v1856_v50  ;;  %v1955_v38 = vcombine.high %v1939_v59, %v1939_v59  ;;  %v2009_v49 = vrot.slane %v1939_v59, %v4650_v43 }
 0x28c   :  { %v2300_v24 = vsel %vm910_vm7, %v2205_v54, %v2299_v48  ;;  %v2058_v35 = vsub.f32 %v4865_v42, %v2001_v37  ;;  %v2059_v19 = vsub.f32 %v4861_v0, %v2001_v37  ;;  %v1957_v60 = vcombine.high %v1953_v11, %v1953_v11 }
 0x28d   :  { %v2310_v41 = vadd.f32 %v5033_v3, %v2300_v24  ;;  %v2013_v27 = vrot.slane %v1953_v11, %v4650_v43  ;;  %v2060_v15 = vsub.f32 %v4876_v9, %v2005_v33  ;;  %v2102_v52 = vmul.f32 1.442695, %v2054_v34 }
 0x28e   :  { %v2061_v20 = vsub.f32 %v4872_v5, %v2005_v33  ;;  %v2104_v23 = vmul.f32 1.442695, %v2055_v44  ;;  %v2106_v57 = vmul.f32 1.442695, %v2056_v45  ;;  %v2108_v46 = vmul.f32 1.442695, %v2057_v56 }
 0x28f   :  { %3884 = vrcp.f32 %v2310_v41  ;;  %v2017_v18 = vrot.slane %v1955_v38, %v4650_v43  ;;  %v2062_v26 = vsub.f32 %v4887_v55, %v2009_v49  ;;  %v2110_v42 = vmul.f32 1.442695, %v2058_v35 }
 0x290   :  { %3886 = vpow2.f32 %v2102_v52  ;;  %v2063_v63 = vsub.f32 %v4883_v39, %v2009_v49  ;;  %v2112_v0 = vmul.f32 1.442695, %v2059_v19  ;;  %v2021_v13 = vrot.slane %v1957_v60, %v4650_v43 }
 0x291   :  { %3888 = vpow2.f32 %v2104_v23  ;;  %v2064_v9 = vsub.f32 %v4902_v16, %v2013_v27  ;;  %v2114_v17 = vmul.f32 1.442695, %v2060_v15  ;;  %v2065_v5 = vsub.f32 %v4895_v25, %v2013_v27 }
 0x292   :  { %3890 = vpow2.f32 %v2106_v57  ;;  %v2116_v10 = vmul.f32 1.442695, %v2061_v20  ;;  %v2066_v30 = vsub.f32 %v4926_v61, %v2017_v18  ;;  %v2118_v55 = vmul.f32 1.442695, %v2062_v26 }
 0x293   :  { %3892 = vpow2.f32 %v2108_v46  ;;  %v2067_v50 = vsub.f32 %v4910_v28, %v2017_v18  ;;  %v2120_v39 = vmul.f32 1.442695, %v2063_v63  ;;  %v2068_v53 = vsub.f32 %v4944_v29, %v2021_v13 }
 0x294   :  { %3894 = vpow2.f32 %v2110_v42  ;;  %v2069_v8 = vsub.f32 %v4939_v40, %v2021_v13  ;;  %v2122_v16 = vmul.f32 1.442695, %v2064_v9  ;;  %v2124_v54 = vmul.f32 1.442695, %v2065_v5 }
 0x295   :  { %3896 = vpow2.f32 %v2112_v0  ;;  %v2126_v25 = vmul.f32 1.442695, %v2066_v30  ;;  %v2128_v61 = vmul.f32 1.442695, %v2067_v50  ;;  %v2130_v37 = vmul.f32 1.442695, %v2068_v53 }
 0x296   :  { %3898 = vpow2.f32 %v2114_v17  ;;  %v2132_v28 = vmul.f32 1.442695, %v2069_v8 }
 0x297   :  { %3900 = vpow2.f32 %v2116_v10 }
 0x298   :  { %3902 = vpow2.f32 %v2118_v55  ;;  %v5072_v48 = vpop.eup %3882 }
 0x299   :  { %3904 = vpow2.f32 %v2120_v39 }
 0x29a   :  { %3906 = vpow2.f32 %v2122_v16 }
 0x29b   :  { %3908 = vpow2.f32 %v2124_v54 }
 0x29c   :  { %v3885_v59 = vpop.eup %3884  ;;  %3910 = vpow2.f32 %v2126_v25 }
 0x29d   :  { %v2315_v24 = vmul.f32 %v3885_v59, %v5033_v3  ;;  %v2411_v29 = vrot.slane %v3885_v59, %v4633_v36  ;;  %v2404_v40 = vcombine.high %v3885_v59, %v3885_v59  ;;  %v5076_v11 = vpop.eup %3886  ;;  %3912 = vpow2.f32 %v2128_v61 }
 0x29e   :  { %v5083_v44 = vpop.eup %3888  ;;  %3914 = vpow2.f32 %v2130_v37  ;;  %v2206_v3 = vsel %vm1673_vm9, %v5076_v11, 0.0 }
 0x29f   :  { %3767 = vmatprep.mubr.msk.f32.mxu0 %vm1673_vm9, %v2315_v24  ;;  %v2427_v33 = vrot.slane %v2411_v29, %v4633_v36  ;;  %v2419_v34 = vcombine.high %v2411_v29, %v2411_v29  ;;  %v5081_v41 = vrot.slane %v2404_v40, %v4633_v36  ;;  %v5087_v45 = vpop.eup %3890  ;;  %3916 = vpow2.f32 %v2132_v28 }
 0x2a0   :  { %v2207_v56 = vsel %vm1673_vm9, %v5083_v44, 0.0  ;;  %v5093_v35 = vpop.eup %3892  ;;  %v2215_v60 = vsel %vm1673_vm9, %v5087_v45, 0.0 }
 0x2a1   :  { %v2505_v38 = vrot.slane %v2427_v33, %v4650_v43  ;;  %v2441_v49 = vrot.slane %v2419_v34, %v4633_v36  ;;  %v2208_v19 = vadd.f32 %v2207_v56, %v2206_v3  ;;  %v2449_v27 = vcombine.high %v2427_v33, %v2427_v33  ;;  %v5101_v52 = vpop.eup %3894 }
 0x2a2   :  { %v5099_v15 = vrot.slane %v5081_v41, %v4633_v36  ;;  %v2216_v20 = vsel %vm1673_vm9, %v5093_v35, 0.0  ;;  %v5112_v18 = vpop.eup %3896  ;;  %v2224_v63 = vsel %vm1673_vm9, %v5101_v52, 0.0 }
 0x2a3   :  { %v5106_v23 = vmul.f32 %v4960_v47, %v2505_v38  ;;  %v5109_v57 = vmul.f32 %v4962_v58, %v2505_v38  ;;  %v2509_v46 = vrot.slane %v2441_v49, %v4650_v43  ;;  %v2209_v26 = vrot.slane %v2208_v19, 4  ;;  %v5117_v13 = vpop.eup %3898 }
 0x2a4   :  { %v2217_v42 = vadd.f32 %v2216_v20, %v2215_v60  ;;  %v2513_v0 = vrot.slane %v2449_v27, %v4650_v43  ;;  %v2225_v47 = vsel %vm1673_vm9, %v5112_v18, 0.0  ;;  %v2451_v17 = vcombine.high %v2441_v49, %v2441_v49  ;;  %v5127_v5 = vpop.eup %3900 }
 0x2a5   :  { %v5122_v9 = vmul.f32 %v4966_v21, %v2509_v46  ;;  %v5125_v58 = vmul.f32 %v4970_v2, %v2509_v46  ;;  %v2210_v10 = vadd.f32 %v2209_v26, %v2208_v19  ;;  %v2226_v55 = vadd.f32 %v2225_v47, %v2224_v63  ;;  %v5131_v39 = vpop.eup %3902 }
 0x2a6   :  { %v2218_v30 = vrot.slane %v2217_v42, 4  ;;  %v2233_v50 = vsel %vm1673_vm9, %v5117_v13, 0.0  ;;  %v2234_v53 = vsel %vm1673_vm9, %v5127_v5, 0.0  ;;  %v5136_v21 = vmul.f32 %v4974_v7, %v2513_v0  ;;  %v5142_v16 = vpop.eup %3904 }
 0x2a7   :  { %v5139_v2 = vmul.f32 %v4979_v32, %v2513_v0  ;;  %v2517_v8 = vrot.slane %v2451_v17, %v4650_v43  ;;  %v2211_v54 = vrot.slane %v2210_v10, 2  ;;  %v2227_v61 = vrot.slane %v2226_v55, 4  ;;  %v5144_v37 = vpop.eup %3906 }
 0x2a8   :  { %v2219_v25 = vadd.f32 %v2218_v30, %v2217_v42  ;;  %v2235_v59 = vadd.f32 %v2234_v53, %v2233_v50  ;;  %v2242_v28 = vsel %vm1673_vm9, %v5131_v39, 0.0  ;;  %v2243_v7 = vsel %vm1673_vm9, %v5142_v16, 0.0  ;;  %v5156_v29 = vpop.eup %3908 }
 0x2a9   :  { %v5151_v24 = vmul.f32 %v4984_v1, %v2517_v8  ;;  %v5154_v32 = vmul.f32 %v4988_v62, %v2517_v8  ;;  %v2212_v40 = vadd.f32 %v2211_v54, %v2210_v10  ;;  %v2228_v34 = vadd.f32 %v2227_v61, %v2226_v55  ;;  %v5158_v56 = vpop.eup %3910 }
 0x2aa   :  { %v2220_v33 = vrot.slane %v2219_v25, 2  ;;  %v2236_v3 = vrot.slane %v2235_v59, 4  ;;  %v2244_v38 = vadd.f32 %v2243_v7, %v2242_v28  ;;  %v2251_v49 = vsel %vm1673_vm9, %v5144_v37, 0.0  ;;  %v5166_v62 = vpop.eup %3912 }
 0x2ab   :  { %v2252_v19 = vsel %vm1673_vm9, %v5156_v29, 0.0  ;;  %v2521_v1 = vrot.slane %v5099_v15, %v4650_v43  ;;  %v2213_v60 = vrot.slane %v2212_v40, 1  ;;  %v2229_v20 = vrot.slane %v2228_v34, 2  ;;  %v5168_v26 = vpop.eup %3914 }
 0x2ac   :  { %v2221_v27 = vadd.f32 %v2220_v33, %v2219_v25  ;;  %v2237_v46 = vadd.f32 %v2236_v3, %v2235_v59  ;;  %v2245_v42 = vrot.slane %v2244_v38, 4  ;;  %v2253_v63 = vadd.f32 %v2252_v19, %v2251_v49  ;;  %v5174_v17 = vpop.eup %3916 }
 0x2ad   :  { %v2260_v0 = vsel %vm1673_vm9, %v5158_v56, 0.0  ;;  %v2261_v47 = vsel %vm1673_vm9, %v5166_v62, 0.0  ;;  %v2214_v10 = vadd.f32 %v2213_v60, %v2212_v40  ;;  %v2230_v55 = vadd.f32 %v2229_v20, %v2228_v34 }
 0x2ae   :  { %v2222_v30 = vrot.slane %v2221_v27, 1  ;;  %v2238_v50 = vrot.slane %v2237_v46, 2  ;;  %v2246_v53 = vadd.f32 %v2245_v42, %v2244_v38  ;;  %v2254_v8 = vrot.slane %v2253_v63, 4 }
 0x2af   :  { %v2262_v54 = vadd.f32 %v2261_v47, %v2260_v0  ;;  %v2269_v25 = vsel %vm1673_vm9, %v5168_v26, 0.0  ;;  %v2231_v59 = vrot.slane %v2230_v55, 1  ;;  %v2270_v7 = vsel %vm1673_vm9, %v5174_v17, 0.0 }
 0x2b0   :  { %v2223_v61 = vadd.f32 %v2222_v30, %v2221_v27  ;;  %v2239_v28 = vadd.f32 %v2238_v50, %v2237_v46  ;;  %v2247_v33 = vrot.slane %v2246_v53, 2  ;;  %v2255_v3 = vadd.f32 %v2254_v8, %v2253_v63 }
 0x2b1   :  { %v2263_v49 = vrot.slane %v2262_v54, 4  ;;  %v2271_v19 = vadd.f32 %v2270_v7, %v2269_v25  ;;  %v2232_v40 = vadd.f32 %v2231_v59, %v2230_v55  ;;  %v2590_v38 = vmul.f32 %v4992_v12, %v2521_v1 }
 0x2b2   :  { %v2240_v60 = vrot.slane %v2239_v28, 1  ;;  %v2301_v34 = vsel %vm892_vm1, %v2223_v61, %v2214_v10  ;;  %v2248_v20 = vadd.f32 %v2247_v33, %v2246_v53  ;;  %v2256_v42 = vrot.slane %v2255_v3, 2 }
 0x2b3   :  { %v2264_v0 = vadd.f32 %v2263_v49, %v2262_v54  ;;  %v2272_v47 = vrot.slane %v2271_v19, 4  ;;  %v2302_v46 = vsel %vm895_vm2, %v2232_v40, %v2301_v34  ;;  %v2591_v30 = vmul.f32 %v4997_v4, %v2521_v1 }
 0x2b4   :  { %v2241_v27 = vadd.f32 %v2240_v60, %v2239_v28  ;;  %v2420_v63 = vcombine.high %v5081_v41, %v5081_v41  ;;  %v2249_v50 = vrot.slane %v2248_v20, 1  ;;  %v2257_v8 = vadd.f32 %v2256_v42, %v2255_v3 }
 0x2b5   :  { %v2265_v55 = vrot.slane %v2264_v0, 2  ;;  %v2273_v25 = vadd.f32 %v2272_v47, %v2271_v19  ;;  %v2450_v53 = vcombine.high %v5099_v15, %v5099_v15 }
 0x2b6   :  { %v2303_v10 = vsel %vm898_vm3, %v2241_v27, %v2302_v46  ;;  %v2448_v12 = vrot.slane %v2420_v63, %v4633_v36  ;;  %v2250_v54 = vadd.f32 %v2249_v50, %v2248_v20  ;;  %v2258_v61 = vrot.slane %v2257_v8, 1 }
 0x2b7   :  { %v2266_v59 = vadd.f32 %v2265_v55, %v2264_v0  ;;  %v2274_v28 = vrot.slane %v2273_v25, 2  ;;  %v2529_v4 = vrot.slane %v2450_v53, %v4650_v43 }
 0x2b8   :  { %v2452_v1 = vcombine.high %v2448_v12, %v2448_v12  ;;  %v2259_v7 = vadd.f32 %v2258_v61, %v2257_v8  ;;  %v2304_v3 = vsel %vm901_vm4, %v2250_v54, %v2303_v10 }
 0x2b9   :  { %v2267_v41 = vrot.slane %v2266_v59, 1  ;;  %v2275_v33 = vadd.f32 %v2274_v28, %v2273_v25  ;;  %v2594_v49 = vmul.f32 %v5009_v51, %v2529_v4  ;;  %v2595_v19 = vmul.f32 %v5016_v31, %v2529_v4 }
 0x2ba   :  { %v2305_v15 = vsel %vm904_vm5, %v2259_v7, %v2304_v3  ;;  %v2533_v34 = vrot.slane %v2452_v1, %v4650_v43  ;;  %v5278_v3 = vpop.permute.xlu1 %3017 }
 0x2bb   :  { %v2268_v40 = vadd.f32 %v2267_v41, %v2266_v59  ;;  %v2276_v60 = vrot.slane %v2275_v33, 1 }
 0x2bc   :  { %v2597_v0 = vmul.f32 %v5024_v22, %v2533_v34 }
 0x2bd   :  { %v2277_v20 = vadd.f32 %v2276_v60, %v2275_v33  ;;  %v2306_v42 = vsel %vm907_vm6, %v2268_v40, %v2305_v15  ;;  %v3281_v33 = vld [vmem:[#allocation8] sm:$0xff] }
 0x2bf   :  { %v2307_v47 = vsel %vm910_vm7, %v2277_v20, %v2306_v42 }
 0x2c0   :  { %v2311_v27 = vadd.f32 %v5072_v48, %v2307_v47 }
 0x2c2   :  { %3918 = vrcp.f32 %v2311_v27 }
 0x2cf   :  { %v3919_v46 = vpop.eup %3918 }
 0x2d0   :  { %v2316_v51 = vmul.f32 %v3919_v46, %v5072_v48  ;;  %v2460_v22 = vrot.slane %v3919_v46, %v4633_v36  ;;  %v5431_v48 = vld [vmem:[#allocation25_spill] sm:$0xff] }
 0x2d2   :  { %3768 = vmatmul.mubr.msk.f32.vlgmr.msra.gmra.mxu0 %vm1673_vm9, %v2316_v51 }
 0x2d3   :  { %3771 = vmatpush3.msk.msra.mxu0 %vm2323_vm10, %v4839_v6  ;;  %3772 = vmatprep.mubr.msk.f32.mxu0 %vm1673_vm9, %v5106_v23  ;;  %v2525_v6 = vrot.slane %v2448_v12, %v4650_v43 }
 0x2d5   :  { %v2592_v31 = vmul.f32 %v4999_v14, %v2525_v6  ;;  %v2593_v23 = vmul.f32 %v5431_v48, %v2525_v6 }
 0x2d6   :  { %3773 = vmatmul.mubr.msk.f32.vlgmr.msra.gmra.mxu0 %vm1673_vm9, %v5109_v57  ;;  %v2476_v57 = vrot.slane %v2460_v22, %v4633_v36 }
 0x2d7   :  { %3775 = vmatprep.mubr.msk.f32.mxu0 %vm1673_vm9, %v5122_v9  ;;  %v2468_v9 = vcombine.high %v2460_v22, %v2460_v22 }
 0x2d9   :  { %v2490_v14 = vrot.slane %v2468_v9, %v4633_v36 }
 0x2da   :  { %3776 = vmatmul.mubr.msk.f32.gmra.mxu0 %vm1673_vm9, %v5125_v58  ;;  %v5432_v58 = vld [vmem:[#allocation27_spill] sm:$0xff] }
 0x2db   :  { %3778 = vmatprep.mubr.msk.f32.mxu0 %vm1673_vm9, %v5136_v21  ;;  %v2596_v21 = vmul.f32 %v5432_v58, %v2533_v34  ;;  %v2500_v55 = vcombine.high %v2490_v14, %v2490_v14 }
 0x2dd   :  { %v2549_v12 = vrot.slane %v2500_v55, %v4650_v43 }
 0x2de   :  { %3779 = vmatmul.mubr.msk.f32.gmra.mxu0 %vm1673_vm9, %v5139_v2  ;;  %v2537_v2 = vrot.slane %v2476_v57, %v4650_v43 }
 0x2df   :  { %3781 = vmatprep.mubr.msk.f32.mxu0 %vm1673_vm9, %v5151_v24  ;;  %v2604_v54 = vmul.f32 %v5117_v13, %v2549_v12 }
 0x2e0   :  { %v2598_v24 = vmul.f32 %v5076_v11, %v2537_v2  ;;  %v2599_v63 = vmul.f32 %v5083_v44, %v2537_v2 }
 0x2e2   :  { %3782 = vmatmul.mubr.msk.f32.gmra.mxu0 %vm1673_vm9, %v5154_v32  ;;  %v2541_v32 = vrot.slane %v2490_v14, %v4650_v43 }
 0x2e3   :  { %3784 = vmatprep.mubr.msk.f32.mxu0 %vm1673_vm9, %v2590_v38  ;;  %v2498_v38 = vcombine.high %v2476_v57, %v2476_v57 }
 0x2e4   :  { %v2600_v50 = vmul.f32 %v5087_v45, %v2541_v32  ;;  %v2601_v11 = vmul.f32 %v5093_v35, %v2541_v32  ;;  %v2605_v35 = vmul.f32 %v5127_v5, %v2549_v12 }
 0x2e5   :  { %v2545_v8 = vrot.slane %v2498_v38, %v4650_v43 }
 0x2e6   :  { %3785 = vmatmul.mubr.msk.f32.gmra.mxu0 %vm1673_vm9, %v2591_v30  ;;  %v2453_v30 = vcombine.high %v3919_v46, %v3919_v46 }
 0x2e7   :  { %3787 = vmatprep.mubr.msk.f32.mxu0 %vm1673_vm9, %v2592_v31  ;;  %v2602_v10 = vmul.f32 %v5101_v52, %v2545_v8  ;;  %v2603_v45 = vmul.f32 %v5112_v18, %v2545_v8 }
 0x2e8   :  { %v2467_v25 = vrot.slane %v2453_v30, %v4633_v36 }
 0x2ea   :  { %3788 = vmatmul.mubr.msk.f32.gmra.mxu0 %vm1673_vm9, %v2593_v23  ;;  %v2483_v53 = vrot.slane %v2467_v25, %v4633_v36  ;;  %v2469_v44 = vcombine.high %v2467_v25, %v2467_v25 }
 0x2eb   :  { %3790 = vmatprep.mubr.msk.f32.mxu0 %vm1673_vm9, %v2594_v49 }
 0x2ec   :  { %v2553_v61 = vrot.slane %v2483_v53, %v4650_v43  ;;  %v2497_v59 = vrot.slane %v2469_v44, %v4633_v36  ;;  %v2499_v4 = vcombine.high %v2483_v53, %v2483_v53 }
 0x2ee   :  { %3791 = vmatmul.mubr.msk.f32.gmra.mxu0 %vm1673_vm9, %v2595_v19  ;;  %v2606_v52 = vmul.f32 %v5131_v39, %v2553_v61  ;;  %v2557_v28 = vrot.slane %v2497_v59, %v4650_v43  ;;  %v2607_v18 = vmul.f32 %v5142_v16, %v2553_v61  ;;  %v2561_v36 = vrot.slane %v2499_v4, %v4650_v43 }
 0x2ef   :  { %3793 = vmatprep.mubr.msk.f32.mxu0 %vm1673_vm9, %v2596_v21  ;;  %v2501_v1 = vcombine.high %v2497_v59, %v2497_v59 }
 0x2f0   :  { %v2608_v13 = vmul.f32 %v5144_v37, %v2557_v28  ;;  %v2609_v5 = vmul.f32 %v5156_v29, %v2557_v28  ;;  %v2610_v39 = vmul.f32 %v5158_v56, %v2561_v36  ;;  %v2611_v16 = vmul.f32 %v5166_v62, %v2561_v36  ;;  %v3284_v29 = vld [vmem:[#allocation8 + $0x18] sm:$0xff]  ;;  %v3282_v56 = vld [vmem:[#allocation8 + $0x8] sm:$0xff]  ;;  %v2978_v62 = vpop.permute.xlu0 %2977 }
 0x2f1   :  { %v2565_v7 = vrot.slane %v2501_v1, %v4650_v43  ;;  %3820 = vmatprep.subr.mxu1 %v3284_v29  ;;  %v3283_v43 = vld [vmem:[#allocation8 + $0x10] sm:$0xff] }
 0x2f2   :  { %3794 = vmatmul.mubr.msk.f32.gmra.mxu0 %vm1673_vm9, %v2597_v0  ;;  %3821 = vmatpush3.msra.mxu1 %v3284_v29 }
 0x2f3   :  { %3796 = vmatprep.mubr.msk.f32.mxu0 %vm1673_vm9, %v2598_v24  ;;  %v2612_v37 = vmul.f32 %v5168_v26, %v2565_v7  ;;  %v2613_v41 = vmul.f32 %v5174_v17, %v2565_v7  ;;  %3822 = vmatprep.subr.mxu1 %v3283_v43  ;;  %v2982_v17 = vpop.permute.xlu1 %2981 }
 0x2f4   :  { %3823 = vmatpush3.msra.mxu1 %v3283_v43  ;;  %v2976_v26 = vpop.permute.xlu0 %2975 }
 0x2f5   :  { %3824 = vmatprep.subr.mxu1 %v3282_v56 }
 0x2f6   :  { %3797 = vmatmul.mubr.msk.f32.gmra.mxu0 %vm1673_vm9, %v2599_v63  ;;  %3825 = vmatpush3.msra.mxu1 %v3282_v56 }
 0x2f7   :  { %3799 = vmatprep.mubr.msk.f32.mxu0 %vm1673_vm9, %v2600_v50  ;;  %3826 = vmatprep.subr.mxu1 %v3281_v33  ;;  %v5284_v40 = vpop.permute.xlu1 %3021 }
 0x2f8   :  { %3827 = vmatpush3.msra.mxu1 %v3281_v33  ;;  %v5280_v49 = vpop.permute.xlu0 %3015 }
 0x2fa   :  { %3800 = vmatmul.mubr.msk.f32.gmra.mxu0 %vm1673_vm9, %v2601_v11 }
 0x2fb   :  { %3802 = vmatprep.mubr.msk.f32.mxu0 %vm1673_vm9, %v2602_v10  ;;  %v2980_v15 = vpop.permute.xlu1 %2979 }
 0x2fc   :  { %v5282_v19 = vpop.permute.xlu0 %3019 }
 0x2fe   :  { %3803 = vmatmul.mubr.msk.f32.gmra.mxu0 %vm1673_vm9, %v2603_v45 }
 0x2ff   :  { %3805 = vmatprep.mubr.msk.f32.mxu0 %vm1673_vm9, %v2604_v54  ;;  %v2986_v20 = vpop.permute.xlu1 %2985 }
 0x300   :  { %v2984_v60 = vpop.permute.xlu0 %2983 }
 0x302   :  { %3806 = vmatmul.mubr.msk.f32.gmra.mxu0 %vm1673_vm9, %v2605_v35 }
 0x303   :  { %3808 = vmatprep.mubr.msk.f32.mxu0 %vm1673_vm9, %v2606_v52  ;;  %v5288_v0 = vpop.permute.xlu1 %3025 }
 0x304   :  { %v5286_v34 = vpop.permute.xlu0 %3023 }
 0x306   :  { %3809 = vmatmul.mubr.msk.f32.gmra.mxu0 %vm1673_vm9, %v2607_v18 }
 0x307   :  { %3811 = vmatprep.mubr.msk.f32.mxu0 %vm1673_vm9, %v2608_v13  ;;  %v2990_v27 = vpop.permute.xlu1 %2989 }
 0x308   :  { %v2988_v42 = vpop.permute.xlu0 %2987 }
 0x30a   :  { %3812 = vmatmul.mubr.msk.f32.gmra.mxu0 %vm1673_vm9, %v2609_v5 }
 0x30b   :  { %3814 = vmatprep.mubr.msk.f32.mxu0 %vm1673_vm9, %v2610_v39  ;;  %v5296_v31 = vpop.permute.xlu1 %3029 }
 0x30c   :  { %v5290_v47 = vpop.permute.xlu0 %3027 }
 0x30e   :  { %3815 = vmatmul.mubr.msk.f32.gmra.mxu0 %vm1673_vm9, %v2611_v16 }
 0x30f   :  { %3817 = vmatprep.mubr.msk.f32.mxu0 %vm1673_vm9, %v2612_v37  ;;  %v2994_v9 = vpop.permute.xlu1 %2993 }
 0x310   :  { %v2992_v51 = vpop.permute.xlu0 %2991 }
 0x312   :  { %3818 = vmatmul.mubr.msk.f32.gmra.mxu0 %vm1673_vm9, %v2613_v41 }
 0x313   :  { %v2998_v25 = vpop.permute.xlu1 %2997 }
 0x314   :  { %v2996_v23 = vpop.permute.xlu0 %2995 }
 0x317   :  { %v3002_v5 = vpop.permute.xlu1 %3001 }
 0x318   :  { %v3000_v38 = vpop.permute.xlu0 %2999 }
 0x31c   :  { %v3004_v28 = vpop.permute.xlu0 %3003 }
 0x392   :  { %v5292_v46 = vpop.f32.mrf.mxu0 }
 0x394   :  { %v5294_v6 = vpop.f32.mrf.mxu0 }
 0x396   :  { %v3774_v22 = vpop.f32.mrf.mxu0 }
 0x397   :  { %v3072_v30 = vmul.f32 %v3774_v22, %v2978_v62  ;;  %v3006_v22 = vpop.permute.xlu1 %3005 }
 0x398   :  { %v2776_v48 = vpop.f32.mrf.mxu0 }
 0x399   :  { %v3071_v14 = vmul.f32 %v2976_v26, %v2776_v48  ;;  %v3104_v45 = vsel %vm163_vm0, %v3072_v30, 0.0 }
 0x39a   :  { %v3777_v57 = vpop.f32.mrf.mxu0 }
 0x39b   :  { %v3074_v21 = vmul.f32 %v3777_v57, %v2982_v17  ;;  %v3103_v11 = vsel %vm163_vm0, %v3071_v14, 0.0  ;;  %v3008_v17 = vpop.permute.xlu0 %3007 }
 0x39c   :  { %v2786_v58 = vpop.f32.mrf.mxu0  ;;  %v3105_v59 = vadd.f32 %v3104_v45, %v3103_v11  ;;  %v3010_v45 = vpop.permute.xlu1 %3009 }
 0x39d   :  { %v3073_v2 = vmul.f32 %v2980_v15, %v2786_v58  ;;  %v3113_v8 = vsel %vm163_vm0, %v3074_v21, 0.0 }
 0x39e   :  { %v3780_v24 = vpop.f32.mrf.mxu0  ;;  %v3106_v16 = vrot.slane %v3105_v59, 4 }
 0x39f   :  { %v3112_v32 = vsel %vm163_vm0, %v3073_v2, 0.0  ;;  %v3076_v63 = vmul.f32 %v3780_v24, %v2986_v20 }
 0x3a0   :  { %v2796_v50 = vpop.f32.mrf.mxu0  ;;  %v3114_v10 = vadd.f32 %v3113_v8, %v3112_v32  ;;  %v3107_v20 = vadd.f32 %v3106_v16, %v3105_v59  ;;  %v3012_v8 = vpop.permute.xlu0 %3011 }
 0x3a1   :  { %v3075_v55 = vmul.f32 %v2984_v60, %v2796_v50  ;;  %v3122_v54 = vsel %vm163_vm0, %v3076_v63, 0.0 }
 0x3a2   :  { %v3783_v12 = vpop.f32.mrf.mxu0  ;;  %v3115_v4 = vrot.slane %v3114_v10, 4  ;;  %v3108_v30 = vrot.slane %v3107_v20, 2 }
 0x3a3   :  { %v3121_v53 = vsel %vm163_vm0, %v3075_v55, 0.0  ;;  %v3078_v44 = vmul.f32 %v3783_v12, %v2990_v27 }
 0x3a4   :  { %v2806_v61 = vpop.f32.mrf.mxu0  ;;  %v3123_v35 = vadd.f32 %v3122_v54, %v3121_v53  ;;  %v3116_v29 = vadd.f32 %v3115_v4, %v3114_v10 }
 0x3a5   :  { %v3077_v52 = vmul.f32 %v2988_v42, %v2806_v61  ;;  %v3131_v13 = vsel %vm163_vm0, %v3078_v44, 0.0 }
 0x3a6   :  { %v3786_v18 = vpop.f32.mrf.mxu0  ;;  %v3124_v37 = vrot.slane %v3123_v35, 4  ;;  %v3117_v48 = vrot.slane %v3116_v29, 2 }
 0x3a7   :  { %v3130_v36 = vsel %vm163_vm0, %v3077_v52, 0.0  ;;  %v3080_v1 = vmul.f32 %v3786_v18, %v2994_v9 }
 0x3a8   :  { %v3132_v39 = vadd.f32 %v3131_v13, %v3130_v36  ;;  %v2816_v7 = vpop.f32.mrf.mxu0  ;;  %v3125_v42 = vadd.f32 %v3124_v37, %v3123_v35  ;;  %v3118_v55 = vadd.f32 %v3117_v48, %v3116_v29  ;;  %v3109_v35 = vadd.f32 %v3108_v30, %v3107_v20  ;;  %v5314_v37 = vpop.permute.xlu0 %3031 }
 0x3a9   :  { %v3079_v41 = vmul.f32 %v2992_v51, %v2816_v7  ;;  %v3140_v62 = vsel %vm163_vm0, %v3080_v1, 0.0 }
 0x3aa   :  { %v3133_v43 = vrot.slane %v3132_v39, 4  ;;  %v3789_v56 = vpop.f32.mrf.mxu0  ;;  %v3126_v63 = vrot.slane %v3125_v42, 2  ;;  %v3119_v18 = vrot.slane %v3118_v55, 1 }
 0x3ab   :  { %v3139_v33 = vsel %vm163_vm0, %v3079_v41, 0.0  ;;  %v3082_v26 = vmul.f32 %v3789_v56, %v2998_v25 }
 0x3ac   :  { %v3141_v60 = vadd.f32 %v3140_v62, %v3139_v33  ;;  %v2826_v15 = vpop.f32.mrf.mxu0  ;;  %v3134_v57 = vadd.f32 %v3133_v43, %v3132_v39  ;;  %v3127_v52 = vadd.f32 %v3126_v63, %v3125_v42  ;;  %v3110_v62 = vrot.slane %v3109_v35, 1  ;;  %v5318_v30 = vpop.permute.xlu0 %3035 }
 0x3ad   :  { %v3081_v27 = vmul.f32 %v2996_v23, %v2826_v15  ;;  %v3149_v51 = vsel %vm163_vm0, %v3082_v26, 0.0  ;;  %v3014_v26 = vpop.permute.xlu1 %3013 }
 0x3ae   :  { %v3142_v9 = vrot.slane %v3141_v60, 4  ;;  %v3792_v58 = vpop.f32.mrf.mxu0  ;;  %v3135_v25 = vrot.slane %v3134_v57, 2  ;;  %v3128_v33 = vrot.slane %v3127_v52, 1 }
 0x3af   :  { %v3148_v21 = vsel %vm163_vm0, %v3081_v27, 0.0  ;;  %v3084_v2 = vmul.f32 %v3792_v58, %v3002_v5 }
 0x3b0   :  { %v3143_v14 = vadd.f32 %v3142_v9, %v3141_v60  ;;  %v3150_v24 = vadd.f32 %v3149_v51, %v3148_v21  ;;  %v2836_v32 = vpop.f32.mrf.mxu0  ;;  %v3120_v60 = vadd.f32 %v3119_v18, %v3118_v55 }
 0x3b1   :  { %v3083_v50 = vmul.f32 %v3000_v38, %v2836_v32  ;;  %v3158_v12 = vsel %vm163_vm0, %v3084_v2, 0.0  ;;  %v3136_v38 = vadd.f32 %v3135_v25, %v3134_v57  ;;  %v3129_v32 = vadd.f32 %v3128_v33, %v3127_v52 }
 0x3b2   :  { %v3151_v23 = vrot.slane %v3150_v24, 4  ;;  %v3795_v11 = vpop.f32.mrf.mxu0  ;;  %v3144_v10 = vrot.slane %v3143_v14, 2 }
 0x3b3   :  { %v3157_v53 = vsel %vm163_vm0, %v3083_v50, 0.0  ;;  %v3086_v44 = vmul.f32 %v3795_v11, %v3006_v22  ;;  %v3137_v15 = vrot.slane %v3136_v38, 1 }
 0x3b4   :  { %v3152_v54 = vadd.f32 %v3151_v23, %v3150_v24  ;;  %v3159_v61 = vadd.f32 %v3158_v12, %v3157_v53  ;;  %v2846_v59 = vpop.f32.mrf.mxu0  ;;  %v3145_v5 = vadd.f32 %v3144_v10, %v3143_v14  ;;  %v3111_v24 = vadd.f32 %v3110_v62, %v3109_v35 }
 0x3b5   :  { %v3085_v4 = vmul.f32 %v3004_v28, %v2846_v59  ;;  %v3167_v39 = vsel %vm163_vm0, %v3086_v44, 0.0  ;;  %v3138_v63 = vadd.f32 %v3137_v15, %v3136_v38 }
 0x3b6   :  { %v3153_v13 = vrot.slane %v3152_v54, 2  ;;  %v3160_v36 = vrot.slane %v3159_v61, 4  ;;  %v3798_v1 = vpop.f32.mrf.mxu0  ;;  %v3146_v22 = vrot.slane %v3145_v5, 1  ;;  %v3263_v44 = vsel %vm892_vm1, %v3120_v60, %v3111_v24 }
 0x3b7   :  { %v3166_v7 = vsel %vm163_vm0, %v3085_v4, 0.0  ;;  %v3088_v16 = vmul.f32 %v3798_v1, %v3010_v45  ;;  %v3264_v59 = vsel %vm895_vm2, %v3129_v32, %v3263_v44 }
 0x3b8   :  { %v3154_v41 = vadd.f32 %v3153_v13, %v3152_v54  ;;  %v3161_v29 = vadd.f32 %v3160_v36, %v3159_v61  ;;  %v3168_v43 = vadd.f32 %v3167_v39, %v3166_v7  ;;  %v2856_v56 = vpop.f32.mrf.mxu0  ;;  %v3147_v11 = vadd.f32 %v3146_v22, %v3145_v5  ;;  %v2936_v7 = vpop.permute.xlu0 %2935 }
 0x3b9   :  { %v3087_v28 = vmul.f32 %v3008_v17, %v2856_v56  ;;  %v3176_v48 = vsel %vm163_vm0, %v3088_v16, 0.0  ;;  %v3265_v4 = vsel %vm898_vm3, %v3138_v63, %v3264_v59  ;;  %v2941_v56 = vmul.f32 %v2936_v7, %v5294_v6 }
 0x3ba   :  { %v3162_v20 = vrot.slane %v3161_v29, 2  ;;  %v3169_v42 = vrot.slane %v3168_v43, 4  ;;  %v3801_v27 = vpop.f32.mrf.mxu0  ;;  %v3155_v58 = vrot.slane %v3154_v41, 1  ;;  %v3266_v1 = vsel %vm901_vm4, %v3147_v11, %v3265_v4 }
 0x3bb   :  { %v3175_v57 = vsel %vm163_vm0, %v3087_v28, 0.0  ;;  %v3090_v9 = vmul.f32 %v3801_v27, %v3014_v26 }
 0x3bc   :  { %v3163_v51 = vadd.f32 %v3162_v20, %v3161_v29  ;;  %v3170_v21 = vadd.f32 %v3169_v42, %v3168_v43  ;;  %v3177_v2 = vadd.f32 %v3176_v48, %v3175_v57  ;;  %v2866_v14 = vpop.f32.mrf.mxu0  ;;  %v3156_v45 = vadd.f32 %v3155_v58, %v3154_v41 }
 0x3bd   :  { %v3089_v17 = vmul.f32 %v3012_v8, %v2866_v14  ;;  %v3185_v10 = vsel %vm163_vm0, %v3090_v9, 0.0 }
 0x3be   :  { %v3164_v50 = vrot.slane %v3163_v51, 1  ;;  %v3171_v55 = vrot.slane %v3170_v21, 2  ;;  %v3178_v25 = vrot.slane %v3177_v2, 4  ;;  %v3804_v23 = vpop.f32.mrf.mxu0 }
 0x3bf   :  { %v3184_v12 = vsel %vm163_vm0, %v3089_v17, 0.0  ;;  %v3092_v53 = vmul.f32 %v3804_v23, %v5278_v3 }
 0x3c0   :  { %v3172_v54 = vadd.f32 %v3171_v55, %v3170_v21  ;;  %v3186_v61 = vadd.f32 %v3185_v10, %v3184_v12  ;;  %v2876_v8 = vpop.f32.mrf.mxu0  ;;  %v3165_v35 = vadd.f32 %v3164_v50, %v3163_v51  ;;  %v3179_v38 = vadd.f32 %v3178_v25, %v3177_v2 }
 0x3c1   :  { %v3091_v52 = vmul.f32 %v5280_v49, %v2876_v8  ;;  %v3194_v3 = vsel %vm163_vm0, %v3092_v53, 0.0  ;;  %v3267_v49 = vsel %vm904_vm5, %v3156_v45, %v3266_v1 }
 0x3c2   :  { %v3173_v18 = vrot.slane %v3172_v54, 1  ;;  %v3187_v13 = vrot.slane %v3186_v61, 4  ;;  %v3807_v36 = vpop.f32.mrf.mxu0  ;;  %v3268_v33 = vsel %vm907_vm6, %v3165_v35, %v3267_v49  ;;  %v3180_v28 = vrot.slane %v3179_v38, 2 }
 0x3c3   :  { %v3193_v5 = vsel %vm163_vm0, %v3091_v52, 0.0  ;;  %v3094_v39 = vmul.f32 %v3807_v36, %v5284_v40 }
 0x3c4   :  { %v3174_v16 = vadd.f32 %v3173_v18, %v3172_v54  ;;  %v3188_v41 = vadd.f32 %v3187_v13, %v3186_v61  ;;  %v3195_v29 = vadd.f32 %v3194_v3, %v3193_v5  ;;  %v2886_v43 = vpop.f32.mrf.mxu0  ;;  %v3181_v58 = vadd.f32 %v3180_v28, %v3179_v38 }
 0x3c5   :  { %v3093_v62 = vmul.f32 %v5282_v19, %v2886_v43  ;;  %v3203_v40 = vsel %vm163_vm0, %v3094_v39, 0.0 }
 0x3c6   :  { %v3189_v26 = vrot.slane %v3188_v41, 2  ;;  %v3196_v60 = vrot.slane %v3195_v29, 4  ;;  %v3810_v15 = vpop.f32.mrf.mxu0  ;;  %v3269_v20 = vsel %vm910_vm7, %v3174_v16, %v3268_v33  ;;  %v3182_v23 = vrot.slane %v3181_v58, 1 }
 0x3c7   :  { %v3202_v42 = vsel %vm163_vm0, %v3093_v62, 0.0  ;;  %v3096_v27 = vmul.f32 %v3810_v15, %v5288_v0  ;;  %v3279_v22 = vadd.f32 %v3269_v20, %v2941_v56  ;;  %v3034_v0 = vpop.permute.xlu1 %3033 }
 0x3c8   :  { %v3190_v48 = vadd.f32 %v3189_v26, %v3188_v41  ;;  %v3197_v57 = vadd.f32 %v3196_v60, %v3195_v29  ;;  %v3204_v6 = vadd.f32 %v3203_v40, %v3202_v42  ;;  %v2896_v9 = vpop.f32.mrf.mxu0 }
 0x3c9   :  { %v3095_v19 = vmul.f32 %v5286_v34, %v2896_v9  ;;  %3828 = vmatprep.mubr.msk.f32.mxu1 %vm163_vm0, %v3279_v22  ;;  %v3212_v14 = vsel %vm163_vm0, %v3096_v27, 0.0 }
 0x3ca   :  { %v3198_v51 = vrot.slane %v3197_v57, 2  ;;  %v3205_v21 = vrot.slane %v3204_v6, 4  ;;  %v3813_v2 = vpop.f32.mrf.mxu0  ;;  %v3191_v17 = vrot.slane %v3190_v48, 1 }
 0x3cb   :  { %v3211_v24 = vsel %vm163_vm0, %v3095_v19, 0.0  ;;  %v3098_v32 = vmul.f32 %v3813_v2, %v5296_v31  ;;  %v3038_v18 = vpop.permute.xlu1 %3037 }
 0x3cc   :  { %v3199_v63 = vadd.f32 %v3198_v51, %v3197_v57  ;;  %v3206_v50 = vadd.f32 %v3205_v21, %v3204_v6  ;;  %v3213_v55 = vadd.f32 %v3212_v14, %v3211_v24  ;;  %v2906_v25 = vpop.f32.mrf.mxu0  ;;  %v3192_v61 = vadd.f32 %v3191_v17, %v3190_v48 }
 0x3cd   :  { %v3097_v34 = vmul.f32 %v5290_v47, %v2906_v25  ;;  %v3221_v44 = vsel %vm163_vm0, %v3098_v32, 0.0  ;;  %v3183_v47 = vadd.f32 %v3182_v23, %v3181_v58  ;;  %v3502_v25 = vld [vmem:[%s5380_s9] ss:$0 sm:$0xff] }
 0x3ce   :  { %v3200_v11 = vrot.slane %v3199_v63, 1  ;;  %v3207_v10 = vrot.slane %v3206_v50, 2  ;;  %v3214_v12 = vrot.slane %v3213_v55, 4  ;;  %v3816_v53 = vpop.f32.mrf.mxu0 }
 0x3cf   :  { %v3220_v45 = vsel %vm163_vm0, %v3097_v34, 0.0  ;;  %v3100_v54 = vmul.f32 %v3816_v53, %v3034_v0  ;;  %v3270_v7 = vsel %vm892_vm1, %v3192_v61, %v3183_v47  ;;  %v2938_v24 = vpop.permute.xlu1 %2937 }
 0x3d0   :  { %v3208_v31 = vadd.f32 %v3207_v10, %v3206_v50  ;;  %v3215_v8 = vadd.f32 %v3214_v12, %v3213_v55  ;;  %v3222_v59 = vadd.f32 %v3221_v44, %v3220_v45  ;;  %v2916_v35 = vpop.f32.mrf.mxu0  ;;  %v3201_v52 = vadd.f32 %v3200_v11, %v3199_v63 }
 0x3d1   :  { %v3099_v4 = vmul.f32 %v5314_v37, %v2916_v35  ;;  %v3230_v3 = vsel %vm163_vm0, %v3100_v54, 0.0  ;;  %v2942_v17 = vmul.f32 %v5292_v46, %v2938_v24 }
 0x3d2   :  { %v3209_v38 = vrot.slane %v3208_v31, 1  ;;  %v3223_v13 = vrot.slane %v3222_v59, 4  ;;  %v3819_v36 = vpop.f32.mrf.mxu0  ;;  %v3216_v1 = vrot.slane %v3215_v8, 2  ;;  %v3271_v49 = vsel %vm895_vm2, %v3201_v52, %v3270_v7 }
 0x3d3   :  { %v3229_v5 = vsel %vm163_vm0, %v3099_v4, 0.0  ;;  %v3102_v39 = vmul.f32 %v3819_v36, %v3038_v18 }
 0x3d4   :  { %v3210_v16 = vadd.f32 %v3209_v38, %v3208_v31  ;;  %v3224_v41 = vadd.f32 %v3223_v13, %v3222_v59  ;;  %v3231_v29 = vadd.f32 %v3230_v3, %v3229_v5  ;;  %v2926_v43 = vpop.f32.mrf.mxu0  ;;  %v3217_v28 = vadd.f32 %v3216_v1, %v3215_v8 }
 0x3d5   :  { %v3101_v37 = vmul.f32 %v5318_v30, %v2926_v43  ;;  %v3239_v26 = vsel %vm163_vm0, %v3102_v39, 0.0 }
 0x3d6   :  { %v3272_v56 = vsel %vm898_vm3, %v3210_v16, %v3271_v49  ;;  %v3225_v62 = vrot.slane %v3224_v41, 2  ;;  %v3232_v33 = vrot.slane %v3231_v29, 4  ;;  %v3218_v22 = vrot.slane %v3217_v28, 1 }
 0x3d7   :  { %v3238_v60 = vsel %vm163_vm0, %v3101_v37, 0.0 }
 0x3d8   :  { %v3226_v15 = vadd.f32 %v3225_v62, %v3224_v41  ;;  %v3233_v20 = vadd.f32 %v3232_v33, %v3231_v29  ;;  %v3240_v40 = vadd.f32 %v3239_v26, %v3238_v60  ;;  %v3219_v19 = vadd.f32 %v3218_v22, %v3217_v28 }
 0x3da   :  { %v3234_v42 = vrot.slane %v3233_v20, 2  ;;  %v3241_v27 = vrot.slane %v3240_v40, 4  ;;  %v3227_v48 = vrot.slane %v3226_v15, 1  ;;  %v3273_v14 = vsel %vm901_vm4, %v3219_v19, %v3272_v56 }
 0x3dc   :  { %v3235_v57 = vadd.f32 %v3234_v42, %v3233_v20  ;;  %v3242_v6 = vadd.f32 %v3241_v27, %v3240_v40  ;;  %v3228_v58 = vadd.f32 %v3227_v48, %v3226_v15 }
 0x3de   :  { %v3236_v9 = vrot.slane %v3235_v57, 1  ;;  %v3243_v30 = vrot.slane %v3242_v6, 2  ;;  %v3274_v32 = vsel %vm904_vm5, %v3228_v58, %v3273_v14 }
 0x3e0   :  { %v3244_v51 = vadd.f32 %v3243_v30, %v3242_v6  ;;  %v3237_v21 = vadd.f32 %v3236_v9, %v3235_v57 }
 0x3e2   :  { %v3245_v2 = vrot.slane %v3244_v51, 1  ;;  %v3275_v63 = vsel %vm907_vm6, %v3237_v21, %v3274_v32 }
 0x3e4   :  { %v3246_v0 = vadd.f32 %v3245_v2, %v3244_v51 }
 0x3e6   :  { %v3276_v50 = vsel %vm910_vm7, %v3246_v0, %v3275_v63 }
 0x3e7   :  { %v3280_v55 = vadd.f32 %v3276_v50, %v2942_v17 }
 0x3e9   :  { %3829 = vmatmul.mubr.msk.f32.vlgmr.msra.gmra.mxu1 %vm163_vm0, %v3280_v55 }
 0x4a9   :  { %v3830_v34 = vpop.f32.mrf.mxu1 }
 0x4aa   :  { %v3370_v23 = vadd.f32 %v3830_v34, %v3502_v25 }
 0x4ab   :  { %v3364_v11 = vpop.f32.mrf.mxu1 }
 0x4ac   :  { %3374 = vst [vmem:[#allocation10 + $0x8] sm:$0xff] %v3370_v23  ;;  %v3365_v10 = vadd.f32 %v3502_v25, %v3364_v11 }
 0x4ae   :  { %3373 = vst [vmem:[#allocation10] sm:$0xff] %v3365_v10 }
 0x4af   :  { %4011 = shalt.err (!%p4008_p10)
}
 0x4b0   :  { %3386 = dma.vmem_to_hbm [thread:$0]  %s3381_s24, 256, %s5383_s12, [#allocation4], %s4030_s26, %s4030_s26, %s4031_s27  }
 0x4b1   :  { %4026 = dma.done.wait [#allocation4], 256  }
 0x4b2   :  { %4027 = vsyncadd [#allocation4], 4294967040 }
 0x4b3   :  { %3390 = vsyncpa [#allocation3], 1 }
 0x4b4   :  { %3391 = vsyncpa [#allocation6], 1 }
 0x4b5   :  { %3392 = vsyncpa [#allocation9], 1 }
 0x4b6   :  { %3393 = vsyncpa [#allocation4], 1 }

// kernel: tpu_custom_call.1
= control target key start
LH: loop header
LB: loop body
LE: loop exit
PB: predicated region body
PF: predicated region fallthrough
CT: control target
= control target key end

     0   :  { %17 = vsyncpa [#allocation3], 0  ;;  %s5371_s0 = inlined_call_operand.hbm [shape: f32[16,16,32], index: 0, kind: input, shape index: {}]   ;;  %s5372_s1 = inlined_call_operand.hbm [shape: f32[16,32], index: 1, kind: input, shape index: {}]   ;;  %s5373_s2 = inlined_call_operand.vmem [shape: f32[1,32], index: 2, kind: input, shape index: {}]   ;;  %s5374_s3 = inlined_call_operand.vmem [shape: f32[32,32], index: 3, kind: input, shape index: {}]   ;;  %s5375_s4 = inlined_call_operand.hbm [shape: f32[32,64], index: 4, kind: input, shape index: {}]   ;;  %s5376_s5 = inlined_call_operand.vmem [shape: f32[1,32], index: 5, kind: input, shape index: {}]   ;;  %s5377_s6 = inlined_call_operand.vmem [shape: f32[1,64], index: 6, kind: input, shape index: {}]   ;;  %s5378_s7 = inlined_call_operand.vmem [shape: f32[1,64], index: 7, kind: input, shape index: {}]   ;;  %s5379_s8 = inlined_call_operand.hbm [shape: f32[32,128], index: 8, kind: input, shape index: {}]   ;;  %s5380_s9 = inlined_call_operand.vmem [shape: f32[1,128], index: 9, kind: input, shape index: {}]   ;;  %s5381_s10 = inlined_call_operand.vmem [shape: f32[32,4], index: 10, kind: input, shape index: {}]   ;;  %s5382_s11 = inlined_call_operand.vmem [shape: f32[4,32], index: 11, kind: input, shape index: {}]   ;;  %s5383_s12 = inlined_call_operand.hbm [shape: f32[16,128], index: 12, kind: output, shape index: {}]  }
   0x1   :  { %18 = vsyncpa [#allocation6], 0 }
   0x2   :  { %19 = vsyncpa [#allocation9], 0 }
   0x3   :  { %20 = vsyncpa [#allocation4], 0  ;;  %s4028_s21 = smov [#allocation5]   ;;  %s4029_s23 = smov [#allocation2]  }
   0x4   :  { %s38_s22 = sshll.u32 %s4028_s21, 4  ;;  %s26_s24 = sshll.u32 %s4029_s23, 4  ;;  %s39_s22 = int_to_ptr.vmem [resolvable:$true] %s38_s22  ;;  %s27_s24 = int_to_ptr.vmem [resolvable:$true] %s26_s24 }
   0x5   :  { %s3928_s25 = scalar_lea.vmem %s39_s22, 256  ;;  %p3933_p1 = scmp.lt.s32.totalorder %s39_s22, %s39_s22 }
   0x6   :  { %p3929_p0 = scmp.ne.s32.totalorder %s39_s22, %s3928_s25  ;;  %p3934_p2 = scmp.lt.s32.totalorder %s3928_s25, %s3928_s25 }
   0x8   :  { %p3935_p3 = por %p3934_p2, %p3933_p1 }
   0xa   :  { %p3936_p4 = pnand %p3935_p3, %p3929_p0 }
   0xc   :  { %3939 = shalt.err (!%p3936_p4)
}
   0xd   :  { %s4030_s26 = smov 128   ;;  %s4031_s27 = smov 8  }
   0xe   :  { %44 = dma.hbm_to_vmem [thread:$0]  %s5372_s1, 256, %s39_s22, [#allocation6], %s4030_s26, %s4030_s26, %s4031_s27  }
   0xf   :  { %s3948_s30 = scalar_lea.vmem %s27_s24, 4096  ;;  %p3953_p6 = scmp.lt.s32.totalorder %s27_s24, %s27_s24 }
  0x10   :  { %p3949_p5 = scmp.ne.s32.totalorder %s27_s24, %s3948_s30  ;;  %p3954_p7 = scmp.lt.s32.totalorder %s3948_s30, %s3948_s30 }
  0x12   :  { %p3955_p8 = por %p3954_p7, %p3953_p6 }
  0x14   :  { %p3956_p9 = pnand %p3955_p8, %p3949_p5 }
  0x16   :  { %3959 = shalt.err (!%p3956_p9)
}
  0x17   :  { %32 = dma.hbm_to_vmem [thread:$0]  %s5371_s0, 4096, %s27_s24, [#allocation3], %s4030_s26, %s4030_s26, %s4031_s27  }
  0x18   :  { %s4032_s15 = smov [#allocation7]   ;;  %s4033_s17 = smov [#allocation8]  }
  0x19   :  { %s54_s16 = sshll.u32 %s4032_s15, 4  ;;  %s72_s18 = sshll.u32 %s4033_s17, 4  ;;  %s55_s16 = int_to_ptr.vmem [resolvable:$true] %s54_s16  ;;  %s73_s18 = int_to_ptr.vmem [resolvable:$true] %s72_s18 }
  0x1a   :  { %s3968_s1 = scalar_lea.vmem %s55_s16, 512  ;;  %p3973_p11 = scmp.lt.s32.totalorder %s55_s16, %s55_s16 }
  0x1b   :  { %p3969_p10 = scmp.ne.s32.totalorder %s55_s16, %s3968_s1  ;;  %p3974_p12 = scmp.lt.s32.totalorder %s3968_s1, %s3968_s1 }
  0x1d   :  { %p3975_p13 = por %p3974_p12, %p3973_p11 }
  0x1f   :  { %p3976_p0 = pnand %p3975_p13, %p3969_p10 }
  0x21   :  { %3979 = shalt.err (!%p3976_p0)
}
  0x22   :  { %60 = dma.hbm_to_vmem [thread:$0]  %s5375_s4, 512, %s55_s16, [#allocation6], %s4030_s26, %s4030_s26, %s4031_s27  }
  0x23   :  { %s3988_s0 = scalar_lea.vmem %s73_s18, 512  ;;  %p3993_p2 = scmp.lt.s32.totalorder %s73_s18, %s73_s18 }
  0x24   :  { %p3989_p1 = scmp.ne.s32.totalorder %s73_s18, %s3988_s0  ;;  %p3994_p3 = scmp.lt.s32.totalorder %s3988_s0, %s3988_s0 }
  0x26   :  { %p3995_p4 = por %p3994_p3, %p3993_p2 }
  0x28   :  { %p3996_p5 = pnand %p3995_p4, %p3989_p1 }
  0x2a   :  { %3999 = shalt.err (!%p3996_p5)
}
  0x2b   :  { %78 = dma.hbm_to_vmem [thread:$0]  %s5379_s8, 512, %s73_s18, [#allocation9], %s4030_s26, %s4030_s26, %s4031_s27  }
  0x2c   :  { %4020 = dma.done.wait [#allocation3], 4096  }
  0x2d   :  { %4021 = vsyncadd [#allocation3], 4294963200 }
  0x2e   :  { %4022 = dma.done.wait [#allocation6], 768  }
  0x2f   :  { %4023 = vsyncadd [#allocation6], 4294966528 }
  0x30   :  { %4024 = dma.done.wait [#allocation9], 512  }
  0x31   :  { %4025 = vsyncadd [#allocation9], 4294966784  ;;  %v351_v0 = vld [vmem:[#allocation7 + $0x18] sm:$0xff]  ;;  %v350_v1 = vld [vmem:[#allocation7 + $0x10] sm:$0xff]  ;;  %vm163_vm0 = vcmask 261120   ;;  %vm892_vm1 = vcmask 1041409  }
  0x32   :  { %3631 = vmatprep.subr.mxu0 %v351_v0  ;;  %3831 = vmatprep.subr.mxu1 %v351_v0  ;;  %v349_v2 = vld [vmem:[#allocation7 + $0x8] sm:$0xff]  ;;  %v97_v3 = vld [vmem:[#allocation2] sm:$0xff]  ;;  %v98_v4 = vld [vmem:[#allocation2 + $0x8] sm:$0xff]  ;;  %vm895_vm2 = vcmask 1042434   ;;  %vm898_vm3 = vcmask 1043459   ;;  %vm901_vm4 = vcmask 1044484  }
  0x33   :  { %3632 = vmatpush3.msra.mxu0 %v351_v0  ;;  %3835 = vmatpush3.msra.mxu1 %v351_v0  ;;  %v348_v5 = vld [vmem:[#allocation7] sm:$0xff]  ;;  %v4126_v6 = vld [vmem:[#allocation5] sm:$0xff]  ;;  %v164_v7 = vsel %vm163_vm0, %v97_v3, 0.0  ;;  %v165_v8 = vsel %vm163_vm0, %v98_v4, 0.0  ;;  %v4132_v11 = vld [vmem:[#allocation2 + $0x88] sm:$0xff]  ;;  %vm904_vm5 = vcmask 1045509  }
  0x34   :  { %v4130_v9 = vld [vmem:[#allocation2 + $0x80] sm:$0xff]  ;;  %3633 = vmatprep.subr.mxu0 %v350_v1  ;;  %3832 = vmatprep.subr.mxu1 %v350_v1  ;;  %v166_v10 = vadd.f32 %v165_v8, %v164_v7  ;;  %v4134_v12 = vld [vmem:[#allocation2 + $0x90] sm:$0xff]  ;;  %v4136_v13 = vld [vmem:[#allocation2 + $0x98] sm:$0xff]  ;;  %v131_v15 = vadd.f32 %v4126_v6, %v97_v3  ;;  %v237_v18 = vsel %vm163_vm0, %v4132_v11, 0.0  ;;  %vm907_vm6 = vcmask 1046534   ;;  %s4036_s23 = smov [#allocation10]  }
  0x35   :  { %v236_v14 = vsel %vm163_vm0, %v4130_v9, 0.0  ;;  %3634 = vmatpush3.msra.mxu0 %v350_v1  ;;  %3836 = vmatpush3.msra.mxu1 %v350_v1  ;;  %v117_v16 = vld [vmem:[#allocation2 + $0xa0] sm:$0xff]  ;;  %v118_v17 = vld [vmem:[#allocation2 + $0xa8] sm:$0xff]  ;;  %v245_v19 = vsel %vm163_vm0, %v4134_v12, 0.0  ;;  %v246_v20 = vsel %vm163_vm0, %v4136_v13, 0.0  ;;  %v99_v26 = vld [vmem:[#allocation2 + $0x10] sm:$0xff]  ;;  %v4177_v1 = vadd.f32 %v4126_v6, %v4130_v9 }
  0x36   :  { %v4147_v21 = vld [vmem:[#allocation5 + $0x8] sm:$0xff]  ;;  %3635 = vmatprep.subr.mxu0 %v349_v2  ;;  %3833 = vmatprep.subr.mxu1 %v349_v2  ;;  %v167_v22 = vrot.slane %v166_v10, 4  ;;  %v151_v23 = vadd.f32 %v4126_v6, %v117_v16  ;;  %v238_v24 = vadd.f32 %v237_v18, %v236_v14  ;;  %v247_v25 = vadd.f32 %v246_v20, %v245_v19  ;;  %v119_v27 = vld [vmem:[#allocation2 + $0xb0] sm:$0xff]  ;;  %v100_v36 = vld [vmem:[#allocation2 + $0x18] sm:$0xff]  ;;  %s3380_s24 = sshll.u32 %s4036_s23, 4  ;;  %s3381_s24 = int_to_ptr.vmem [resolvable:$true] %s3380_s24 }
  0x37   :  { %3636 = vmatpush3.msra.mxu0 %v349_v2  ;;  %3837 = vmatpush3.msra.mxu1 %v349_v2  ;;  %v254_v28 = vsel %vm163_vm0, %v117_v16, 0.0  ;;  %v255_v29 = vsel %vm163_vm0, %v118_v17, 0.0  ;;  %v132_v30 = vadd.f32 %v4147_v21, %v98_v4  ;;  %v152_v31 = vadd.f32 %v4147_v21, %v118_v17  ;;  %v120_v37 = vld [vmem:[#allocation2 + $0xb8] sm:$0xff]  ;;  %v101_v55 = vld [vmem:[#allocation2 + $0x20] sm:$0xff]  ;;  %v866_v59 = vld [vmem:[%s5374_s3 + $0x10] sm:$0xff]  ;;  %s4000_s25 = scalar_lea.vmem %s3381_s24, 256  ;;  %p4005_p7 = scmp.lt.s32.totalorder %s3381_s24, %s3381_s24 }
  0x38   :  { %3637 = vmatprep.subr.mxu0 %v348_v5  ;;  %3834 = vmatprep.subr.mxu1 %v348_v5  ;;  %v168_v32 = vadd.f32 %v167_v22, %v166_v10  ;;  %v239_v33 = vrot.slane %v238_v24, 4  ;;  %v248_v34 = vrot.slane %v247_v25, 4  ;;  %v256_v35 = vadd.f32 %v255_v29, %v254_v28  ;;  %v867_v50 = vld [vmem:[%s5374_s3 + $0x18] sm:$0xff]  ;;  %v121_v63 = vld [vmem:[#allocation2 + $0xc0] sm:$0xff]  ;;  %v102_v0 = vld [vmem:[#allocation2 + $0x28] sm:$0xff]  ;;  %p4001_p6 = scmp.ne.s32.totalorder %s3381_s24, %s4000_s25  ;;  %p4006_p8 = scmp.lt.s32.totalorder %s4000_s25, %s4000_s25 }
  0x39   :  { %3638 = vmatpush3.msra.mxu0 %v348_v5  ;;  %3838 = vmatpush3.msra.mxu1 %v348_v5  ;;  %v133_v38 = vadd.f32 %v4126_v6, %v99_v26  ;;  %v173_v39 = vsel %vm163_vm0, %v99_v26, 0.0  ;;  %v153_v40 = vadd.f32 %v4126_v6, %v119_v27  ;;  %v263_v41 = vsel %vm163_vm0, %v119_v27, 0.0  ;;  %v865_v7 = vld [vmem:[%s5374_s3 + $0x8] sm:$0xff]  ;;  %v864_v19 = vld [vmem:[%s5374_s3] sm:$0xff] }
  0x3a   :  { %v169_v42 = vrot.slane %v168_v32, 2  ;;  %3639 = vmatprep.mubr.msk.f32.mxu0 %vm163_vm0, %v131_v15  ;;  %v240_v43 = vadd.f32 %v239_v33, %v238_v24  ;;  %v249_v44 = vadd.f32 %v248_v34, %v247_v25  ;;  %v257_v45 = vrot.slane %v256_v35, 4  ;;  %3669 = vmatprep.mubr.msk.f32.mxu1 %vm163_vm0, %v151_v23  ;;  %v122_v25 = vld [vmem:[#allocation2 + $0xc8] sm:$0xff]  ;;  %v4197_v26 = vld [vmem:[%s5373_s2] ss:$0 sm:$0xff]  ;;  %p4007_p9 = por %p4006_p8, %p4005_p7 }
  0x3b   :  { %3640 = vmatmul.mubr.msk.f32.vlgmr.msra.gmra.mxu0 %vm163_vm0, %v132_v30  ;;  %3670 = vmatmul.mubr.msk.f32.vlgmr.msra.gmra.mxu1 %vm163_vm0, %v152_v31  ;;  %v134_v46 = vadd.f32 %v4147_v21, %v100_v36  ;;  %v174_v47 = vsel %vm163_vm0, %v100_v36, 0.0  ;;  %v154_v48 = vadd.f32 %v4147_v21, %v120_v37  ;;  %v264_v49 = vsel %vm163_vm0, %v120_v37, 0.0 }
  0x3c   :  { %v170_v51 = vadd.f32 %v169_v42, %v168_v32  ;;  %v241_v52 = vrot.slane %v240_v43, 2  ;;  %v250_v53 = vrot.slane %v249_v44, 2  ;;  %v258_v54 = vadd.f32 %v257_v45, %v256_v35  ;;  %3642 = vmatprep.mubr.msk.f32.mxu0 %vm163_vm0, %v133_v38  ;;  %3672 = vmatprep.mubr.msk.f32.mxu1 %vm163_vm0, %v153_v40  ;;  %p4008_p10 = pnand %p4007_p9, %p4001_p6 }
  0x3d   :  { %v175_v56 = vadd.f32 %v174_v47, %v173_v39  ;;  %v265_v57 = vadd.f32 %v264_v49, %v263_v41  ;;  %v135_v58 = vadd.f32 %v4126_v6, %v101_v55  ;;  %3687 = vmatprep.subr.mxu1 %v867_v50  ;;  %v182_v4 = vsel %vm163_vm0, %v101_v55, 0.0 }
  0x3e   :  { %v242_v60 = vadd.f32 %v241_v52, %v240_v43  ;;  %v251_v61 = vadd.f32 %v250_v53, %v249_v44  ;;  %v259_v62 = vrot.slane %v258_v54, 2  ;;  %3688 = vmatpush3.msra.mxu1 %v867_v50  ;;  %v155_v5 = vadd.f32 %v4126_v6, %v121_v63  ;;  %v103_v43 = vld [vmem:[#allocation2 + $0x30] sm:$0xff] }
  0x3f   :  { %v176_v2 = vrot.slane %v175_v56, 4  ;;  %3643 = vmatmul.mubr.msk.f32.gmra.mxu0 %vm163_vm0, %v134_v46  ;;  %v266_v3 = vrot.slane %v265_v57, 4  ;;  %3673 = vmatmul.mubr.msk.f32.gmra.mxu1 %vm163_vm0, %v154_v48  ;;  %v171_v8 = vrot.slane %v170_v51, 1  ;;  %v136_v17 = vadd.f32 %v4147_v21, %v102_v0  ;;  %v123_v52 = vld [vmem:[#allocation2 + $0xd0] sm:$0xff] }
  0x40   :  { %v243_v10 = vrot.slane %v242_v60, 1  ;;  %v252_v14 = vrot.slane %v251_v61, 1  ;;  %v260_v9 = vadd.f32 %v259_v62, %v258_v54  ;;  %3645 = vmatprep.mubr.msk.f32.mxu0 %vm163_vm0, %v135_v58  ;;  %3689 = vmatprep.subr.mxu1 %v866_v59  ;;  %v183_v18 = vsel %vm163_vm0, %v102_v0, 0.0 }
  0x41   :  { %v177_v15 = vadd.f32 %v176_v2, %v175_v56  ;;  %v267_v16 = vadd.f32 %v266_v3, %v265_v57  ;;  %3675 = vmatprep.mubr.msk.f32.mxu1 %vm163_vm0, %v155_v5  ;;  %3690 = vmatpush3.msra.mxu1 %v866_v59  ;;  %v272_v24 = vsel %vm163_vm0, %v121_v63, 0.0  ;;  %v184_v29 = vadd.f32 %v183_v18, %v182_v4  ;;  %v104_v57 = vld [vmem:[#allocation2 + $0x38] sm:$0xff] }
  0x42   :  { %v244_v20 = vadd.f32 %v243_v10, %v242_v60  ;;  %v253_v22 = vadd.f32 %v252_v14, %v251_v61  ;;  %v261_v23 = vrot.slane %v260_v9, 1  ;;  %3691 = vmatprep.subr.mxu1 %v865_v7  ;;  %v156_v30 = vadd.f32 %v4147_v21, %v122_v25  ;;  %v124_v3 = vld [vmem:[#allocation2 + $0xd8] sm:$0xff]  ;;  %v105_v10 = vld [vmem:[#allocation2 + $0x40] sm:$0xff] }
  0x43   :  { %v178_v27 = vrot.slane %v177_v15, 2  ;;  %v268_v28 = vrot.slane %v267_v16, 2  ;;  %3646 = vmatmul.mubr.msk.f32.gmra.mxu0 %vm163_vm0, %v136_v17  ;;  %3692 = vmatpush3.msra.mxu1 %v865_v7  ;;  %v172_v31 = vadd.f32 %v171_v8, %v170_v51  ;;  %v185_v37 = vrot.slane %v184_v29, 4  ;;  %v125_v17 = vld [vmem:[#allocation2 + $0xe0] sm:$0xff] }
  0x44   :  { %v262_v32 = vadd.f32 %v261_v23, %v260_v9  ;;  %v317_v33 = vmul.f32 0.0625, %v244_v20  ;;  %v318_v34 = vmul.f32 0.0625, %v253_v22  ;;  %3693 = vmatprep.subr.mxu1 %v864_v19  ;;  %v273_v38 = vsel %vm163_vm0, %v122_v25, 0.0  ;;  %3676 = vmatmul.mubr.msk.f32.gmra.mxu1 %vm163_vm0, %v156_v30  ;;  %v106_v23 = vld [vmem:[#allocation2 + $0x48] sm:$0xff] }
  0x45   :  { %v179_v35 = vadd.f32 %v178_v27, %v177_v15  ;;  %v269_v36 = vadd.f32 %v268_v28, %v267_v16  ;;  %v274_v42 = vadd.f32 %v273_v38, %v272_v24  ;;  %3694 = vmatpush3.msra.mxu1 %v864_v19  ;;  %v186_v46 = vadd.f32 %v185_v37, %v184_v29 }
  0x46   :  { %v319_v39 = vmul.f32 0.0625, %v262_v32  ;;  %v340_v40 = vadd.f32 %v4197_v26, %v317_v33  ;;  %v341_v41 = vadd.f32 %v4197_v26, %v318_v34  ;;  %v137_v47 = vadd.f32 %v4126_v6, %v103_v43  ;;  %v126_v33 = vld [vmem:[#allocation2 + $0xe8] sm:$0xff] }
  0x47   :  { %v180_v44 = vrot.slane %v179_v35, 1  ;;  %v270_v45 = vrot.slane %v269_v36, 1  ;;  %v309_v48 = vmul.f32 0.0625, %v172_v31  ;;  %v275_v51 = vrot.slane %v274_v42, 4 }
  0x48   :  { %v342_v49 = vadd.f32 %v4197_v26, %v319_v39  ;;  %v912_v50 = vrot.slane %v341_v41, 7  ;;  %v187_v55 = vrot.slane %v186_v46, 2  ;;  %3648 = vmatprep.mubr.msk.f32.mxu0 %vm163_vm0, %v137_v47  ;;  %v157_v56 = vadd.f32 %v4126_v6, %v123_v52  ;;  %v127_v47 = vld [vmem:[#allocation2 + $0xf0] sm:$0xff] }
  0x49   :  { %v181_v53 = vadd.f32 %v180_v44, %v179_v35  ;;  %v271_v54 = vadd.f32 %v270_v45, %v269_v36  ;;  %v276_v60 = vadd.f32 %v275_v51, %v274_v42  ;;  %v191_v61 = vsel %vm163_vm0, %v103_v43, 0.0  ;;  %v107_v42 = vld [vmem:[#allocation2 + $0x50] sm:$0xff] }
  0x4a   :  { %v913_v58 = vsel %vm892_vm1, %v912_v50, %v340_v40  ;;  %v914_v59 = vrot.slane %v342_v49, 6  ;;  %v188_v0 = vadd.f32 %v187_v55, %v186_v46  ;;  %3678 = vmatprep.mubr.msk.f32.mxu1 %vm163_vm0, %v157_v56  ;;  %v138_v2 = vadd.f32 %v4147_v21, %v104_v57 }
  0x4b   :  { %v310_v62 = vmul.f32 0.0625, %v181_v53  ;;  %v320_v63 = vmul.f32 0.0625, %v271_v54  ;;  %v4214_v4 = vadd.f32 %v4197_v26, %v309_v48  ;;  %v277_v5 = vrot.slane %v276_v60, 2 }
  0x4c   :  { %v192_v7 = vsel %vm163_vm0, %v104_v57, 0.0  ;;  %v158_v8 = vadd.f32 %v4147_v21, %v124_v3  ;;  %v4219_v14 = vsel %vm895_vm2, %v914_v59, %v913_v58  ;;  %v189_v9 = vrot.slane %v188_v0, 1  ;;  %3649 = vmatmul.mubr.msk.f32.gmra.mxu0 %vm163_vm0, %v138_v2 }
  0x4d   :  { %v281_v15 = vsel %vm163_vm0, %v123_v52, 0.0  ;;  %v193_v16 = vadd.f32 %v192_v7, %v191_v61  ;;  %v4224_v18 = vadd.f32 %v4197_v26, %v310_v62  ;;  %v278_v19 = vadd.f32 %v277_v5, %v276_v60  ;;  %v108_v52 = vld [vmem:[#allocation2 + $0x58] sm:$0xff] }
  0x4e   :  { %v282_v20 = vsel %vm163_vm0, %v124_v3, 0.0  ;;  %3679 = vmatmul.mubr.msk.f32.gmra.mxu1 %vm163_vm0, %v158_v8  ;;  %v139_v22 = vadd.f32 %v4126_v6, %v105_v10  ;;  %v4230_v24 = vadd.f32 %v4197_v26, %v320_v63  ;;  %v190_v25 = vadd.f32 %v189_v9, %v188_v0  ;;  %v128_v61 = vld [vmem:[#allocation2 + $0xf8] sm:$0xff]  ;;  %v110_v9 = vld [vmem:[#allocation2 + $0x68] sm:$0xff] }
  0x4f   :  { %v194_v27 = vrot.slane %v193_v16, 4  ;;  %v200_v28 = vsel %vm163_vm0, %v105_v10, 0.0  ;;  %v279_v29 = vrot.slane %v278_v19, 1  ;;  %v283_v30 = vadd.f32 %v282_v20, %v281_v15  ;;  %v109_v10 = vld [vmem:[#allocation2 + $0x60] sm:$0xff] }
  0x50   :  { %3651 = vmatprep.mubr.msk.f32.mxu0 %vm163_vm0, %v139_v22  ;;  %v159_v31 = vadd.f32 %v4126_v6, %v125_v17  ;;  %v290_v32 = vsel %vm163_vm0, %v125_v17, 0.0  ;;  %v311_v34 = vmul.f32 0.0625, %v190_v25  ;;  %v140_v36 = vadd.f32 %v4147_v21, %v106_v23 }
  0x51   :  { %v195_v35 = vadd.f32 %v194_v27, %v193_v16  ;;  %v201_v37 = vsel %vm163_vm0, %v106_v23, 0.0  ;;  %v280_v38 = vadd.f32 %v279_v29, %v278_v19  ;;  %v284_v39 = vrot.slane %v283_v30, 4  ;;  %v111_v27 = vld [vmem:[#allocation2 + $0x70] sm:$0xff] }
  0x52   :  { %3681 = vmatprep.mubr.msk.f32.mxu1 %vm163_vm0, %v159_v31  ;;  %v202_v40 = vadd.f32 %v201_v37, %v200_v28  ;;  %v160_v41 = vadd.f32 %v4147_v21, %v126_v33  ;;  %v891_v43 = vrot.slane %v4224_v18, 7  ;;  %3652 = vmatmul.mubr.msk.f32.gmra.mxu0 %vm163_vm0, %v140_v36  ;;  %v291_v45 = vsel %vm163_vm0, %v126_v33, 0.0  ;;  %v4263_v28 = vld [vmem:[#allocation2 + $0x78] sm:$0xff] }
  0x53   :  { %v196_v44 = vrot.slane %v195_v35, 2  ;;  %v141_v46 = vadd.f32 %v4126_v6, %v107_v42  ;;  %v321_v48 = vmul.f32 0.0625, %v280_v38  ;;  %v285_v49 = vadd.f32 %v284_v39, %v283_v30 }
  0x54   :  { %v203_v50 = vrot.slane %v202_v40, 4  ;;  %v292_v51 = vadd.f32 %v291_v45, %v290_v32  ;;  %3682 = vmatmul.mubr.msk.f32.gmra.mxu1 %vm163_vm0, %v160_v41  ;;  %v4246_v53 = vadd.f32 %v4197_v26, %v311_v34  ;;  %v209_v55 = vsel %vm163_vm0, %v107_v42, 0.0 }
  0x55   :  { %v197_v54 = vadd.f32 %v196_v44, %v195_v35  ;;  %3654 = vmatprep.mubr.msk.f32.mxu0 %vm163_vm0, %v141_v46  ;;  %v161_v56 = vadd.f32 %v4126_v6, %v127_v47  ;;  %v286_v57 = vrot.slane %v285_v49, 2  ;;  %v299_v60 = vsel %vm163_vm0, %v127_v47, 0.0 }
  0x56   :  { %v204_v58 = vadd.f32 %v203_v50, %v202_v40  ;;  %v293_v59 = vrot.slane %v292_v51, 4  ;;  %v142_v63 = vadd.f32 %v4147_v21, %v108_v52  ;;  %v210_v0 = vsel %vm163_vm0, %v108_v52, 0.0 }
  0x57   :  { %v198_v62 = vrot.slane %v197_v54, 1  ;;  %3684 = vmatprep.mubr.msk.f32.mxu1 %vm163_vm0, %v161_v56  ;;  %v162_v2 = vadd.f32 %v4147_v21, %v128_v61  ;;  %v4257_v3 = vadd.f32 %v4197_v26, %v321_v48  ;;  %v287_v5 = vadd.f32 %v286_v57, %v285_v49 }
  0x58   :  { %v205_v7 = vrot.slane %v204_v58, 2  ;;  %v294_v8 = vadd.f32 %v293_v59, %v292_v51  ;;  %v211_v16 = vadd.f32 %v210_v0, %v209_v55  ;;  %3655 = vmatmul.mubr.msk.f32.gmra.mxu0 %vm163_vm0, %v142_v63  ;;  %v300_v17 = vsel %vm163_vm0, %v128_v61, 0.0 }
  0x59   :  { %v199_v15 = vadd.f32 %v198_v62, %v197_v54  ;;  %3685 = vmatmul.mubr.msk.f32.gmra.mxu1 %vm163_vm0, %v162_v2  ;;  %v143_v19 = vadd.f32 %v4126_v6, %v109_v10  ;;  %v288_v20 = vrot.slane %v287_v5, 1  ;;  %v301_v25 = vadd.f32 %v300_v17, %v299_v60 }
  0x5a   :  { %v206_v22 = vadd.f32 %v205_v7, %v204_v58  ;;  %v295_v23 = vrot.slane %v294_v8, 2  ;;  %v212_v30 = vrot.slane %v211_v16, 4  ;;  %v218_v31 = vsel %vm163_vm0, %v109_v10, 0.0 }
  0x5b   :  { %v312_v29 = vmul.f32 0.0625, %v199_v15  ;;  %v219_v32 = vsel %vm163_vm0, %v110_v9, 0.0  ;;  %3657 = vmatprep.mubr.msk.f32.mxu0 %vm163_vm0, %v143_v19  ;;  %v289_v33 = vadd.f32 %v288_v20, %v287_v5  ;;  %v302_v36 = vrot.slane %v301_v25, 4 }
  0x5c   :  { %v207_v34 = vrot.slane %v206_v22, 1  ;;  %v296_v35 = vadd.f32 %v295_v23, %v294_v8  ;;  %v213_v37 = vadd.f32 %v212_v30, %v211_v16  ;;  %v220_v38 = vadd.f32 %v219_v32, %v218_v31 }
  0x5d   :  { %v227_v39 = vsel %vm163_vm0, %v111_v27, 0.0  ;;  %v228_v40 = vsel %vm163_vm0, %v4263_v28, 0.0  ;;  %v322_v41 = vmul.f32 0.0625, %v289_v33  ;;  %v303_v45 = vadd.f32 %v302_v36, %v301_v25 }
  0x5e   :  { %v208_v42 = vadd.f32 %v207_v34, %v206_v22  ;;  %v297_v44 = vrot.slane %v296_v35, 1  ;;  %v214_v46 = vrot.slane %v213_v37, 2  ;;  %v221_v47 = vrot.slane %v220_v38, 4 }
  0x5f   :  { %v229_v48 = vadd.f32 %v228_v40, %v227_v39  ;;  %v335_v49 = vadd.f32 %v4197_v26, %v312_v29  ;;  %v304_v52 = vrot.slane %v303_v45, 2  ;;  %v893_v54 = vsel %vm892_vm1, %v891_v43, %v4214_v4 }
  0x60   :  { %v313_v50 = vmul.f32 0.0625, %v208_v42  ;;  %v298_v51 = vadd.f32 %v297_v44, %v296_v35  ;;  %v215_v55 = vadd.f32 %v214_v46, %v213_v37  ;;  %v222_v56 = vadd.f32 %v221_v47, %v220_v38 }
  0x61   :  { %v230_v57 = vrot.slane %v229_v48, 4  ;;  %v894_v58 = vrot.slane %v4246_v53, 6  ;;  %v916_v59 = vrot.slane %v4230_v24, 5  ;;  %v305_v61 = vadd.f32 %v304_v52, %v303_v45 }
  0x62   :  { %v323_v60 = vmul.f32 0.0625, %v298_v51  ;;  %v336_v62 = vadd.f32 %v4197_v26, %v313_v50  ;;  %v216_v63 = vrot.slane %v215_v55, 1  ;;  %v223_v0 = vrot.slane %v222_v56, 2  ;;  %v4340_v50 = vld [vmem:[%s5381_s10] sm:$0xff] }
  0x63   :  { %v231_v2 = vadd.f32 %v230_v57, %v229_v48  ;;  %v897_v5 = vrot.slane %v335_v49, 5  ;;  %v918_v18 = vrot.slane %v4257_v3, 4  ;;  %v306_v7 = vrot.slane %v305_v61, 1  ;;  %v4350_v51 = vld [vmem:[%s5377_s6] ss:$0 sm:$0xff] }
  0x64   :  { %v896_v4 = vsel %vm895_vm2, %v894_v58, %v893_v54  ;;  %v144_v43 = vadd.f32 %v4147_v21, %v110_v9  ;;  %v224_v8 = vadd.f32 %v223_v0, %v222_v56  ;;  %v217_v53 = vadd.f32 %v216_v63, %v215_v55 }
  0x65   :  { %v232_v10 = vrot.slane %v231_v2, 2  ;;  %v345_v24 = vadd.f32 %v4197_v26, %v322_v41  ;;  %v900_v15 = vrot.slane %v336_v62, 4  ;;  %v307_v16 = vadd.f32 %v306_v7, %v305_v61 }
  0x66   :  { %3658 = vmatmul.mubr.msk.f32.gmra.mxu0 %vm163_vm0, %v144_v43  ;;  %v346_v17 = vadd.f32 %v4197_v26, %v323_v60  ;;  %v917_v19 = vsel %vm898_vm3, %v916_v59, %v4219_v14  ;;  %v225_v3 = vrot.slane %v224_v8, 1  ;;  %v314_v22 = vmul.f32 0.0625, %v217_v53 }
  0x67   :  { %v233_v20 = vadd.f32 %v232_v10, %v231_v2  ;;  %v899_v23 = vsel %vm898_vm3, %v897_v5, %v896_v4  ;;  %v324_v9 = vmul.f32 0.0625, %v307_v16  ;;  %v919_v25 = vsel %vm901_vm4, %v918_v18, %v917_v19 }
  0x68   :  { %v920_v29 = vrot.slane %v345_v24, 3  ;;  %v145_v30 = vadd.f32 %v4126_v6, %v111_v27  ;;  %v226_v31 = vadd.f32 %v225_v3, %v224_v8  ;;  %v337_v33 = vadd.f32 %v4197_v26, %v314_v22 }
  0x69   :  { %v234_v32 = vrot.slane %v233_v20, 1  ;;  %v146_v34 = vadd.f32 %v4147_v21, %v4263_v28  ;;  %v902_v14 = vsel %vm901_vm4, %v900_v15, %v899_v23  ;;  %v347_v35 = vadd.f32 %v4197_v26, %v324_v9 }
  0x6a   :  { %v922_v36 = vrot.slane %v346_v17, 2  ;;  %3660 = vmatprep.mubr.msk.f32.mxu0 %vm163_vm0, %v145_v30  ;;  %v315_v38 = vmul.f32 0.0625, %v226_v31  ;;  %v903_v39 = vrot.slane %v337_v33, 3  ;;  %v148_v27 = vadd.f32 %v4147_v21, %v4132_v11 }
  0x6b   :  { %v235_v37 = vadd.f32 %v234_v32, %v233_v20  ;;  %3661 = vmatmul.mubr.msk.f32.gmra.mxu0 %vm163_vm0, %v146_v34  ;;  %v921_v40 = vsel %vm904_vm5, %v920_v29, %v919_v25  ;;  %v149_v28 = vadd.f32 %v4126_v6, %v4134_v12  ;;  %vm910_vm7 = vcmask 1047559  }
  0x6c   :  { %3663 = vmatprep.mubr.msk.f32.mxu0 %vm163_vm0, %v4177_v1  ;;  %v338_v42 = vadd.f32 %v4197_v26, %v315_v38  ;;  %v905_v44 = vsel %vm904_vm5, %v903_v39, %v902_v14  ;;  %v924_v45 = vrot.slane %v347_v35, 1  ;;  %v923_v11 = vsel %vm907_vm6, %v922_v36, %v921_v40 }
  0x6d   :  { %v316_v41 = vmul.f32 0.0625, %v235_v37  ;;  %v150_v1 = vadd.f32 %v4147_v21, %v4136_v13  ;;  %v4326_v13 = vld [vmem:[%s5381_s10 + $0x10] sm:$0xff]  ;;  %v4333_v21 = vld [vmem:[%s5381_s10 + $0x8] sm:$0xff]  ;;  %vm680_vm8 = vcmask 523264   ;;  %vm1673_vm9 = vcmask 31744  }
  0x6e   :  { %v906_v47 = vrot.slane %v338_v42, 2  ;;  %v925_v48 = vsel %vm910_vm7, %v924_v45, %v923_v11  ;;  %vm2323_vm10 = vcmask 1043456  }
  0x6f   :  { %v339_v46 = vadd.f32 %v4197_v26, %v316_v41  ;;  %3664 = vmatmul.mubr.msk.f32.gmra.mxu0 %vm163_vm0, %v148_v27  ;;  %v4321_v26 = vld [vmem:[%s5381_s10 + $0x18] sm:$0xff]  ;;  %s4034_s10 = smov 96  }
  0x70   :  { %3666 = vmatprep.mubr.msk.f32.mxu0 %vm163_vm0, %v149_v28  ;;  %v908_v6 = vsel %vm907_vm6, %v906_v47, %v905_v44  ;;  %3698 = vmatprep.subr.mxu1 %v4321_v26 }
  0x71   :  { %v909_v12 = vrot.slane %v339_v46, 1 }
  0x73   :  { %v911_v49 = vsel %vm910_vm7, %v909_v12, %v908_v6  ;;  %3667 = vmatmul.mubr.msk.f32.gmra.mxu0 %vm163_vm0, %v150_v1 }
  0x74   :  { %3695 = vmatprep.mubr.msk.f32.mxu1 %vm163_vm0, %v911_v49 }
  0x75   :  { %3696 = vmatmul.mubr.msk.f32.vlgmr.msra.gmra.mxu1 %vm163_vm0, %v925_v48 }
  0x76   :  { %3699 = vmatpush3.msra.mxu1 %v4321_v26 }
  0x77   :  { %3700 = vmatprep.subr.mxu1 %v4326_v13 }
  0x78   :  { %3701 = vmatpush3.msra.mxu1 %v4326_v13 }
  0x79   :  { %3702 = vmatprep.subr.mxu1 %v4333_v21 }
  0x7a   :  { %3703 = vmatpush3.msra.mxu1 %v4333_v21 }
  0x7b   :  { %3704 = vmatprep.subr.mxu1 %v4340_v50 }
  0x7c   :  { %3705 = vmatpush3.msra.mxu1 %v4340_v50 }
  0x7d   :  { %3709 = vmatprep.subr.mxu1 %v4321_v26 }
  0xfb   :  { %v3641_v52 = vpop.f32.mrf.mxu0  ;;  %v3671_v54 = vpop.f32.mrf.mxu1 }
  0xfc   :  { %v4353_v55 = vadd.f32 %v3641_v52, %v4350_v51  ;;  %v4356_v56 = vadd.f32 %v3671_v54, %v4350_v51 }
  0xfd   :  { %v521_v57 = vpop.f32.mrf.mxu0  ;;  %v621_v58 = vpop.f32.mrf.mxu1 }
  0xfe   :  { %5399 = vst [vmem:[#allocation15_spill] sm:$0xff] %v4356_v56  ;;  %3017 = vrot.lane.b32.xlu1 %v4356_v56, %s4034_s10  ;;  %2977 = vrot.lane.b32.xlu0 %v4353_v55, %s4034_s10  ;;  %v4363_v60 = vadd.f32 %v4350_v51, %v521_v57  ;;  %v4369_v0 = vadd.f32 %v4350_v51, %v621_v58  ;;  %v682_v25 = vsel %vm680_vm8, %v4353_v55, 0.0  ;;  %v772_v29 = vsel %vm680_vm8, %v4356_v56, 0.0 }
  0xff   :  { %v3644_v59 = vpop.f32.mrf.mxu0  ;;  %v3674_v62 = vpop.f32.mrf.mxu1 }
 0x100   :  { %v4366_v61 = vadd.f32 %v3644_v59, %v4350_v51  ;;  %5400 = vst [vmem:[#allocation16_spill] sm:$0xff] %v4369_v0  ;;  %v4372_v2 = vadd.f32 %v3674_v62, %v4350_v51  ;;  %v681_v20 = vsel %vm680_vm8, %v4363_v60, 0.0  ;;  %v771_v31 = vsel %vm680_vm8, %v4369_v0, 0.0 }
 0x101   :  { %v531_v63 = vpop.f32.mrf.mxu0  ;;  %v631_v5 = vpop.f32.mrf.mxu1  ;;  %v683_v30 = vadd.f32 %v682_v25, %v681_v20  ;;  %v773_v37 = vadd.f32 %v772_v29, %v771_v31 }
 0x102   :  { %5401 = vst [vmem:[#allocation17_spill] sm:$0xff] %v4372_v2  ;;  %2981 = vrot.lane.b32.xlu1 %v4366_v61, %s4034_s10  ;;  %2975 = vrot.lane.b32.xlu0 %v4363_v60, %s4034_s10  ;;  %v4379_v7 = vadd.f32 %v4350_v51, %v631_v5  ;;  %v4386_v4 = vadd.f32 %v4350_v51, %v531_v63  ;;  %v691_v22 = vsel %vm680_vm8, %v4366_v61, 0.0  ;;  %v781_v45 = vsel %vm680_vm8, %v4372_v2, 0.0 }
 0x103   :  { %v3647_v18 = vpop.f32.mrf.mxu0  ;;  %v684_v40 = vrot.slane %v683_v30, 4  ;;  %v774_v6 = vrot.slane %v773_v37, 4 }
 0x104   :  { %5402 = vst [vmem:[#allocation18_spill] sm:$0xff] %v4379_v7  ;;  %v3677_v43 = vpop.f32.mrf.mxu1  ;;  %v4393_v53 = vadd.f32 %v3647_v18, %v4350_v51  ;;  %v690_v16 = vsel %vm680_vm8, %v4386_v4, 0.0  ;;  %v780_v47 = vsel %vm680_vm8, %v4379_v7, 0.0 }
 0x105   :  { %v541_v8 = vpop.f32.mrf.mxu0  ;;  %v4401_v17 = vadd.f32 %v3677_v43, %v4350_v51  ;;  %v692_v23 = vadd.f32 %v691_v22, %v690_v16  ;;  %v685_v49 = vadd.f32 %v684_v40, %v683_v30  ;;  %v782_v59 = vadd.f32 %v781_v45, %v780_v47 }
 0x106   :  { %3021 = vrot.lane.b32.xlu1 %v4372_v2, %s4034_s10  ;;  %3015 = vrot.lane.b32.xlu0 %v4369_v0, %s4034_s10  ;;  %v4396_v10 = vadd.f32 %v4350_v51, %v541_v8  ;;  %v641_v24 = vpop.f32.mrf.mxu1  ;;  %v700_v28 = vsel %vm680_vm8, %v4393_v53, 0.0 }
 0x107   :  { %5403 = vst [vmem:[#allocation19_spill] sm:$0xff] %v4401_v17  ;;  %v4404_v19 = vadd.f32 %v4350_v51, %v641_v24  ;;  %v693_v14 = vrot.slane %v692_v23, 4  ;;  %v790_v62 = vsel %vm680_vm8, %v4401_v17, 0.0  ;;  %v686_v16 = vrot.slane %v685_v49, 2 }
 0x108   :  { %v699_v38 = vsel %vm680_vm8, %v4396_v10, 0.0 }
 0x109   :  { %5404 = vst [vmem:[#allocation20_spill] sm:$0xff] %v4404_v19  ;;  %v694_v46 = vadd.f32 %v693_v14, %v692_v23  ;;  %v701_v11 = vadd.f32 %v700_v28, %v699_v38  ;;  %v789_v63 = vsel %vm680_vm8, %v4404_v19, 0.0  ;;  %v687_v38 = vadd.f32 %v686_v16, %v685_v49 }
 0x10a   :  { %2979 = vrot.lane.b32.xlu1 %v4386_v4, %s4034_s10  ;;  %3019 = vrot.lane.b32.xlu0 %v4379_v7, %s4034_s10  ;;  %v791_v25 = vadd.f32 %v790_v62, %v789_v63 }
 0x10b   :  { %v695_v18 = vrot.slane %v694_v46, 2  ;;  %v702_v43 = vrot.slane %v701_v11, 4  ;;  %v688_v63 = vrot.slane %v687_v38, 1 }
 0x10c   :  { %v3650_v15 = vpop.f32.mrf.mxu0  ;;  %v792_v45 = vrot.slane %v791_v25, 4 }
 0x10d   :  { %v4425_v33 = vadd.f32 %v3650_v15, %v4350_v51  ;;  %v775_v15 = vadd.f32 %v774_v6, %v773_v37  ;;  %v696_v30 = vadd.f32 %v695_v18, %v694_v46  ;;  %v703_v31 = vadd.f32 %v702_v43, %v701_v11 }
 0x10e   :  { %2985 = vrot.lane.b32.xlu1 %v4393_v53, %s4034_s10  ;;  %2983 = vrot.lane.b32.xlu0 %v4396_v10, %s4034_s10  ;;  %v551_v3 = vpop.f32.mrf.mxu0  ;;  %v3680_v9 = vpop.f32.mrf.mxu1  ;;  %v4505_v43 = vadd.f32 %v792_v45, %v791_v25 }
 0x10f   :  { %v4428_v34 = vadd.f32 %v4350_v51, %v551_v3  ;;  %v4433_v39 = vadd.f32 %v3680_v9, %v4350_v51  ;;  %v709_v12 = vsel %vm680_vm8, %v4425_v33, 0.0  ;;  %v783_v9 = vrot.slane %v782_v59, 4 }
 0x110   :  { %v651_v35 = vpop.f32.mrf.mxu1  ;;  %v776_v14 = vrot.slane %v775_v15, 2  ;;  %v697_v46 = vrot.slane %v696_v30, 1  ;;  %v704_v47 = vrot.slane %v703_v31, 2 }
 0x111   :  { %5405 = vst [vmem:[#allocation21_spill] sm:$0xff] %v4433_v39  ;;  %v4436_v27 = vadd.f32 %v4350_v51, %v651_v35  ;;  %v708_v41 = vsel %vm680_vm8, %v4428_v34, 0.0 }
 0x112   :  { %3025 = vrot.lane.b32.xlu1 %v4401_v17, %s4034_s10  ;;  %3023 = vrot.lane.b32.xlu0 %v4404_v19, %s4034_s10  ;;  %v3653_v32 = vpop.f32.mrf.mxu0  ;;  %v710_v52 = vadd.f32 %v709_v12, %v708_v41  ;;  %v4490_v41 = vadd.f32 %v783_v9, %v782_v59  ;;  %v4492_v6 = vadd.f32 %v776_v14, %v775_v15 }
 0x113   :  { %5406 = vst [vmem:[#allocation22_spill] sm:$0xff] %v4436_v27  ;;  %v4447_v42 = vadd.f32 %v3653_v32, %v4350_v51  ;;  %v698_v16 = vadd.f32 %v697_v46, %v696_v30  ;;  %v798_v9 = vsel %vm680_vm8, %v4436_v27, 0.0  ;;  %v4539_v46 = vadd.f32 %v688_v63, %v687_v38 }
 0x114   :  { %v561_v36 = vpop.f32.mrf.mxu0  ;;  %v3683_v54 = vpop.f32.mrf.mxu1  ;;  %v711_v3 = vrot.slane %v710_v52, 4 }
 0x115   :  { %v4450_v44 = vadd.f32 %v4350_v51, %v561_v36  ;;  %v718_v5 = vsel %vm680_vm8, %v4447_v42, 0.0  ;;  %v4035_v36 = vmov 1966171168   ;;  %v4495_v12 = vadd.f32 %v3683_v54, %v4350_v51 }
 0x116   :  { %2989 = vrot.lane.b32.xlu1 %v4425_v33, %s4034_s10  ;;  %2987 = vrot.lane.b32.xlu0 %v4428_v34, %s4034_s10  ;;  %v661_v20 = vpop.f32.mrf.mxu1  ;;  %v4484_v37 = vunpack.c.l.s4 %v4035_v36  ;;  %v712_v40 = vadd.f32 %v711_v3, %v710_v52  ;;  %v705_v3 = vadd.f32 %v704_v47, %v703_v31  ;;  %v826_v47 = vmul.f32 0.0625, %v698_v16 }
 0x117   :  { %v717_v48 = vsel %vm680_vm8, %v4450_v44, 0.0  ;;  %v4499_v52 = vadd.f32 %v4350_v51, %v661_v20  ;;  %v808_v25 = vsel %vm680_vm8, %v4495_v12, 0.0 }
 0x118   :  { %v3656_v1 = vpop.f32.mrf.mxu0  ;;  %v719_v8 = vadd.f32 %v718_v5, %v717_v48  ;;  %v713_v49 = vrot.slane %v712_v40, 2 }
 0x119   :  { %v4465_v57 = vadd.f32 %v3656_v1, %v4350_v51  ;;  %v3686_v28 = vpop.f32.mrf.mxu1  ;;  %v807_v30 = vsel %vm680_vm8, %v4499_v52, 0.0 }
 0x11a   :  { %3029 = vrot.lane.b32.xlu1 %v4433_v39, %s4034_s10  ;;  %3027 = vrot.lane.b32.xlu0 %v4436_v27, %s4034_s10  ;;  %v571_v58 = vpop.f32.mrf.mxu0  ;;  %v720_v32 = vrot.slane %v719_v8, 4  ;;  %v4508_v54 = vadd.f32 %v3686_v28, %v4350_v51 }
 0x11b   :  { %v4474_v24 = vadd.f32 %v4350_v51, %v571_v58  ;;  %v727_v22 = vsel %vm680_vm8, %v4465_v57, 0.0  ;;  %v671_v59 = vpop.f32.mrf.mxu1 }
 0x11c   :  { %v721_v11 = vadd.f32 %v720_v32, %v719_v8  ;;  %5407 = vst [vmem:[#allocation23_spill] sm:$0xff] %v4508_v54  ;;  %v4511_v8 = vadd.f32 %v4350_v51, %v671_v59  ;;  %v714_v32 = vadd.f32 %v713_v49, %v712_v40  ;;  %v817_v36 = vsel %vm680_vm8, %v4508_v54, 0.0 }
 0x11d   :  { %v726_v23 = vsel %vm680_vm8, %v4474_v24, 0.0 }
 0x11e   :  { %2993 = vrot.lane.b32.xlu1 %v4447_v42, %s4034_s10  ;;  %2991 = vrot.lane.b32.xlu0 %v4450_v44, %s4034_s10  ;;  %v728_v29 = vadd.f32 %v727_v22, %v726_v23  ;;  %5408 = vst [vmem:[#allocation24_spill] sm:$0xff] %v4511_v8  ;;  %v722_v22 = vrot.slane %v721_v11, 2  ;;  %v799_v23 = vsel %vm680_vm8, %v4433_v39, 0.0  ;;  %v816_v28 = vsel %vm680_vm8, %v4511_v8, 0.0 }
 0x11f   :  { %v818_v39 = vadd.f32 %v817_v36, %v816_v28 }
 0x120   :  { %v729_v35 = vrot.slane %v728_v29, 4  ;;  %v723_v49 = vadd.f32 %v722_v22, %v721_v11  ;;  %v4550_v11 = vld [vmem:[%s5378_s7] ss:$0 sm:$0xff] }
 0x122   :  { %2997 = vrot.lane.b32.xlu1 %v4465_v57, %s4034_s10  ;;  %2995 = vrot.lane.b32.xlu0 %v4474_v24, %s4034_s10  ;;  %v730_v48 = vadd.f32 %v729_v35, %v728_v29 }
 0x124   :  { %v731_v29 = vrot.slane %v730_v48, 2 }
 0x126   :  { %v3659_v58 = vpop.f32.mrf.mxu0  ;;  %v732_v62 = vadd.f32 %v731_v29, %v730_v48 }
 0x127   :  { %v4502_v5 = vadd.f32 %v3659_v58, %v4350_v51  ;;  %v706_v58 = vrot.slane %v705_v3, 1 }
 0x128   :  { %v581_v15 = vpop.f32.mrf.mxu0  ;;  %v733_v36 = vrot.slane %v732_v62, 1 }
 0x129   :  { %v4514_v20 = vadd.f32 %v4350_v51, %v581_v15  ;;  %3001 = vrot.lane.b32.xlu1 %v4502_v5, %s4034_s10  ;;  %v736_v31 = vsel %vm680_vm8, %v4502_v5, 0.0  ;;  %v800_v15 = vadd.f32 %v799_v23, %v798_v9  ;;  %v4562_v23 = vadd.f32 %v4550_v11, %v826_v47 }
 0x12a   :  { %v707_v9 = vadd.f32 %v706_v58, %v705_v3  ;;  %v734_v7 = vadd.f32 %v733_v36, %v732_v62 }
 0x12b   :  { %v735_v14 = vsel %vm680_vm8, %v4514_v20, 0.0  ;;  %v3662_v35 = vpop.f32.mrf.mxu0  ;;  %2999 = vrot.lane.b32.xlu0 %v4514_v20, %s4034_s10 }
 0x12c   :  { %v737_v40 = vadd.f32 %v736_v31, %v735_v14  ;;  %v4537_v45 = vadd.f32 %v3662_v35, %v4350_v51  ;;  %v715_v14 = vrot.slane %v714_v32, 1  ;;  %v809_v35 = vadd.f32 %v808_v25, %v807_v30 }
 0x12d   :  { %v591_v59 = vpop.f32.mrf.mxu0  ;;  %v724_v25 = vrot.slane %v723_v49, 1  ;;  %v819_v31 = vrot.slane %v818_v39, 4 }
 0x12e   :  { %5409 = vst [vmem:[#allocation25_spill] sm:$0xff] %v4537_v45  ;;  %v738_v1 = vrot.slane %v737_v40, 4  ;;  %v4542_v18 = vadd.f32 %v4350_v51, %v591_v59  ;;  %3005 = vrot.lane.b32.xlu1 %v4537_v45, %s4034_s10  ;;  %v745_v48 = vsel %vm680_vm8, %v4537_v45, 0.0  ;;  %v716_v59 = vadd.f32 %v715_v14, %v714_v32 }
 0x12f   :  { %v3665_v38 = vpop.f32.mrf.mxu0  ;;  %v820_v45 = vadd.f32 %v819_v31, %v818_v39 }
 0x130   :  { %v739_v63 = vadd.f32 %v738_v1, %v737_v40  ;;  %v744_v16 = vsel %vm680_vm8, %v4542_v18, 0.0  ;;  %v4557_v22 = vadd.f32 %v3665_v38, %v4350_v51  ;;  %3003 = vrot.lane.b32.xlu0 %v4542_v18, %s4034_s10  ;;  %v801_v1 = vrot.slane %v800_v15, 4 }
 0x131   :  { %v746_v29 = vadd.f32 %v745_v48, %v744_v16  ;;  %v601_v30 = vpop.f32.mrf.mxu0  ;;  %v810_v38 = vrot.slane %v809_v35, 4  ;;  %v827_v16 = vmul.f32 0.0625, %v707_v9  ;;  %v828_v56 = vmul.f32 0.0625, %v716_v59 }
 0x132   :  { %5410 = vst [vmem:[#allocation26_spill] sm:$0xff] %v4557_v22  ;;  %v740_v28 = vrot.slane %v739_v63, 2  ;;  %v4565_v40 = vadd.f32 %v4350_v51, %v601_v30  ;;  %3009 = vrot.lane.b32.xlu1 %v4557_v22, %s4034_s10  ;;  %v754_v3 = vsel %vm680_vm8, %v4557_v22, 0.0  ;;  %v725_v30 = vadd.f32 %v724_v25, %v723_v49 }
 0x133   :  { %v747_v27 = vrot.slane %v746_v29, 4  ;;  %v3668_v17 = vpop.f32.mrf.mxu0  ;;  %v802_v2 = vadd.f32 %v801_v1, %v800_v15  ;;  %v850_v39 = vadd.f32 %v4550_v11, %v827_v16  ;;  %v830_v25 = vmul.f32 0.0625, %v734_v7 }
 0x134   :  { %5411 = vst [vmem:[#allocation27_spill] sm:$0xff] %v4565_v40  ;;  %v741_v47 = vadd.f32 %v740_v28, %v739_v63  ;;  %v753_v58 = vsel %vm680_vm8, %v4565_v40, 0.0  ;;  %v4574_v48 = vadd.f32 %v3668_v17, %v4350_v51  ;;  %3007 = vrot.lane.b32.xlu0 %v4565_v40, %s4034_s10  ;;  %v811_v17 = vadd.f32 %v810_v38, %v809_v35 }
 0x135   :  { %v748_v32 = vadd.f32 %v747_v27, %v746_v29  ;;  %v755_v14 = vadd.f32 %v754_v3, %v753_v58  ;;  %v611_v19 = vpop.f32.mrf.mxu0  ;;  %v5412_v35 = vrot.slane %v4490_v41, 2  ;;  %v803_v31 = vrot.slane %v802_v2, 2  ;;  %v4596_v1 = vpop.f32.mrf.mxu1 }
 0x136   :  { %v742_v63 = vrot.slane %v741_v47, 1  ;;  %v4579_v28 = vadd.f32 %v4350_v51, %v611_v19  ;;  %3013 = vrot.lane.b32.xlu1 %v4574_v48, %s4034_s10  ;;  %v763_v27 = vsel %vm680_vm8, %v4574_v48, 0.0  ;;  %v829_v51 = vmul.f32 0.0625, %v725_v30 }
 0x137   :  { %v749_v0 = vrot.slane %v748_v32, 2  ;;  %v756_v22 = vrot.slane %v755_v14, 4  ;;  %v786_v9 = vadd.f32 %v5412_v35, %v4490_v41  ;;  %v825_v29 = vmul.f32 0.0625, %v4539_v46 }
 0x138   :  { %v743_v40 = vadd.f32 %v742_v63, %v741_v47  ;;  %v762_v49 = vsel %vm680_vm8, %v4579_v28, 0.0  ;;  %3011 = vrot.lane.b32.xlu0 %v4579_v28, %s4034_s10  ;;  %v851_v41 = vadd.f32 %v4550_v11, %v828_v56  ;;  %v812_v47 = vrot.slane %v811_v17, 2  ;;  %v996_v63 = vpop.f32.mrf.mxu1 }
 0x139   :  { %v750_v19 = vadd.f32 %v749_v0, %v748_v32  ;;  %v757_v62 = vadd.f32 %v756_v22, %v755_v14  ;;  %v764_v15 = vadd.f32 %v763_v27, %v762_v49  ;;  %v5413_v22 = vrot.slane %v4505_v43, 2 }
 0x13a   :  { %3033 = vrot.lane.b32.xlu1 %v4495_v12, %s4034_s10  ;;  %v831_v36 = vmul.f32 0.0625, %v743_v40  ;;  %v1027_v7 = vrot.slane %v4562_v23, 7  ;;  %v852_v46 = vadd.f32 %v4550_v11, %v829_v51  ;;  %v821_v58 = vrot.slane %v820_v45, 2 }
 0x13b   :  { %v751_v59 = vrot.slane %v750_v19, 1  ;;  %v758_v0 = vrot.slane %v757_v62, 2  ;;  %v795_v38 = vadd.f32 %v5413_v22, %v4505_v43  ;;  %v765_v3 = vrot.slane %v764_v15, 4 }
 0x13c   :  { %3031 = vrot.lane.b32.xlu0 %v4499_v52, %s4034_s10  ;;  %v778_v40 = vrot.slane %v4492_v6, 1  ;;  %v1029_v30 = vrot.slane %v850_v39, 6  ;;  %v804_v32 = vadd.f32 %v803_v31, %v802_v2  ;;  %v853_v14 = vadd.f32 %v4550_v11, %v830_v25 }
 0x13d   :  { %v752_v16 = vadd.f32 %v751_v59, %v750_v19  ;;  %v848_v56 = vadd.f32 %v4550_v11, %v825_v29  ;;  %v854_v43 = vadd.f32 %v4550_v11, %v831_v36  ;;  %v759_v23 = vadd.f32 %v758_v0, %v757_v62  ;;  %v3429_v29 = vld [vmem:[%s5376_s5] ss:$0 sm:$0xff] }
 0x13e   :  { %3037 = vrot.lane.b32.xlu1 %v4508_v54, %s4034_s10  ;;  %v787_v49 = vrot.slane %v786_v9, 1  ;;  %v1031_v51 = vrot.slane %v851_v41, 5  ;;  %v813_v35 = vadd.f32 %v812_v47, %v811_v17  ;;  %v766_v19 = vadd.f32 %v765_v3, %v764_v15 }
 0x13f   :  { %v832_v27 = vmul.f32 0.0625, %v752_v16  ;;  %v1028_v2 = vsel %vm892_vm1, %v1027_v7, %v848_v56  ;;  %v796_v39 = vrot.slane %v795_v38, 1  ;;  %v1033_v31 = vrot.slane %v852_v46, 4 }
 0x140   :  { %3035 = vrot.lane.b32.xlu0 %v4511_v8, %s4034_s10  ;;  %v822_v25 = vadd.f32 %v821_v58, %v820_v45  ;;  %v1030_v36 = vsel %vm895_vm2, %v1029_v30, %v1028_v2  ;;  %v805_v59 = vrot.slane %v804_v32, 1  ;;  %v1035_v62 = vrot.slane %v853_v14, 3 }
 0x141   :  { %v997_v0 = vadd.f32 %v3429_v29, %v996_v63  ;;  %v1037_v22 = vrot.slane %v854_v43, 2  ;;  %v760_v17 = vrot.slane %v759_v23, 1  ;;  %v767_v15 = vrot.slane %v766_v19, 2 }
 0x142   :  { %v855_v41 = vadd.f32 %v4550_v11, %v832_v27  ;;  %v779_v47 = vadd.f32 %v778_v40, %v4492_v6  ;;  %v814_v3 = vrot.slane %v813_v35, 1  ;;  %v5414_v7 = vlaneseq }
 0x143   :  { %v1032_v45 = vsel %vm898_vm3, %v1031_v51, %v1030_v36  ;;  %v788_v58 = vadd.f32 %v787_v49, %v786_v9  ;;  %v768_v16 = vadd.f32 %v767_v15, %v766_v19  ;;  %v823_v30 = vrot.slane %v822_v25, 1 }
 0x144   :  { %v1147_v46 = vshrl.u32 %v5414_v7, 7  ;;  %v1034_v56 = vsel %vm901_vm4, %v1033_v31, %v1032_v45  ;;  %v797_v2 = vadd.f32 %v796_v39, %v795_v38  ;;  %v806_v14 = vadd.f32 %v805_v59, %v804_v32 }
 0x145   :  { %v1036_v43 = vsel %vm904_vm5, %v1035_v62, %v1034_v56  ;;  %v1039_v63 = vrot.slane %v855_v41, 1  ;;  %v4625_v54 = vmul.f32 0.35355338, %v997_v0  ;;  %v761_v27 = vadd.f32 %v760_v17, %v759_v23 }
 0x146   :  { %v769_v8 = vrot.slane %v768_v16, 1  ;;  %v1038_v6 = vsel %vm907_vm6, %v1037_v22, %v1036_v43  ;;  %v835_v40 = vmul.f32 0.0625, %v779_v47  ;;  %v815_v51 = vadd.f32 %v814_v3, %v813_v35 }
 0x147   :  { %v1040_v7 = vsel %vm910_vm7, %v1039_v63, %v1038_v6  ;;  %v836_v9 = vmul.f32 0.0625, %v788_v58  ;;  %v824_v38 = vadd.f32 %v823_v30, %v822_v25  ;;  %v837_v32 = vmul.f32 0.0625, %v797_v2 }
 0x148   :  { %v770_v49 = vadd.f32 %v769_v8, %v768_v16  ;;  %v1057_v19 = vmul.f32 %v1040_v7, %v4625_v54  ;;  %2935 = vrot.lane.b32.xlu0 %v1040_v7, %s4034_s10  ;;  %v838_v39 = vmul.f32 0.0625, %v806_v14  ;;  %v5415_v31 = vunpack.c.0.s8 %v4484_v37 }
 0x149   :  { %v833_v23 = vmul.f32 0.0625, %v761_v27  ;;  %v858_v62 = vadd.f32 %v4550_v11, %v835_v40  ;;  %v839_v35 = vmul.f32 0.0625, %v815_v51  ;;  %v859_v8 = vadd.f32 %v4550_v11, %v836_v9 }
 0x14a   :  { %v4633_v36 = vsub.s32 %v5415_v31, %v1147_v46  ;;  %v834_v59 = vmul.f32 0.0625, %v770_v49  ;;  %3706 = vmatprep.mubr.msk.f32.mxu1 %vm163_vm0, %v1057_v19  ;;  %v840_v22 = vmul.f32 0.0625, %v824_v38  ;;  %v860_v17 = vadd.f32 %v4550_v11, %v837_v32 }
 0x14b   :  { %v856_v37 = vadd.f32 %v4550_v11, %v833_v23  ;;  %v861_v41 = vadd.f32 %v4550_v11, %v838_v39  ;;  %v1043_v47 = vrot.slane %v858_v62, 6  ;;  %v862_v3 = vadd.f32 %v4550_v11, %v839_v35 }
 0x14c   :  { %v1149_v0 = vrot.slane %v4625_v54, %v4633_v36  ;;  %v857_v25 = vadd.f32 %v4550_v11, %v834_v59  ;;  %v1045_v45 = vrot.slane %v859_v8, 5  ;;  %v863_v16 = vadd.f32 %v4550_v11, %v840_v22 }
 0x14d   :  { %v1002_v30 = vadd.f32 %v4596_v1, %v3429_v29  ;;  %v1047_v14 = vrot.slane %v860_v17, 4  ;;  %v4650_v43 = vsub.s32 0, %v1147_v46  ;;  %v1049_v27 = vrot.slane %v861_v41, 3 }
 0x14e   :  { %v1041_v15 = vrot.slane %v857_v25, 7  ;;  %v1165_v58 = vrot.slane %v1149_v0, %v4633_v36  ;;  %v1051_v40 = vrot.slane %v862_v3, 2  ;;  %v1157_v7 = vcombine.high %v1149_v0, %v1149_v0 }
 0x14f   :  { %v1053_v9 = vrot.slane %v863_v16, 1  ;;  %v4656_v49 = vmul.f32 0.35355338, %v1002_v30  ;;  %v1142_v32 = vcombine.high %v4625_v54, %v4625_v54 }
 0x150   :  { %v1042_v56 = vsel %vm892_vm1, %v1041_v15, %v856_v37  ;;  %v1243_v11 = vrot.slane %v1165_v58, %v4650_v43  ;;  %v1179_v19 = vrot.slane %v1157_v7, %v4633_v36  ;;  %v1187_v39 = vcombine.high %v1165_v58, %v1165_v58 }
 0x151   :  { %v1044_v2 = vsel %vm895_vm2, %v1043_v47, %v1042_v56  ;;  %v5417_v56 = vld [vmem:[#allocation27_spill] sm:$0xff] }
 0x152   :  { %v1046_v63 = vsel %vm898_vm3, %v1045_v45, %v1044_v2  ;;  %v1320_v38 = vmul.f32 %v1243_v11, %v4363_v60  ;;  %v1247_v31 = vrot.slane %v1179_v19, %v4650_v43  ;;  %v1321_v60 = vmul.f32 %v1243_v11, %v4353_v55  ;;  %v5419_v11 = vld [vmem:[#allocation16_spill] sm:$0xff] }
 0x153   :  { %v1048_v6 = vsel %vm901_vm4, %v1047_v14, %v1046_v63  ;;  %v1251_v54 = vrot.slane %v1187_v39, %v4650_v43  ;;  %v1189_v59 = vcombine.high %v1179_v19, %v1179_v19 }
 0x154   :  { %v1050_v51 = vsel %vm904_vm5, %v1049_v27, %v1048_v6  ;;  %v1322_v23 = vmul.f32 %v1247_v31, %v4386_v4 }
 0x155   :  { %v1052_v1 = vsel %vm907_vm6, %v1051_v40, %v1050_v51  ;;  %v1324_v62 = vmul.f32 %v1251_v54, %v4396_v10  ;;  %v1255_v35 = vrot.slane %v1189_v59, %v4650_v43 }
 0x156   :  { %v1054_v29 = vsel %vm910_vm7, %v1053_v9, %v1052_v1 }
 0x157   :  { %v1058_v46 = vmul.f32 %v1054_v29, %v4656_v49  ;;  %2937 = vrot.lane.b32.xlu1 %v1054_v29, %s4034_s10  ;;  %v1326_v8 = vmul.f32 %v1255_v35, %v4428_v34 }
 0x159   :  { %3707 = vmatmul.mubr.msk.f32.vlgmr.msra.gmra.mxu1 %vm163_vm0, %v1058_v46  ;;  %v5421_v46 = vld [vmem:[#allocation18_spill] sm:$0xff] }
 0x15a   :  { %3710 = vmatpush3.msra.mxu1 %v4321_v26  ;;  %3717 = vmatprep.mubr.msk.f32.mxu1 %vm163_vm0, %v1320_v38  ;;  %v1156_v26 = vrot.slane %v1142_v32, %v4633_v36 }
 0x15b   :  { %3711 = vmatprep.subr.mxu1 %v4326_v13 }
 0x15c   :  { %3712 = vmatpush3.msra.mxu1 %v4326_v13  ;;  %v1323_v13 = vmul.f32 %v1247_v31, %v4366_v61  ;;  %v1172_v55 = vrot.slane %v1156_v26, %v4633_v36  ;;  %v1327_v61 = vmul.f32 %v1255_v35, %v4425_v33  ;;  %v1198_v33 = vrot.slane %v4656_v49, %v4633_v36  ;;  %v5423_v31 = vld [vmem:[#allocation20_spill] sm:$0xff]  ;;  %v5426_v35 = vld [vmem:[#allocation21_spill] sm:$0xff] }
 0x15d   :  { %3713 = vmatprep.subr.mxu1 %v4333_v21 }
 0x15e   :  { %3714 = vmatpush3.msra.mxu1 %v4333_v21  ;;  %v1158_v21 = vcombine.high %v1156_v26, %v1156_v26  ;;  %v1259_v0 = vrot.slane %v1172_v55, %v4650_v43  ;;  %v1188_v22 = vcombine.high %v1172_v55, %v1172_v55  ;;  %v1206_v47 = vcombine.high %v1198_v33, %v1198_v33 }
 0x15f   :  { %3715 = vmatprep.subr.mxu1 %v4340_v50 }
 0x160   :  { %3716 = vmatpush3.msra.mxu1 %v4340_v50  ;;  %v1325_v50 = vmul.f32 %v1251_v54, %v4393_v53  ;;  %v1186_v4 = vrot.slane %v1158_v21, %v4633_v36  ;;  %v1328_v10 = vmul.f32 %v1259_v0, %v4450_v44  ;;  %v1329_v53 = vmul.f32 %v1259_v0, %v4447_v42  ;;  %v5424_v54 = vld [vmem:[#allocation19_spill] sm:$0xff] }
 0x161   :  { %3718 = vmatmul.mubr.msk.f32.vlgmr.msra.gmra.mxu1 %vm163_vm0, %v1321_v60  ;;  %v1267_v37 = vrot.slane %v1188_v22, %v4650_v43  ;;  %v1214_v42 = vrot.slane %v1198_v33, %v4633_v36  ;;  %v1228_v2 = vrot.slane %v1206_v47, %v4633_v36 }
 0x162   :  { %3720 = vmatprep.mubr.msk.f32.mxu1 %vm163_vm0, %v1322_v23  ;;  %v1263_v25 = vrot.slane %v1186_v4, %v4650_v43  ;;  %v1190_v34 = vcombine.high %v1186_v4, %v1186_v4 }
 0x163   :  { %v1332_v41 = vmul.f32 %v1267_v37, %v4514_v20  ;;  %v1275_v45 = vrot.slane %v1214_v42, %v4650_v43  ;;  %v1191_v20 = vcombine.high %v4656_v49, %v4656_v49  ;;  %v1236_v16 = vcombine.high %v1214_v42, %v1214_v42 }
 0x164   :  { %v1330_v17 = vmul.f32 %v1263_v25, %v4474_v24  ;;  %v1331_v44 = vmul.f32 %v1263_v25, %v4465_v57  ;;  %v1271_v15 = vrot.slane %v1190_v34, %v4650_v43  ;;  %v1333_v24 = vmul.f32 %v1267_v37, %v4502_v5  ;;  %v5416_v57 = vld [vmem:[#allocation25_spill] sm:$0xff]  ;;  %v5428_v25 = vld [vmem:[#allocation23_spill] sm:$0xff] }
 0x165   :  { %3721 = vmatmul.mubr.msk.f32.gmra.mxu1 %vm163_vm0, %v1323_v13  ;;  %v1336_v30 = vmul.f32 %v1275_v45, %v5417_v56  ;;  %v1279_v5 = vrot.slane %v1228_v2, %v4650_v43  ;;  %v1205_v63 = vrot.slane %v1191_v20, %v4633_v36  ;;  %v1238_v27 = vcombine.high %v1228_v2, %v1228_v2  ;;  %v5425_v13 = vld [vmem:[#allocation22_spill] sm:$0xff] }
 0x166   :  { %3723 = vmatprep.mubr.msk.f32.mxu1 %vm163_vm0, %v1324_v62  ;;  %v1334_v3 = vmul.f32 %v1271_v15, %v4542_v18  ;;  %v1335_v58 = vmul.f32 %v1271_v15, %v5416_v57  ;;  %v5418_v18 = vld [vmem:[#allocation26_spill] sm:$0xff]  ;;  %v1283_v40 = vrot.slane %v1236_v16, %v4650_v43 }
 0x167   :  { %v1337_v14 = vmul.f32 %v1275_v45, %v5418_v18  ;;  %v1338_v6 = vmul.f32 %v1279_v5, %v4579_v28  ;;  %v1339_v7 = vmul.f32 %v1279_v5, %v4574_v48  ;;  %v1207_v51 = vcombine.high %v1205_v63, %v1205_v63  ;;  %v5420_v28 = vld [vmem:[#allocation15_spill] sm:$0xff]  ;;  %v5422_v48 = vld [vmem:[#allocation17_spill] sm:$0xff] }
 0x168   :  { %v1221_v9 = vrot.slane %v1205_v63, %v4633_v36  ;;  %v1340_v49 = vmul.f32 %v1283_v40, %v5419_v11  ;;  %v1287_v1 = vrot.slane %v1238_v27, %v4650_v43  ;;  %v1341_v29 = vmul.f32 %v1283_v40, %v5420_v28 }
 0x169   :  { %3724 = vmatmul.mubr.msk.f32.gmra.mxu1 %vm163_vm0, %v1325_v50  ;;  %v1235_v32 = vrot.slane %v1207_v51, %v4633_v36 }
 0x16a   :  { %3726 = vmatprep.mubr.msk.f32.mxu1 %vm163_vm0, %v1326_v8  ;;  %v1342_v19 = vmul.f32 %v1287_v1, %v5421_v46  ;;  %v1291_v38 = vrot.slane %v1221_v9, %v4650_v43  ;;  %v1343_v39 = vmul.f32 %v1287_v1, %v5422_v48  ;;  %v1237_v23 = vcombine.high %v1221_v9, %v1221_v9 }
 0x16b   :  { %v1295_v26 = vrot.slane %v1235_v32, %v4650_v43  ;;  %v1239_v62 = vcombine.high %v1235_v32, %v1235_v32 }
 0x16c   :  { %v1344_v60 = vmul.f32 %v1291_v38, %v5423_v31  ;;  %v1345_v59 = vmul.f32 %v1291_v38, %v5424_v54  ;;  %v1299_v55 = vrot.slane %v1237_v23, %v4650_v43 }
 0x16d   :  { %3727 = vmatmul.mubr.msk.f32.gmra.mxu1 %vm163_vm0, %v1327_v61  ;;  %v1346_v21 = vmul.f32 %v1295_v26, %v5425_v13  ;;  %v1347_v50 = vmul.f32 %v1295_v26, %v5426_v35  ;;  %v1303_v8 = vrot.slane %v1239_v62, %v4650_v43  ;;  %v5427_v61 = vld [vmem:[#allocation24_spill] sm:$0xff] }
 0x16e   :  { %3729 = vmatprep.mubr.msk.f32.mxu1 %vm163_vm0, %v1328_v10  ;;  %v1348_v4 = vmul.f32 %v1299_v55, %v4499_v52  ;;  %v1349_v0 = vmul.f32 %v1299_v55, %v4495_v12 }
 0x16f   :  { %v1350_v10 = vmul.f32 %v1303_v8, %v5427_v61  ;;  %v1351_v22 = vmul.f32 %v1303_v8, %v5428_v25 }
 0x171   :  { %3730 = vmatmul.mubr.msk.f32.gmra.mxu1 %vm163_vm0, %v1329_v53 }
 0x172   :  { %3732 = vmatprep.mubr.msk.f32.mxu1 %vm163_vm0, %v1330_v17 }
 0x175   :  { %3733 = vmatmul.mubr.msk.f32.gmra.mxu1 %vm163_vm0, %v1331_v44 }
 0x176   :  { %3735 = vmatprep.mubr.msk.f32.mxu1 %vm163_vm0, %v1332_v41 }
 0x179   :  { %3736 = vmatmul.mubr.msk.f32.gmra.mxu1 %vm163_vm0, %v1333_v24 }
 0x17a   :  { %3738 = vmatprep.mubr.msk.f32.mxu1 %vm163_vm0, %v1334_v3 }
 0x17d   :  { %3739 = vmatmul.mubr.msk.f32.gmra.mxu1 %vm163_vm0, %v1335_v58 }
 0x17e   :  { %3741 = vmatprep.mubr.msk.f32.mxu1 %vm163_vm0, %v1336_v30 }
 0x181   :  { %3742 = vmatmul.mubr.msk.f32.gmra.mxu1 %vm163_vm0, %v1337_v14 }
 0x182   :  { %3744 = vmatprep.mubr.msk.f32.mxu1 %vm163_vm0, %v1338_v6 }
 0x185   :  { %3745 = vmatmul.mubr.msk.f32.gmra.mxu1 %vm163_vm0, %v1339_v7 }
 0x186   :  { %3747 = vmatprep.mubr.msk.f32.mxu1 %vm163_vm0, %v1340_v49 }
 0x189   :  { %3748 = vmatmul.mubr.msk.f32.gmra.mxu1 %vm163_vm0, %v1341_v29 }
 0x18a   :  { %3750 = vmatprep.mubr.msk.f32.mxu1 %vm163_vm0, %v1342_v19 }
 0x18d   :  { %3751 = vmatmul.mubr.msk.f32.gmra.mxu1 %vm163_vm0, %v1343_v39 }
 0x18e   :  { %3753 = vmatprep.mubr.msk.f32.mxu1 %vm163_vm0, %v1344_v60 }
 0x191   :  { %3754 = vmatmul.mubr.msk.f32.gmra.mxu1 %vm163_vm0, %v1345_v59 }
 0x192   :  { %3756 = vmatprep.mubr.msk.f32.mxu1 %vm163_vm0, %v1346_v21 }
 0x195   :  { %3757 = vmatmul.mubr.msk.f32.gmra.mxu1 %vm163_vm0, %v1347_v50 }
 0x196   :  { %3759 = vmatprep.mubr.msk.f32.mxu1 %vm163_vm0, %v1348_v4 }
 0x199   :  { %3760 = vmatmul.mubr.msk.f32.gmra.mxu1 %vm163_vm0, %v1349_v0 }
 0x19a   :  { %3762 = vmatprep.mubr.msk.f32.mxu1 %vm163_vm0, %v1350_v10 }
 0x19d   :  { %3763 = vmatmul.mubr.msk.f32.gmra.mxu1 %vm163_vm0, %v1351_v22 }
 0x219   :  { %v4764_v53 = vpop.f32.mrf.mxu1 }
 0x21b   :  { %v4766_v52 = vpop.f32.mrf.mxu1 }
 0x221   :  { %v4768_v34 = vpop.f32.mrf.mxu1 }
 0x222   :  { %v1675_v45 = vsel %vm1673_vm9, %v4768_v34, -inf }
 0x223   :  { %v4770_v17 = vpop.f32.mrf.mxu1 }
 0x224   :  { %v1674_v41 = vsel %vm1673_vm9, %v4770_v17, -inf }
 0x225   :  { %v4772_v37 = vpop.f32.mrf.mxu1  ;;  %v1676_v20 = vmax.f32 %v1674_v41, %v1675_v45 }
 0x226   :  { %v1684_v15 = vsel %vm1673_vm9, %v4772_v37, -inf }
 0x227   :  { %v4774_v12 = vpop.f32.mrf.mxu1  ;;  %v1677_v63 = vrot.slane %v1676_v20, 4 }
 0x228   :  { %v1683_v33 = vsel %vm1673_vm9, %v4774_v12, -inf }
 0x229   :  { %v4778_v44 = vpop.f32.mrf.mxu1  ;;  %v1685_v42 = vmax.f32 %v1683_v33, %v1684_v15  ;;  %v1678_v1 = vmax.f32 %v1676_v20, %v1677_v63 }
 0x22a   :  { %v1693_v47 = vsel %vm1673_vm9, %v4778_v44, -inf }
 0x22b   :  { %v4784_v24 = vpop.f32.mrf.mxu1  ;;  %v1686_v16 = vrot.slane %v1685_v42, 4  ;;  %v1679_v26 = vrot.slane %v1678_v1, 2 }
 0x22c   :  { %v1692_v3 = vsel %vm1673_vm9, %v4784_v24, -inf }
 0x22d   :  { %v1694_v57 = vmax.f32 %v1692_v3, %v1693_v47  ;;  %v4792_v58 = vpop.f32.mrf.mxu1  ;;  %v1687_v27 = vmax.f32 %v1685_v42, %v1686_v16  ;;  %v1680_v0 = vmax.f32 %v1678_v1, %v1679_v26 }
 0x22e   :  { %v1702_v30 = vsel %vm1673_vm9, %v4792_v58, -inf }
 0x22f   :  { %v4794_v56 = vpop.f32.mrf.mxu1  ;;  %v1695_v5 = vrot.slane %v1694_v57, 4  ;;  %v1688_v29 = vrot.slane %v1687_v27, 2  ;;  %v1681_v16 = vrot.slane %v1680_v0, 1 }
 0x230   :  { %v1701_v2 = vsel %vm1673_vm9, %v4794_v56, -inf }
 0x231   :  { %v1703_v18 = vmax.f32 %v1701_v2, %v1702_v30  ;;  %v4800_v14 = vpop.f32.mrf.mxu1  ;;  %v1696_v9 = vmax.f32 %v1694_v57, %v1695_v5  ;;  %v1689_v54 = vmax.f32 %v1687_v27, %v1688_v29 }
 0x232   :  { %v1711_v7 = vsel %vm1673_vm9, %v4800_v14, -inf }
 0x233   :  { %v1704_v6 = vrot.slane %v1703_v18, 4  ;;  %v4802_v40 = vpop.f32.mrf.mxu1  ;;  %v1697_v48 = vrot.slane %v1696_v9, 2  ;;  %v1690_v10 = vrot.slane %v1689_v54, 1 }
 0x234   :  { %v1710_v51 = vsel %vm1673_vm9, %v4802_v40, -inf }
 0x235   :  { %v1712_v11 = vmax.f32 %v1710_v51, %v1711_v7  ;;  %v4808_v49 = vpop.f32.mrf.mxu1  ;;  %v1705_v28 = vmax.f32 %v1703_v18, %v1704_v6  ;;  %v1698_v35 = vmax.f32 %v1696_v9, %v1697_v48  ;;  %v1691_v2 = vmax.f32 %v1689_v54, %v1690_v10  ;;  %v4839_v6 = vld [vmem:[%s5382_s11] sm:$0xf] }
 0x236   :  { %v1720_v38 = vsel %vm1673_vm9, %v4808_v49, -inf  ;;  %3765 = vmatprep.subr.msk.mxu0 %vm2323_vm10, %v4839_v6 }
 0x237   :  { %v1713_v46 = vrot.slane %v1712_v11, 4  ;;  %v4810_v19 = vpop.f32.mrf.mxu1  ;;  %v1706_v23 = vrot.slane %v1705_v28, 2  ;;  %v1699_v47 = vrot.slane %v1698_v35, 1  ;;  %3766 = vmatpush3.msk.msra.mxu0 %vm2323_vm10, %v4839_v6 }
 0x238   :  { %v1719_v32 = vsel %vm1673_vm9, %v4810_v19, -inf  ;;  %3770 = vmatprep.subr.msk.mxu0 %vm2323_vm10, %v4839_v6 }
 0x239   :  { %v1714_v39 = vmax.f32 %v1712_v11, %v1713_v46  ;;  %v1721_v31 = vmax.f32 %v1719_v32, %v1720_v38  ;;  %v4816_v60 = vpop.f32.mrf.mxu1  ;;  %v1707_v61 = vmax.f32 %v1705_v28, %v1706_v23  ;;  %v1700_v11 = vmax.f32 %v1698_v35, %v1699_v47 }
 0x23a   :  { %v1729_v55 = vsel %vm1673_vm9, %v4816_v60, -inf  ;;  %v1682_v38 = vmax.f32 %v1680_v0, %v1681_v16 }
 0x23b   :  { %v1715_v59 = vrot.slane %v1714_v39, 2  ;;  %v1722_v13 = vrot.slane %v1721_v31, 4  ;;  %v4818_v21 = vpop.f32.mrf.mxu1  ;;  %v1708_v30 = vrot.slane %v1707_v61, 1 }
 0x23c   :  { %v1728_v62 = vsel %vm1673_vm9, %v4818_v21, -inf  ;;  %v1834_v54 = vsel %vm892_vm1, %v1691_v2, %v1682_v38 }
 0x23d   :  { %v1723_v50 = vmax.f32 %v1721_v31, %v1722_v13  ;;  %v1730_v4 = vmax.f32 %v1728_v62, %v1729_v55  ;;  %v4824_v8 = vpop.f32.mrf.mxu1  ;;  %v1716_v25 = vmax.f32 %v1714_v39, %v1715_v59  ;;  %v1709_v32 = vmax.f32 %v1707_v61, %v1708_v30 }
 0x23e   :  { %v1738_v41 = vsel %vm1673_vm9, %v4824_v8, -inf  ;;  %v1835_v62 = vsel %vm895_vm2, %v1700_v11, %v1834_v54 }
 0x23f   :  { %v1724_v22 = vrot.slane %v1723_v50, 2  ;;  %v1731_v33 = vrot.slane %v1730_v4, 4  ;;  %v4826_v15 = vpop.f32.mrf.mxu1  ;;  %v1717_v5 = vrot.slane %v1716_v25, 1  ;;  %v1836_v61 = vsel %vm898_vm3, %v1709_v32, %v1835_v62 }
 0x240   :  { %v1737_v42 = vsel %vm1673_vm9, %v4826_v15, -inf }
 0x241   :  { %v1725_v3 = vmax.f32 %v1723_v50, %v1724_v22  ;;  %v1732_v45 = vmax.f32 %v1730_v4, %v1731_v33  ;;  %v1739_v57 = vmax.f32 %v1737_v42, %v1738_v41  ;;  %v4832_v20 = vpop.f32.mrf.mxu1  ;;  %v1718_v48 = vmax.f32 %v1716_v25, %v1717_v5 }
 0x242   :  { %v1747_v51 = vsel %vm1673_vm9, %v4832_v20, -inf }
 0x243   :  { %v1733_v18 = vrot.slane %v1732_v45, 2  ;;  %v1740_v63 = vrot.slane %v1739_v57, 4  ;;  %v4834_v27 = vpop.f32.mrf.mxu1  ;;  %v1726_v7 = vrot.slane %v1725_v3, 1  ;;  %v1837_v25 = vsel %vm901_vm4, %v1718_v48, %v1836_v61 }
 0x244   :  { %v1746_v9 = vsel %vm1673_vm9, %v4834_v27, -inf }
 0x245   :  { %v1734_v1 = vmax.f32 %v1732_v45, %v1733_v18  ;;  %v1741_v28 = vmax.f32 %v1739_v57, %v1740_v63  ;;  %v1748_v29 = vmax.f32 %v1746_v9, %v1747_v51  ;;  %v4845_v46 = vpop.f32.mrf.mxu1  ;;  %v1727_v59 = vmax.f32 %v1725_v3, %v1726_v7 }
 0x246   :  { %v1756_v13 = vsel %vm1673_vm9, %v4845_v46, -inf }
 0x247   :  { %v1735_v39 = vrot.slane %v1734_v1, 1  ;;  %v1742_v31 = vrot.slane %v1741_v28, 2  ;;  %v1749_v26 = vrot.slane %v1748_v29, 4  ;;  %v4851_v23 = vpop.f32.mrf.mxu1  ;;  %v1838_v47 = vsel %vm904_vm5, %v1727_v59, %v1837_v25 }
 0x248   :  { %v1755_v55 = vsel %vm1673_vm9, %v4851_v23, -inf }
 0x249   :  { %v1743_v35 = vmax.f32 %v1741_v28, %v1742_v31  ;;  %v1750_v50 = vmax.f32 %v1748_v29, %v1749_v26  ;;  %v1757_v4 = vmax.f32 %v1755_v55, %v1756_v13  ;;  %v4861_v0 = vpop.f32.mrf.mxu1  ;;  %v1736_v10 = vmax.f32 %v1734_v1, %v1735_v39 }
 0x24a   :  { %v1765_v3 = vsel %vm1673_vm9, %v4861_v0, -inf }
 0x24b   :  { %v1744_v22 = vrot.slane %v1743_v35, 1  ;;  %v1751_v33 = vrot.slane %v1750_v50, 2  ;;  %v1758_v41 = vrot.slane %v1757_v4, 4  ;;  %v4865_v42 = vpop.f32.mrf.mxu1  ;;  %v1839_v18 = vsel %vm907_vm6, %v1736_v10, %v1838_v47 }
 0x24c   :  { %v1764_v45 = vsel %vm1673_vm9, %v4865_v42, -inf }
 0x24d   :  { %v1745_v57 = vmax.f32 %v1743_v35, %v1744_v22  ;;  %v1752_v16 = vmax.f32 %v1750_v50, %v1751_v33  ;;  %v1759_v30 = vmax.f32 %v1757_v4, %v1758_v41  ;;  %v1766_v2 = vmax.f32 %v1764_v45, %v1765_v3  ;;  %v4872_v5 = vpop.f32.mrf.mxu1 }
 0x24e   :  { %v1774_v1 = vsel %vm1673_vm9, %v4872_v5, -inf }
 0x24f   :  { %v1840_v63 = vsel %vm910_vm7, %v1745_v57, %v1839_v18  ;;  %v1760_v7 = vrot.slane %v1759_v30, 2  ;;  %v1767_v51 = vrot.slane %v1766_v2, 4  ;;  %v4876_v9 = vpop.f32.mrf.mxu1  ;;  %v1753_v29 = vrot.slane %v1752_v16, 1 }
 0x250   :  { %v1850_v11 = vmax.f32 %v4766_v52, %v1840_v63  ;;  %v1773_v28 = vsel %vm1673_vm9, %v4876_v9, -inf }
 0x251   :  { %v1761_v38 = vmax.f32 %v1759_v30, %v1760_v7  ;;  %v1768_v32 = vmax.f32 %v1766_v2, %v1767_v51  ;;  %v1775_v48 = vmax.f32 %v1773_v28, %v1774_v1  ;;  %v4883_v39 = vpop.f32.mrf.mxu1  ;;  %v1754_v4 = vmax.f32 %v1752_v16, %v1753_v29 }
 0x252   :  { %v1852_v31 = vsub.f32 %v4766_v52, %v1850_v11  ;;  %v1860_v26 = vcombine.high %v1850_v11, %v1850_v11  ;;  %v1867_v54 = vrot.slane %v1850_v11, %v4633_v36  ;;  %v4893_v10 = vsel %vm1673_vm9, %v4883_v39, -inf }
 0x253   :  { %v1762_v59 = vrot.slane %v1761_v38, 1  ;;  %v1769_v13 = vrot.slane %v1768_v32, 2  ;;  %v4887_v55 = vpop.f32.mrf.mxu1  ;;  %v1776_v61 = vrot.slane %v1775_v48, 4 }
 0x254   :  { %v1874_v62 = vrot.slane %v1860_v26, %v4633_v36  ;;  %v1875_v35 = vcombine.high %v1867_v54, %v1867_v54  ;;  %v1883_v50 = vrot.slane %v1867_v54, %v4633_v36  ;;  %v4897_v52 = vmul.f32 1.442695, %v1852_v31 }
 0x255   :  { %v4895_v25 = vpop.f32.mrf.mxu1  ;;  %v1763_v45 = vmax.f32 %v1761_v38, %v1762_v59  ;;  %v1770_v57 = vmax.f32 %v1768_v32, %v1769_v13  ;;  %v1777_v11 = vmax.f32 %v1775_v48, %v1776_v61  ;;  %v1782_v1 = vsel %vm1673_vm9, %v4887_v55, -inf }
 0x256   :  { %v1876_v22 = vcombine.high %v1874_v62, %v1874_v62  ;;  %v1890_v33 = vrot.slane %v1874_v62, %v4633_v36  ;;  %v1897_v41 = vrot.slane %v1875_v35, %v4633_v36  ;;  %v1905_v47 = vcombine.high %v1883_v50, %v1883_v50 }
 0x257   :  { %v1961_v3 = vrot.slane %v1883_v50, %v4650_v43  ;;  %v4902_v16 = vpop.f32.mrf.mxu1  ;;  %v4924_v35 = vsel %vm892_vm1, %v1763_v45, %v1754_v4  ;;  %v1771_v50 = vrot.slane %v1770_v57, 1 }
 0x258   :  { %v1904_v30 = vrot.slane %v1876_v22, %v4633_v36  ;;  %v1906_v2 = vcombine.high %v1890_v33, %v1890_v33  ;;  %v1907_v18 = vcombine.high %v1897_v41, %v1897_v41  ;;  %v1965_v63 = vrot.slane %v1897_v41, %v4650_v43 }
 0x259   :  { %v1969_v7 = vrot.slane %v1905_v47, %v4650_v43  ;;  %v1977_v51 = vrot.slane %v1890_v33, %v4650_v43  ;;  %v4910_v28 = vpop.f32.mrf.mxu1  ;;  %v2038_v31 = vsub.f32 %v4770_v17, %v1961_v3  ;;  %v2039_v54 = vsub.f32 %v4768_v34, %v1961_v3 }
 0x25a   :  { %v1908_v29 = vcombine.high %v1904_v30, %v1904_v30  ;;  %v1973_v38 = vrot.slane %v1907_v18, %v4650_v43  ;;  %v1981_v32 = vrot.slane %v1904_v30, %v4650_v43  ;;  %v1985_v26 = vrot.slane %v1906_v2, %v4650_v43 }
 0x25b   :  { %v2040_v59 = vsub.f32 %v4774_v12, %v1965_v63  ;;  %v2041_v48 = vsub.f32 %v4772_v37, %v1965_v63  ;;  %v2042_v62 = vsub.f32 %v4784_v24, %v1969_v7  ;;  %v4926_v61 = vpop.f32.mrf.mxu1  ;;  %v2043_v17 = vsub.f32 %v4778_v44, %v1969_v7 }
 0x25c   :  { %v4920_v13 = vrot.slane %v1908_v29, %v4650_v43  ;;  %v2044_v22 = vsub.f32 %v4794_v56, %v1973_v38  ;;  %v2045_v34 = vsub.f32 %v4792_v58, %v1973_v38  ;;  %v2046_v12 = vsub.f32 %v4802_v40, %v1977_v51 }
 0x25d   :  { %v2047_v37 = vsub.f32 %v4800_v14, %v1977_v51  ;;  %v2048_v33 = vsub.f32 %v4810_v19, %v1981_v32  ;;  %v2049_v24 = vsub.f32 %v4808_v49, %v1981_v32  ;;  %v2070_v41 = vmul.f32 1.442695, %v2038_v31  ;;  %v4939_v40 = vpop.f32.mrf.mxu1 }
 0x25e   :  { %v2050_v4 = vsub.f32 %v4818_v21, %v1985_v26  ;;  %v2072_v47 = vmul.f32 1.442695, %v2039_v54  ;;  %v2074_v3 = vmul.f32 1.442695, %v2040_v59  ;;  %v2076_v45 = vmul.f32 1.442695, %v2041_v48 }
 0x25f   :  { %v2051_v44 = vsub.f32 %v4816_v60, %v1985_v26  ;;  %v2052_v56 = vsub.f32 %v4826_v15, %v4920_v13  ;;  %3848 = vpow2.f32 %v2070_v41  ;;  %v2078_v58 = vmul.f32 1.442695, %v2042_v62  ;;  %v4944_v29 = vpop.f32.mrf.mxu1 }
 0x260   :  { %v2053_v14 = vsub.f32 %v4824_v8, %v4920_v13  ;;  %3850 = vpow2.f32 %v2072_v47  ;;  %v2080_v49 = vmul.f32 1.442695, %v2043_v17  ;;  %v1772_v19 = vmax.f32 %v1770_v57, %v1771_v50 }
 0x261   :  { %3852 = vpow2.f32 %v2074_v3  ;;  %v2082_v21 = vmul.f32 1.442695, %v2044_v22  ;;  %v2084_v30 = vmul.f32 1.442695, %v2045_v34  ;;  %v2086_v2 = vmul.f32 1.442695, %v2046_v12 }
 0x262   :  { %3854 = vpow2.f32 %v2076_v45  ;;  %v2088_v18 = vmul.f32 1.442695, %v2047_v37  ;;  %v2090_v60 = vmul.f32 1.442695, %v2048_v33  ;;  %v2092_v63 = vmul.f32 1.442695, %v2049_v24 }
 0x263   :  { %3856 = vpow2.f32 %v2078_v58  ;;  %v2094_v15 = vmul.f32 1.442695, %v2050_v4  ;;  %v1778_v7 = vrot.slane %v1777_v11, 2  ;;  %v1784_v51 = vmax.f32 %v1782_v1, %v4893_v10 }
 0x264   :  { %3858 = vpow2.f32 %v2080_v49  ;;  %v2096_v8 = vmul.f32 1.442695, %v2051_v44  ;;  %v1792_v57 = vsel %vm1673_vm9, %v4895_v25, -inf  ;;  %v1791_v38 = vsel %vm1673_vm9, %v4902_v16, -inf }
 0x265   :  { %3860 = vpow2.f32 %v2082_v21  ;;  %v1779_v32 = vmax.f32 %v1777_v11, %v1778_v7  ;;  %v1785_v31 = vrot.slane %v1784_v51, 4  ;;  %v1793_v26 = vmax.f32 %v1791_v38, %v1792_v57 }
 0x266   :  { %3862 = vpow2.f32 %v2084_v30  ;;  %v1801_v54 = vsel %vm1673_vm9, %v4910_v28, -inf  ;;  %v1800_v10 = vsel %vm1673_vm9, %v4926_v61, -inf  ;;  %v1809_v1 = vsel %vm1673_vm9, %v4944_v29, -inf }
 0x267   :  { %3864 = vpow2.f32 %v2086_v2  ;;  %v1786_v59 = vmax.f32 %v1784_v51, %v1785_v31  ;;  %v1794_v48 = vrot.slane %v1793_v26, 4  ;;  %v1810_v13 = vsel %vm1673_vm9, %v4939_v40, -inf }
 0x268   :  { %3866 = vpow2.f32 %v2088_v18  ;;  %v1780_v11 = vrot.slane %v1779_v32, 1  ;;  %v1802_v62 = vmax.f32 %v1800_v10, %v1801_v54  ;;  %v1811_v50 = vmax.f32 %v1809_v1, %v1810_v13 }
 0x269   :  { %3868 = vpow2.f32 %v2090_v60  ;;  %v2098_v17 = vmul.f32 1.442695, %v2052_v56  ;;  %v1787_v22 = vrot.slane %v1786_v59, 2  ;;  %v1795_v34 = vmax.f32 %v1793_v26, %v1794_v48 }
 0x26a   :  { %3870 = vpow2.f32 %v2092_v63  ;;  %v2100_v12 = vmul.f32 1.442695, %v2053_v14  ;;  %v1803_v37 = vrot.slane %v1802_v62, 4  ;;  %v1812_v33 = vrot.slane %v1811_v50, 4 }
 0x26b   :  { %3872 = vpow2.f32 %v2094_v15  ;;  %v1842_v24 = vsel %vm895_vm2, %v1772_v19, %v4924_v35  ;;  %v1788_v41 = vmax.f32 %v1786_v59, %v1787_v22  ;;  %v1796_v4 = vrot.slane %v1795_v34, 2 }
 0x26c   :  { %v4960_v47 = vpop.eup %3848  ;;  %3874 = vpow2.f32 %v2096_v8  ;;  %v1781_v3 = vmax.f32 %v1779_v32, %v1780_v11  ;;  %v1804_v45 = vmax.f32 %v1802_v62, %v1803_v37  ;;  %v1813_v44 = vmax.f32 %v1811_v50, %v1812_v33 }
 0x26d   :  { %v4962_v58 = vpop.eup %3850  ;;  %3876 = vpow2.f32 %v2098_v17  ;;  %v2134_v56 = vsel %vm1673_vm9, %v4960_v47, 0.0  ;;  %v1789_v14 = vrot.slane %v1788_v41, 1  ;;  %v1797_v49 = vmax.f32 %v1795_v34, %v1796_v4 }
 0x26e   :  { %v4966_v21 = vpop.eup %3852  ;;  %3878 = vpow2.f32 %v2100_v12  ;;  %v2135_v35 = vsel %vm1673_vm9, %v4962_v58, 0.0  ;;  %v1805_v19 = vrot.slane %v1804_v45, 2  ;;  %v1814_v30 = vrot.slane %v1813_v44, 2 }
 0x26f   :  { %v4970_v2 = vpop.eup %3854  ;;  %v2136_v18 = vadd.f32 %v2135_v35, %v2134_v56  ;;  %v2143_v60 = vsel %vm1673_vm9, %v4966_v21, 0.0  ;;  %v1790_v63 = vmax.f32 %v1788_v41, %v1789_v14  ;;  %v1798_v15 = vrot.slane %v1797_v49, 1 }
 0x270   :  { %v4974_v7 = vpop.eup %3856  ;;  %v2144_v51 = vsel %vm1673_vm9, %v4970_v2, 0.0  ;;  %v1843_v8 = vsel %vm898_vm3, %v1781_v3, %v1842_v24  ;;  %v1806_v57 = vmax.f32 %v1804_v45, %v1805_v19  ;;  %v1815_v38 = vmax.f32 %v1813_v44, %v1814_v30 }
 0x271   :  { %v4979_v32 = vpop.eup %3858  ;;  %v2137_v31 = vrot.slane %v2136_v18, 4  ;;  %v2145_v26 = vadd.f32 %v2144_v51, %v2143_v60  ;;  %v2152_v54 = vsel %vm1673_vm9, %v4974_v7, 0.0  ;;  %v1844_v10 = vsel %vm901_vm4, %v1790_v63, %v1843_v8 }
 0x272   :  { %v4984_v1 = vpop.eup %3860  ;;  %v2153_v59 = vsel %vm1673_vm9, %v4979_v32, 0.0  ;;  %v1799_v48 = vmax.f32 %v1797_v49, %v1798_v15  ;;  %v1807_v13 = vrot.slane %v1806_v57, 1  ;;  %v1816_v11 = vrot.slane %v1815_v38, 1 }
 0x273   :  { %v4988_v62 = vpop.eup %3862  ;;  %v2138_v50 = vadd.f32 %v2137_v31, %v2136_v18  ;;  %v2146_v17 = vrot.slane %v2145_v26, 4  ;;  %v2154_v22 = vadd.f32 %v2153_v59, %v2152_v54  ;;  %v2161_v34 = vsel %vm1673_vm9, %v4984_v1, 0.0 }
 0x274   :  { %v4992_v12 = vpop.eup %3864  ;;  %v2162_v37 = vsel %vm1673_vm9, %v4988_v62, 0.0  ;;  %v1845_v33 = vsel %vm904_vm5, %v1799_v48, %v1844_v10  ;;  %v1808_v24 = vmax.f32 %v1806_v57, %v1807_v13  ;;  %v1817_v41 = vmax.f32 %v1815_v38, %v1816_v11 }
 0x275   :  { %v4997_v4 = vpop.eup %3866  ;;  %v2139_v3 = vrot.slane %v2138_v50, 2  ;;  %v2147_v45 = vadd.f32 %v2146_v17, %v2145_v26  ;;  %v2155_v44 = vrot.slane %v2154_v22, 4  ;;  %v2163_v56 = vadd.f32 %v2162_v37, %v2161_v34 }
 0x276   :  { %v4999_v14 = vpop.eup %3868  ;;  %3880 = vpow2.f32 %v4897_v52  ;;  %v2170_v49 = vsel %vm1673_vm9, %v4992_v12, 0.0  ;;  %v2171_v35 = vsel %vm1673_vm9, %v4997_v4, 0.0  ;;  %v1846_v19 = vsel %vm907_vm6, %v1808_v24, %v1845_v33 }
 0x277   :  { %v5007_v30 = vpop.eup %3870  ;;  %v2140_v18 = vadd.f32 %v2139_v3, %v2138_v50  ;;  %v2148_v60 = vrot.slane %v2147_v45, 2  ;;  %v2156_v63 = vadd.f32 %v2155_v44, %v2154_v22  ;;  %v2164_v15 = vrot.slane %v2163_v56, 4 }
 0x278   :  { %5429 = vst [vmem:[#allocation25_spill] sm:$0xff] %v5007_v30  ;;  %v5009_v51 = vpop.eup %3872  ;;  %v2172_v8 = vadd.f32 %v2171_v35, %v2170_v49  ;;  %v2179_v52 = vsel %vm1673_vm9, %v4999_v14, 0.0  ;;  %v2180_v57 = vsel %vm1673_vm9, %v5007_v30, 0.0  ;;  %v1847_v38 = vsel %vm910_vm7, %v1817_v41, %v1846_v19 }
 0x279   :  { %v5016_v31 = vpop.eup %3874  ;;  %v2141_v26 = vrot.slane %v2140_v18, 1  ;;  %v2149_v54 = vadd.f32 %v2148_v60, %v2147_v45  ;;  %v2157_v10 = vrot.slane %v2156_v63, 2  ;;  %v2165_v59 = vadd.f32 %v2164_v15, %v2163_v56 }
 0x27a   :  { %v5018_v48 = vpop.eup %3876  ;;  %v2173_v13 = vrot.slane %v2172_v8, 4  ;;  %v2181_v11 = vadd.f32 %v2180_v57, %v2179_v52  ;;  %v2188_v50 = vsel %vm1673_vm9, %v5009_v51, 0.0  ;;  %v2189_v17 = vsel %vm1673_vm9, %v5016_v31, 0.0 }
 0x27b   :  { %5430 = vst [vmem:[#allocation27_spill] sm:$0xff] %v5018_v48  ;;  %v5024_v22 = vpop.eup %3878  ;;  %v2142_v34 = vadd.f32 %v2141_v26, %v2140_v18  ;;  %v2150_v37 = vrot.slane %v2149_v54, 1  ;;  %v2158_v33 = vadd.f32 %v2157_v10, %v2156_v63  ;;  %v2166_v24 = vrot.slane %v2165_v59, 2 }
 0x27c   :  { %v2174_v41 = vadd.f32 %v2173_v13, %v2172_v8  ;;  %v2182_v3 = vrot.slane %v2181_v11, 4  ;;  %v2190_v45 = vadd.f32 %v2189_v17, %v2188_v50  ;;  %v2197_v44 = vsel %vm1673_vm9, %v5018_v48, 0.0 }
 0x27d   :  { %v2151_v56 = vadd.f32 %v2150_v37, %v2149_v54  ;;  %v2159_v49 = vrot.slane %v2158_v33, 1  ;;  %v2167_v35 = vadd.f32 %v2166_v24, %v2165_v59  ;;  %v2198_v19 = vsel %vm1673_vm9, %v5024_v22, 0.0 }
 0x27e   :  { %v2175_v60 = vrot.slane %v2174_v41, 2  ;;  %v2183_v15 = vadd.f32 %v2182_v3, %v2181_v11  ;;  %v2191_v52 = vrot.slane %v2190_v45, 4  ;;  %v2199_v57 = vadd.f32 %v2198_v19, %v2197_v44 }
 0x27f   :  { %v2160_v18 = vadd.f32 %v2159_v49, %v2158_v33  ;;  %v2168_v26 = vrot.slane %v2167_v35, 1  ;;  %v2294_v63 = vsel %vm892_vm1, %v2151_v56, %v2142_v34  ;;  %v1851_v8 = vmax.f32 %v4764_v53, %v1847_v38 }
 0x280   :  { %v2176_v10 = vadd.f32 %v2175_v60, %v2174_v41  ;;  %v2184_v13 = vrot.slane %v2183_v15, 2  ;;  %v2192_v50 = vadd.f32 %v2191_v52, %v2190_v45  ;;  %v2200_v17 = vrot.slane %v2199_v57, 4 }
 0x281   :  { %v2169_v54 = vadd.f32 %v2168_v26, %v2167_v35  ;;  %v2295_v59 = vsel %vm895_vm2, %v2160_v18, %v2294_v63  ;;  %v1909_v37 = vcombine.high %v1851_v8, %v1851_v8  ;;  %v1916_v34 = vrot.slane %v1851_v8, %v4633_v36 }
 0x282   :  { %v2177_v24 = vrot.slane %v2176_v10, 1  ;;  %v2185_v48 = vadd.f32 %v2184_v13, %v2183_v15  ;;  %v2193_v30 = vrot.slane %v2192_v50, 2  ;;  %v2201_v11 = vadd.f32 %v2200_v17, %v2199_v57 }
 0x283   :  { %v5033_v3 = vpop.eup %3880  ;;  %v2296_v33 = vsel %vm898_vm3, %v2169_v54, %v2295_v59  ;;  %v1923_v38 = vrot.slane %v1909_v37, %v4633_v36  ;;  %v1853_v49 = vsub.f32 %v4764_v53, %v1851_v8  ;;  %v1924_v35 = vcombine.high %v1916_v34, %v1916_v34 }
 0x284   :  { %v2178_v41 = vadd.f32 %v2177_v24, %v2176_v10  ;;  %v2186_v44 = vrot.slane %v2185_v48, 1  ;;  %v2194_v45 = vadd.f32 %v2193_v30, %v2192_v50  ;;  %v2202_v56 = vrot.slane %v2201_v11, 2 }
 0x285   :  { %v1932_v19 = vrot.slane %v1916_v34, %v4633_v36  ;;  %v1925_v18 = vcombine.high %v1923_v38, %v1923_v38  ;;  %v1946_v26 = vrot.slane %v1924_v35, %v4633_v36  ;;  %v1856_v50 = vmul.f32 1.442695, %v1853_v49 }
 0x286   :  { %v2187_v60 = vadd.f32 %v2186_v44, %v2185_v48  ;;  %v2195_v15 = vrot.slane %v2194_v45, 1  ;;  %v2203_v52 = vadd.f32 %v2202_v56, %v2201_v11  ;;  %v2297_v57 = vsel %vm901_vm4, %v2178_v41, %v2296_v33 }
 0x287   :  { %v1954_v63 = vcombine.high %v1932_v19, %v1932_v19  ;;  %v1993_v30 = vrot.slane %v1932_v19, %v4650_v43  ;;  %v1956_v53 = vcombine.high %v1946_v26, %v1946_v26  ;;  %v1997_v8 = vrot.slane %v1946_v26, %v4650_v43 }
 0x288   :  { %v2196_v13 = vadd.f32 %v2195_v15, %v2194_v45  ;;  %v2204_v17 = vrot.slane %v2203_v52, 1  ;;  %v2298_v10 = vsel %vm904_vm5, %v2187_v60, %v2297_v57  ;;  %v1939_v59 = vrot.slane %v1923_v38, %v4633_v36 }
 0x289   :  { %v2001_v37 = vrot.slane %v1954_v63, %v4650_v43  ;;  %v1953_v11 = vrot.slane %v1925_v18, %v4633_v36  ;;  %v2005_v33 = vrot.slane %v1956_v53, %v4650_v43  ;;  %v2054_v34 = vsub.f32 %v4834_v27, %v1993_v30 }
 0x28a   :  { %v2205_v54 = vadd.f32 %v2204_v17, %v2203_v52  ;;  %v2299_v48 = vsel %vm907_vm6, %v2196_v13, %v2298_v10  ;;  %v2055_v44 = vsub.f32 %v4832_v20, %v1993_v30  ;;  %v2056_v45 = vsub.f32 %v4851_v23, %v1997_v8 }
 0x28b   :  { %v2057_v56 = vsub.f32 %v4845_v46, %v1997_v8  ;;  %3882 = vpow2.f32 %v1856_v50  ;;  %v1955_v38 = vcombine.high %v1939_v59, %v1939_v59  ;;  %v2009_v49 = vrot.slane %v1939_v59, %v4650_v43 }
 0x28c   :  { %v2300_v24 = vsel %vm910_vm7, %v2205_v54, %v2299_v48  ;;  %v2058_v35 = vsub.f32 %v4865_v42, %v2001_v37  ;;  %v2059_v19 = vsub.f32 %v4861_v0, %v2001_v37  ;;  %v1957_v60 = vcombine.high %v1953_v11, %v1953_v11 }
 0x28d   :  { %v2310_v41 = vadd.f32 %v5033_v3, %v2300_v24  ;;  %v2013_v27 = vrot.slane %v1953_v11, %v4650_v43  ;;  %v2060_v15 = vsub.f32 %v4876_v9, %v2005_v33  ;;  %v2102_v52 = vmul.f32 1.442695, %v2054_v34 }
 0x28e   :  { %v2061_v20 = vsub.f32 %v4872_v5, %v2005_v33  ;;  %v2104_v23 = vmul.f32 1.442695, %v2055_v44  ;;  %v2106_v57 = vmul.f32 1.442695, %v2056_v45  ;;  %v2108_v46 = vmul.f32 1.442695, %v2057_v56 }
 0x28f   :  { %3884 = vrcp.f32 %v2310_v41  ;;  %v2017_v18 = vrot.slane %v1955_v38, %v4650_v43  ;;  %v2062_v26 = vsub.f32 %v4887_v55, %v2009_v49  ;;  %v2110_v42 = vmul.f32 1.442695, %v2058_v35 }
 0x290   :  { %3886 = vpow2.f32 %v2102_v52  ;;  %v2063_v63 = vsub.f32 %v4883_v39, %v2009_v49  ;;  %v2112_v0 = vmul.f32 1.442695, %v2059_v19  ;;  %v2021_v13 = vrot.slane %v1957_v60, %v4650_v43 }
 0x291   :  { %3888 = vpow2.f32 %v2104_v23  ;;  %v2064_v9 = vsub.f32 %v4902_v16, %v2013_v27  ;;  %v2114_v17 = vmul.f32 1.442695, %v2060_v15  ;;  %v2065_v5 = vsub.f32 %v4895_v25, %v2013_v27 }
 0x292   :  { %3890 = vpow2.f32 %v2106_v57  ;;  %v2116_v10 = vmul.f32 1.442695, %v2061_v20  ;;  %v2066_v30 = vsub.f32 %v4926_v61, %v2017_v18  ;;  %v2118_v55 = vmul.f32 1.442695, %v2062_v26 }
 0x293   :  { %3892 = vpow2.f32 %v2108_v46  ;;  %v2067_v50 = vsub.f32 %v4910_v28, %v2017_v18  ;;  %v2120_v39 = vmul.f32 1.442695, %v2063_v63  ;;  %v2068_v53 = vsub.f32 %v4944_v29, %v2021_v13 }
 0x294   :  { %3894 = vpow2.f32 %v2110_v42  ;;  %v2069_v8 = vsub.f32 %v4939_v40, %v2021_v13  ;;  %v2122_v16 = vmul.f32 1.442695, %v2064_v9  ;;  %v2124_v54 = vmul.f32 1.442695, %v2065_v5 }
 0x295   :  { %3896 = vpow2.f32 %v2112_v0  ;;  %v2126_v25 = vmul.f32 1.442695, %v2066_v30  ;;  %v2128_v61 = vmul.f32 1.442695, %v2067_v50  ;;  %v2130_v37 = vmul.f32 1.442695, %v2068_v53 }
 0x296   :  { %3898 = vpow2.f32 %v2114_v17  ;;  %v2132_v28 = vmul.f32 1.442695, %v2069_v8 }
 0x297   :  { %3900 = vpow2.f32 %v2116_v10 }
 0x298   :  { %3902 = vpow2.f32 %v2118_v55  ;;  %v5072_v48 = vpop.eup %3882 }
 0x299   :  { %3904 = vpow2.f32 %v2120_v39 }
 0x29a   :  { %3906 = vpow2.f32 %v2122_v16 }
 0x29b   :  { %3908 = vpow2.f32 %v2124_v54 }
 0x29c   :  { %v3885_v59 = vpop.eup %3884  ;;  %3910 = vpow2.f32 %v2126_v25 }
 0x29d   :  { %v2315_v24 = vmul.f32 %v3885_v59, %v5033_v3  ;;  %v2411_v29 = vrot.slane %v3885_v59, %v4633_v36  ;;  %v2404_v40 = vcombine.high %v3885_v59, %v3885_v59  ;;  %v5076_v11 = vpop.eup %3886  ;;  %3912 = vpow2.f32 %v2128_v61 }
 0x29e   :  { %v5083_v44 = vpop.eup %3888  ;;  %3914 = vpow2.f32 %v2130_v37  ;;  %v2206_v3 = vsel %vm1673_vm9, %v5076_v11, 0.0 }
 0x29f   :  { %3767 = vmatprep.mubr.msk.f32.mxu0 %vm1673_vm9, %v2315_v24  ;;  %v2427_v33 = vrot.slane %v2411_v29, %v4633_v36  ;;  %v2419_v34 = vcombine.high %v2411_v29, %v2411_v29  ;;  %v5081_v41 = vrot.slane %v2404_v40, %v4633_v36  ;;  %v5087_v45 = vpop.eup %3890  ;;  %3916 = vpow2.f32 %v2132_v28 }
 0x2a0   :  { %v2207_v56 = vsel %vm1673_vm9, %v5083_v44, 0.0  ;;  %v5093_v35 = vpop.eup %3892  ;;  %v2215_v60 = vsel %vm1673_vm9, %v5087_v45, 0.0 }
 0x2a1   :  { %v2505_v38 = vrot.slane %v2427_v33, %v4650_v43  ;;  %v2441_v49 = vrot.slane %v2419_v34, %v4633_v36  ;;  %v2208_v19 = vadd.f32 %v2207_v56, %v2206_v3  ;;  %v2449_v27 = vcombine.high %v2427_v33, %v2427_v33  ;;  %v5101_v52 = vpop.eup %3894 }
 0x2a2   :  { %v5099_v15 = vrot.slane %v5081_v41, %v4633_v36  ;;  %v2216_v20 = vsel %vm1673_vm9, %v5093_v35, 0.0  ;;  %v5112_v18 = vpop.eup %3896  ;;  %v2224_v63 = vsel %vm1673_vm9, %v5101_v52, 0.0 }
 0x2a3   :  { %v5106_v23 = vmul.f32 %v4960_v47, %v2505_v38  ;;  %v5109_v57 = vmul.f32 %v4962_v58, %v2505_v38  ;;  %v2509_v46 = vrot.slane %v2441_v49, %v4650_v43  ;;  %v2209_v26 = vrot.slane %v2208_v19, 4  ;;  %v5117_v13 = vpop.eup %3898 }
 0x2a4   :  { %v2217_v42 = vadd.f32 %v2216_v20, %v2215_v60  ;;  %v2513_v0 = vrot.slane %v2449_v27, %v4650_v43  ;;  %v2225_v47 = vsel %vm1673_vm9, %v5112_v18, 0.0  ;;  %v2451_v17 = vcombine.high %v2441_v49, %v2441_v49  ;;  %v5127_v5 = vpop.eup %3900 }
 0x2a5   :  { %v5122_v9 = vmul.f32 %v4966_v21, %v2509_v46  ;;  %v5125_v58 = vmul.f32 %v4970_v2, %v2509_v46  ;;  %v2210_v10 = vadd.f32 %v2209_v26, %v2208_v19  ;;  %v2226_v55 = vadd.f32 %v2225_v47, %v2224_v63  ;;  %v5131_v39 = vpop.eup %3902 }
 0x2a6   :  { %v2218_v30 = vrot.slane %v2217_v42, 4  ;;  %v2233_v50 = vsel %vm1673_vm9, %v5117_v13, 0.0  ;;  %v2234_v53 = vsel %vm1673_vm9, %v5127_v5, 0.0  ;;  %v5136_v21 = vmul.f32 %v4974_v7, %v2513_v0  ;;  %v5142_v16 = vpop.eup %3904 }
 0x2a7   :  { %v5139_v2 = vmul.f32 %v4979_v32, %v2513_v0  ;;  %v2517_v8 = vrot.slane %v2451_v17, %v4650_v43  ;;  %v2211_v54 = vrot.slane %v2210_v10, 2  ;;  %v2227_v61 = vrot.slane %v2226_v55, 4  ;;  %v5144_v37 = vpop.eup %3906 }
 0x2a8   :  { %v2219_v25 = vadd.f32 %v2218_v30, %v2217_v42  ;;  %v2235_v59 = vadd.f32 %v2234_v53, %v2233_v50  ;;  %v2242_v28 = vsel %vm1673_vm9, %v5131_v39, 0.0  ;;  %v2243_v7 = vsel %vm1673_vm9, %v5142_v16, 0.0  ;;  %v5156_v29 = vpop.eup %3908 }
 0x2a9   :  { %v5151_v24 = vmul.f32 %v4984_v1, %v2517_v8  ;;  %v5154_v32 = vmul.f32 %v4988_v62, %v2517_v8  ;;  %v2212_v40 = vadd.f32 %v2211_v54, %v2210_v10  ;;  %v2228_v34 = vadd.f32 %v2227_v61, %v2226_v55  ;;  %v5158_v56 = vpop.eup %3910 }
 0x2aa   :  { %v2220_v33 = vrot.slane %v2219_v25, 2  ;;  %v2236_v3 = vrot.slane %v2235_v59, 4  ;;  %v2244_v38 = vadd.f32 %v2243_v7, %v2242_v28  ;;  %v2251_v49 = vsel %vm1673_vm9, %v5144_v37, 0.0  ;;  %v5166_v62 = vpop.eup %3912 }
 0x2ab   :  { %v2252_v19 = vsel %vm1673_vm9, %v5156_v29, 0.0  ;;  %v2521_v1 = vrot.slane %v5099_v15, %v4650_v43  ;;  %v2213_v60 = vrot.slane %v2212_v40, 1  ;;  %v2229_v20 = vrot.slane %v2228_v34, 2  ;;  %v5168_v26 = vpop.eup %3914 }
 0x2ac   :  { %v2221_v27 = vadd.f32 %v2220_v33, %v2219_v25  ;;  %v2237_v46 = vadd.f32 %v2236_v3, %v2235_v59  ;;  %v2245_v42 = vrot.slane %v2244_v38, 4  ;;  %v2253_v63 = vadd.f32 %v2252_v19, %v2251_v49  ;;  %v5174_v17 = vpop.eup %3916 }
 0x2ad   :  { %v2260_v0 = vsel %vm1673_vm9, %v5158_v56, 0.0  ;;  %v2261_v47 = vsel %vm1673_vm9, %v5166_v62, 0.0  ;;  %v2214_v10 = vadd.f32 %v2213_v60, %v2212_v40  ;;  %v2230_v55 = vadd.f32 %v2229_v20, %v2228_v34 }
 0x2ae   :  { %v2222_v30 = vrot.slane %v2221_v27, 1  ;;  %v2238_v50 = vrot.slane %v2237_v46, 2  ;;  %v2246_v53 = vadd.f32 %v2245_v42, %v2244_v38  ;;  %v2254_v8 = vrot.slane %v2253_v63, 4 }
 0x2af   :  { %v2262_v54 = vadd.f32 %v2261_v47, %v2260_v0  ;;  %v2269_v25 = vsel %vm1673_vm9, %v5168_v26, 0.0  ;;  %v2231_v59 = vrot.slane %v2230_v55, 1  ;;  %v2270_v7 = vsel %vm1673_vm9, %v5174_v17, 0.0 }
 0x2b0   :  { %v2223_v61 = vadd.f32 %v2222_v30, %v2221_v27  ;;  %v2239_v28 = vadd.f32 %v2238_v50, %v2237_v46  ;;  %v2247_v33 = vrot.slane %v2246_v53, 2  ;;  %v2255_v3 = vadd.f32 %v2254_v8, %v2253_v63 }
 0x2b1   :  { %v2263_v49 = vrot.slane %v2262_v54, 4  ;;  %v2271_v19 = vadd.f32 %v2270_v7, %v2269_v25  ;;  %v2232_v40 = vadd.f32 %v2231_v59, %v2230_v55  ;;  %v2590_v38 = vmul.f32 %v4992_v12, %v2521_v1 }
 0x2b2   :  { %v2240_v60 = vrot.slane %v2239_v28, 1  ;;  %v2301_v34 = vsel %vm892_vm1, %v2223_v61, %v2214_v10  ;;  %v2248_v20 = vadd.f32 %v2247_v33, %v2246_v53  ;;  %v2256_v42 = vrot.slane %v2255_v3, 2 }
 0x2b3   :  { %v2264_v0 = vadd.f32 %v2263_v49, %v2262_v54  ;;  %v2272_v47 = vrot.slane %v2271_v19, 4  ;;  %v2302_v46 = vsel %vm895_vm2, %v2232_v40, %v2301_v34  ;;  %v2591_v30 = vmul.f32 %v4997_v4, %v2521_v1 }
 0x2b4   :  { %v2241_v27 = vadd.f32 %v2240_v60, %v2239_v28  ;;  %v2420_v63 = vcombine.high %v5081_v41, %v5081_v41  ;;  %v2249_v50 = vrot.slane %v2248_v20, 1  ;;  %v2257_v8 = vadd.f32 %v2256_v42, %v2255_v3 }
 0x2b5   :  { %v2265_v55 = vrot.slane %v2264_v0, 2  ;;  %v2273_v25 = vadd.f32 %v2272_v47, %v2271_v19  ;;  %v2450_v53 = vcombine.high %v5099_v15, %v5099_v15 }
 0x2b6   :  { %v2303_v10 = vsel %vm898_vm3, %v2241_v27, %v2302_v46  ;;  %v2448_v12 = vrot.slane %v2420_v63, %v4633_v36  ;;  %v2250_v54 = vadd.f32 %v2249_v50, %v2248_v20  ;;  %v2258_v61 = vrot.slane %v2257_v8, 1 }
 0x2b7   :  { %v2266_v59 = vadd.f32 %v2265_v55, %v2264_v0  ;;  %v2274_v28 = vrot.slane %v2273_v25, 2  ;;  %v2529_v4 = vrot.slane %v2450_v53, %v4650_v43 }
 0x2b8   :  { %v2452_v1 = vcombine.high %v2448_v12, %v2448_v12  ;;  %v2259_v7 = vadd.f32 %v2258_v61, %v2257_v8  ;;  %v2304_v3 = vsel %vm901_vm4, %v2250_v54, %v2303_v10 }
 0x2b9   :  { %v2267_v41 = vrot.slane %v2266_v59, 1  ;;  %v2275_v33 = vadd.f32 %v2274_v28, %v2273_v25  ;;  %v2594_v49 = vmul.f32 %v5009_v51, %v2529_v4  ;;  %v2595_v19 = vmul.f32 %v5016_v31, %v2529_v4 }
 0x2ba   :  { %v2305_v15 = vsel %vm904_vm5, %v2259_v7, %v2304_v3  ;;  %v2533_v34 = vrot.slane %v2452_v1, %v4650_v43  ;;  %v5278_v3 = vpop.permute.xlu1 %3017 }
 0x2bb   :  { %v2268_v40 = vadd.f32 %v2267_v41, %v2266_v59  ;;  %v2276_v60 = vrot.slane %v2275_v33, 1 }
 0x2bc   :  { %v2597_v0 = vmul.f32 %v5024_v22, %v2533_v34 }
 0x2bd   :  { %v2277_v20 = vadd.f32 %v2276_v60, %v2275_v33  ;;  %v2306_v42 = vsel %vm907_vm6, %v2268_v40, %v2305_v15  ;;  %v3281_v33 = vld [vmem:[#allocation8] sm:$0xff] }
 0x2bf   :  { %v2307_v47 = vsel %vm910_vm7, %v2277_v20, %v2306_v42 }
 0x2c0   :  { %v2311_v27 = vadd.f32 %v5072_v48, %v2307_v47 }
 0x2c2   :  { %3918 = vrcp.f32 %v2311_v27 }
 0x2cf   :  { %v3919_v46 = vpop.eup %3918 }
 0x2d0   :  { %v2316_v51 = vmul.f32 %v3919_v46, %v5072_v48  ;;  %v2460_v22 = vrot.slane %v3919_v46, %v4633_v36  ;;  %v5431_v48 = vld [vmem:[#allocation25_spill] sm:$0xff] }
 0x2d2   :  { %3768 = vmatmul.mubr.msk.f32.vlgmr.msra.gmra.mxu0 %vm1673_vm9, %v2316_v51 }
 0x2d3   :  { %3771 = vmatpush3.msk.msra.mxu0 %vm2323_vm10, %v4839_v6  ;;  %3772 = vmatprep.mubr.msk.f32.mxu0 %vm1673_vm9, %v5106_v23  ;;  %v2525_v6 = vrot.slane %v2448_v12, %v4650_v43 }
 0x2d5   :  { %v2592_v31 = vmul.f32 %v4999_v14, %v2525_v6  ;;  %v2593_v23 = vmul.f32 %v5431_v48, %v2525_v6 }
 0x2d6   :  { %3773 = vmatmul.mubr.msk.f32.vlgmr.msra.gmra.mxu0 %vm1673_vm9, %v5109_v57  ;;  %v2476_v57 = vrot.slane %v2460_v22, %v4633_v36 }
 0x2d7   :  { %3775 = vmatprep.mubr.msk.f32.mxu0 %vm1673_vm9, %v5122_v9  ;;  %v2468_v9 = vcombine.high %v2460_v22, %v2460_v22 }
 0x2d9   :  { %v2490_v14 = vrot.slane %v2468_v9, %v4633_v36 }
 0x2da   :  { %3776 = vmatmul.mubr.msk.f32.gmra.mxu0 %vm1673_vm9, %v5125_v58  ;;  %v5432_v58 = vld [vmem:[#allocation27_spill] sm:$0xff] }
 0x2db   :  { %3778 = vmatprep.mubr.msk.f32.mxu0 %vm1673_vm9, %v5136_v21  ;;  %v2596_v21 = vmul.f32 %v5432_v58, %v2533_v34  ;;  %v2500_v55 = vcombine.high %v2490_v14, %v2490_v14 }
 0x2dd   :  { %v2549_v12 = vrot.slane %v2500_v55, %v4650_v43 }
 0x2de   :  { %3779 = vmatmul.mubr.msk.f32.gmra.mxu0 %vm1673_vm9, %v5139_v2  ;;  %v2537_v2 = vrot.slane %v2476_v57, %v4650_v43 }
 0x2df   :  { %3781 = vmatprep.mubr.msk.f32.mxu0 %vm1673_vm9, %v5151_v24  ;;  %v2604_v54 = vmul.f32 %v5117_v13, %v2549_v12 }
 0x2e0   :  { %v2598_v24 = vmul.f32 %v5076_v11, %v2537_v2  ;;  %v2599_v63 = vmul.f32 %v5083_v44, %v2537_v2 }
 0x2e2   :  { %3782 = vmatmul.mubr.msk.f32.gmra.mxu0 %vm1673_vm9, %v5154_v32  ;;  %v2541_v32 = vrot.slane %v2490_v14, %v4650_v43 }
 0x2e3   :  { %3784 = vmatprep.mubr.msk.f32.mxu0 %vm1673_vm9, %v2590_v38  ;;  %v2498_v38 = vcombine.high %v2476_v57, %v2476_v57 }
 0x2e4   :  { %v2600_v50 = vmul.f32 %v5087_v45, %v2541_v32  ;;  %v2601_v11 = vmul.f32 %v5093_v35, %v2541_v32  ;;  %v2605_v35 = vmul.f32 %v5127_v5, %v2549_v12 }
 0x2e5   :  { %v2545_v8 = vrot.slane %v2498_v38, %v4650_v43 }
 0x2e6   :  { %3785 = vmatmul.mubr.msk.f32.gmra.mxu0 %vm1673_vm9, %v2591_v30  ;;  %v2453_v30 = vcombine.high %v3919_v46, %v3919_v46 }
 0x2e7   :  { %3787 = vmatprep.mubr.msk.f32.mxu0 %vm1673_vm9, %v2592_v31  ;;  %v2602_v10 = vmul.f32 %v5101_v52, %v2545_v8  ;;  %v2603_v45 = vmul.f32 %v5112_v18, %v2545_v8 }
 0x2e8   :  { %v2467_v25 = vrot.slane %v2453_v30, %v4633_v36 }
 0x2ea   :  { %3788 = vmatmul.mubr.msk.f32.gmra.mxu0 %vm1673_vm9, %v2593_v23  ;;  %v2483_v53 = vrot.slane %v2467_v25, %v4633_v36  ;;  %v2469_v44 = vcombine.high %v2467_v25, %v2467_v25 }
 0x2eb   :  { %3790 = vmatprep.mubr.msk.f32.mxu0 %vm1673_vm9, %v2594_v49 }
 0x2ec   :  { %v2553_v61 = vrot.slane %v2483_v53, %v4650_v43  ;;  %v2497_v59 = vrot.slane %v2469_v44, %v4633_v36  ;;  %v2499_v4 = vcombine.high %v2483_v53, %v2483_v53 }
 0x2ee   :  { %3791 = vmatmul.mubr.msk.f32.gmra.mxu0 %vm1673_vm9, %v2595_v19  ;;  %v2606_v52 = vmul.f32 %v5131_v39, %v2553_v61  ;;  %v2557_v28 = vrot.slane %v2497_v59, %v4650_v43  ;;  %v2607_v18 = vmul.f32 %v5142_v16, %v2553_v61  ;;  %v2561_v36 = vrot.slane %v2499_v4, %v4650_v43 }
 0x2ef   :  { %3793 = vmatprep.mubr.msk.f32.mxu0 %vm1673_vm9, %v2596_v21  ;;  %v2501_v1 = vcombine.high %v2497_v59, %v2497_v59 }
 0x2f0   :  { %v2608_v13 = vmul.f32 %v5144_v37, %v2557_v28  ;;  %v2609_v5 = vmul.f32 %v5156_v29, %v2557_v28  ;;  %v2610_v39 = vmul.f32 %v5158_v56, %v2561_v36  ;;  %v2611_v16 = vmul.f32 %v5166_v62, %v2561_v36  ;;  %v3284_v29 = vld [vmem:[#allocation8 + $0x18] sm:$0xff]  ;;  %v3282_v56 = vld [vmem:[#allocation8 + $0x8] sm:$0xff]  ;;  %v2978_v62 = vpop.permute.xlu0 %2977 }
 0x2f1   :  { %v2565_v7 = vrot.slane %v2501_v1, %v4650_v43  ;;  %3820 = vmatprep.subr.mxu1 %v3284_v29  ;;  %v3283_v43 = vld [vmem:[#allocation8 + $0x10] sm:$0xff] }
 0x2f2   :  { %3794 = vmatmul.mubr.msk.f32.gmra.mxu0 %vm1673_vm9, %v2597_v0  ;;  %3821 = vmatpush3.msra.mxu1 %v3284_v29 }
 0x2f3   :  { %3796 = vmatprep.mubr.msk.f32.mxu0 %vm1673_vm9, %v2598_v24  ;;  %v2612_v37 = vmul.f32 %v5168_v26, %v2565_v7  ;;  %v2613_v41 = vmul.f32 %v5174_v17, %v2565_v7  ;;  %3822 = vmatprep.subr.mxu1 %v3283_v43  ;;  %v2982_v17 = vpop.permute.xlu1 %2981 }
 0x2f4   :  { %3823 = vmatpush3.msra.mxu1 %v3283_v43  ;;  %v2976_v26 = vpop.permute.xlu0 %2975 }
 0x2f5   :  { %3824 = vmatprep.subr.mxu1 %v3282_v56 }
 0x2f6   :  { %3797 = vmatmul.mubr.msk.f32.gmra.mxu0 %vm1673_vm9, %v2599_v63  ;;  %3825 = vmatpush3.msra.mxu1 %v3282_v56 }
 0x2f7   :  { %3799 = vmatprep.mubr.msk.f32.mxu0 %vm1673_vm9, %v2600_v50  ;;  %3826 = vmatprep.subr.mxu1 %v3281_v33  ;;  %v5284_v40 = vpop.permute.xlu1 %3021 }
 0x2f8   :  { %3827 = vmatpush3.msra.mxu1 %v3281_v33  ;;  %v5280_v49 = vpop.permute.xlu0 %3015 }
 0x2fa   :  { %3800 = vmatmul.mubr.msk.f32.gmra.mxu0 %vm1673_vm9, %v2601_v11 }
 0x2fb   :  { %3802 = vmatprep.mubr.msk.f32.mxu0 %vm1673_vm9, %v2602_v10  ;;  %v2980_v15 = vpop.permute.xlu1 %2979 }
 0x2fc   :  { %v5282_v19 = vpop.permute.xlu0 %3019 }
 0x2fe   :  { %3803 = vmatmul.mubr.msk.f32.gmra.mxu0 %vm1673_vm9, %v2603_v45 }
 0x2ff   :  { %3805 = vmatprep.mubr.msk.f32.mxu0 %vm1673_vm9, %v2604_v54  ;;  %v2986_v20 = vpop.permute.xlu1 %2985 }
 0x300   :  { %v2984_v60 = vpop.permute.xlu0 %2983 }
 0x302   :  { %3806 = vmatmul.mubr.msk.f32.gmra.mxu0 %vm1673_vm9, %v2605_v35 }
 0x303   :  { %3808 = vmatprep.mubr.msk.f32.mxu0 %vm1673_vm9, %v2606_v52  ;;  %v5288_v0 = vpop.permute.xlu1 %3025 }
 0x304   :  { %v5286_v34 = vpop.permute.xlu0 %3023 }
 0x306   :  { %3809 = vmatmul.mubr.msk.f32.gmra.mxu0 %vm1673_vm9, %v2607_v18 }
 0x307   :  { %3811 = vmatprep.mubr.msk.f32.mxu0 %vm1673_vm9, %v2608_v13  ;;  %v2990_v27 = vpop.permute.xlu1 %2989 }
 0x308   :  { %v2988_v42 = vpop.permute.xlu0 %2987 }
 0x30a   :  { %3812 = vmatmul.mubr.msk.f32.gmra.mxu0 %vm1673_vm9, %v2609_v5 }
 0x30b   :  { %3814 = vmatprep.mubr.msk.f32.mxu0 %vm1673_vm9, %v2610_v39  ;;  %v5296_v31 = vpop.permute.xlu1 %3029 }
 0x30c   :  { %v5290_v47 = vpop.permute.xlu0 %3027 }
 0x30e   :  { %3815 = vmatmul.mubr.msk.f32.gmra.mxu0 %vm1673_vm9, %v2611_v16 }
 0x30f   :  { %3817 = vmatprep.mubr.msk.f32.mxu0 %vm1673_vm9, %v2612_v37  ;;  %v2994_v9 = vpop.permute.xlu1 %2993 }
 0x310   :  { %v2992_v51 = vpop.permute.xlu0 %2991 }
 0x312   :  { %3818 = vmatmul.mubr.msk.f32.gmra.mxu0 %vm1673_vm9, %v2613_v41 }
 0x313   :  { %v2998_v25 = vpop.permute.xlu1 %2997 }
 0x314   :  { %v2996_v23 = vpop.permute.xlu0 %2995 }
 0x317   :  { %v3002_v5 = vpop.permute.xlu1 %3001 }
 0x318   :  { %v3000_v38 = vpop.permute.xlu0 %2999 }
 0x31c   :  { %v3004_v28 = vpop.permute.xlu0 %3003 }
 0x392   :  { %v5292_v46 = vpop.f32.mrf.mxu0 }
 0x394   :  { %v5294_v6 = vpop.f32.mrf.mxu0 }
 0x396   :  { %v3774_v22 = vpop.f32.mrf.mxu0 }
 0x397   :  { %v3072_v30 = vmul.f32 %v3774_v22, %v2978_v62  ;;  %v3006_v22 = vpop.permute.xlu1 %3005 }
 0x398   :  { %v2776_v48 = vpop.f32.mrf.mxu0 }
 0x399   :  { %v3071_v14 = vmul.f32 %v2976_v26, %v2776_v48  ;;  %v3104_v45 = vsel %vm163_vm0, %v3072_v30, 0.0 }
 0x39a   :  { %v3777_v57 = vpop.f32.mrf.mxu0 }
 0x39b   :  { %v3074_v21 = vmul.f32 %v3777_v57, %v2982_v17  ;;  %v3103_v11 = vsel %vm163_vm0, %v3071_v14, 0.0  ;;  %v3008_v17 = vpop.permute.xlu0 %3007 }
 0x39c   :  { %v2786_v58 = vpop.f32.mrf.mxu0  ;;  %v3105_v59 = vadd.f32 %v3104_v45, %v3103_v11  ;;  %v3010_v45 = vpop.permute.xlu1 %3009 }
 0x39d   :  { %v3073_v2 = vmul.f32 %v2980_v15, %v2786_v58  ;;  %v3113_v8 = vsel %vm163_vm0, %v3074_v21, 0.0 }
 0x39e   :  { %v3780_v24 = vpop.f32.mrf.mxu0  ;;  %v3106_v16 = vrot.slane %v3105_v59, 4 }
 0x39f   :  { %v3112_v32 = vsel %vm163_vm0, %v3073_v2, 0.0  ;;  %v3076_v63 = vmul.f32 %v3780_v24, %v2986_v20 }
 0x3a0   :  { %v2796_v50 = vpop.f32.mrf.mxu0  ;;  %v3114_v10 = vadd.f32 %v3113_v8, %v3112_v32  ;;  %v3107_v20 = vadd.f32 %v3106_v16, %v3105_v59  ;;  %v3012_v8 = vpop.permute.xlu0 %3011 }
 0x3a1   :  { %v3075_v55 = vmul.f32 %v2984_v60, %v2796_v50  ;;  %v3122_v54 = vsel %vm163_vm0, %v3076_v63, 0.0 }
 0x3a2   :  { %v3783_v12 = vpop.f32.mrf.mxu0  ;;  %v3115_v4 = vrot.slane %v3114_v10, 4  ;;  %v3108_v30 = vrot.slane %v3107_v20, 2 }
 0x3a3   :  { %v3121_v53 = vsel %vm163_vm0, %v3075_v55, 0.0  ;;  %v3078_v44 = vmul.f32 %v3783_v12, %v2990_v27 }
 0x3a4   :  { %v2806_v61 = vpop.f32.mrf.mxu0  ;;  %v3123_v35 = vadd.f32 %v3122_v54, %v3121_v53  ;;  %v3116_v29 = vadd.f32 %v3115_v4, %v3114_v10 }
 0x3a5   :  { %v3077_v52 = vmul.f32 %v2988_v42, %v2806_v61  ;;  %v3131_v13 = vsel %vm163_vm0, %v3078_v44, 0.0 }
 0x3a6   :  { %v3786_v18 = vpop.f32.mrf.mxu0  ;;  %v3124_v37 = vrot.slane %v3123_v35, 4  ;;  %v3117_v48 = vrot.slane %v3116_v29, 2 }
 0x3a7   :  { %v3130_v36 = vsel %vm163_vm0, %v3077_v52, 0.0  ;;  %v3080_v1 = vmul.f32 %v3786_v18, %v2994_v9 }
 0x3a8   :  { %v3132_v39 = vadd.f32 %v3131_v13, %v3130_v36  ;;  %v2816_v7 = vpop.f32.mrf.mxu0  ;;  %v3125_v42 = vadd.f32 %v3124_v37, %v3123_v35  ;;  %v3118_v55 = vadd.f32 %v3117_v48, %v3116_v29  ;;  %v3109_v35 = vadd.f32 %v3108_v30, %v3107_v20  ;;  %v5314_v37 = vpop.permute.xlu0 %3031 }
 0x3a9   :  { %v3079_v41 = vmul.f32 %v2992_v51, %v2816_v7  ;;  %v3140_v62 = vsel %vm163_vm0, %v3080_v1, 0.0 }
 0x3aa   :  { %v3133_v43 = vrot.slane %v3132_v39, 4  ;;  %v3789_v56 = vpop.f32.mrf.mxu0  ;;  %v3126_v63 = vrot.slane %v3125_v42, 2  ;;  %v3119_v18 = vrot.slane %v3118_v55, 1 }
 0x3ab   :  { %v3139_v33 = vsel %vm163_vm0, %v3079_v41, 0.0  ;;  %v3082_v26 = vmul.f32 %v3789_v56, %v2998_v25 }
 0x3ac   :  { %v3141_v60 = vadd.f32 %v3140_v62, %v3139_v33  ;;  %v2826_v15 = vpop.f32.mrf.mxu0  ;;  %v3134_v57 = vadd.f32 %v3133_v43, %v3132_v39  ;;  %v3127_v52 = vadd.f32 %v3126_v63, %v3125_v42  ;;  %v3110_v62 = vrot.slane %v3109_v35, 1  ;;  %v5318_v30 = vpop.permute.xlu0 %3035 }
 0x3ad   :  { %v3081_v27 = vmul.f32 %v2996_v23, %v2826_v15  ;;  %v3149_v51 = vsel %vm163_vm0, %v3082_v26, 0.0  ;;  %v3014_v26 = vpop.permute.xlu1 %3013 }
 0x3ae   :  { %v3142_v9 = vrot.slane %v3141_v60, 4  ;;  %v3792_v58 = vpop.f32.mrf.mxu0  ;;  %v3135_v25 = vrot.slane %v3134_v57, 2  ;;  %v3128_v33 = vrot.slane %v3127_v52, 1 }
 0x3af   :  { %v3148_v21 = vsel %vm163_vm0, %v3081_v27, 0.0  ;;  %v3084_v2 = vmul.f32 %v3792_v58, %v3002_v5 }
 0x3b0   :  { %v3143_v14 = vadd.f32 %v3142_v9, %v3141_v60  ;;  %v3150_v24 = vadd.f32 %v3149_v51, %v3148_v21  ;;  %v2836_v32 = vpop.f32.mrf.mxu0  ;;  %v3120_v60 = vadd.f32 %v3119_v18, %v3118_v55 }
 0x3b1   :  { %v3083_v50 = vmul.f32 %v3000_v38, %v2836_v32  ;;  %v3158_v12 = vsel %vm163_vm0, %v3084_v2, 0.0  ;;  %v3136_v38 = vadd.f32 %v3135_v25, %v3134_v57  ;;  %v3129_v32 = vadd.f32 %v3128_v33, %v3127_v52 }
 0x3b2   :  { %v3151_v23 = vrot.slane %v3150_v24, 4  ;;  %v3795_v11 = vpop.f32.mrf.mxu0  ;;  %v3144_v10 = vrot.slane %v3143_v14, 2 }
 0x3b3   :  { %v3157_v53 = vsel %vm163_vm0, %v3083_v50, 0.0  ;;  %v3086_v44 = vmul.f32 %v3795_v11, %v3006_v22  ;;  %v3137_v15 = vrot.slane %v3136_v38, 1 }
 0x3b4   :  { %v3152_v54 = vadd.f32 %v3151_v23, %v3150_v24  ;;  %v3159_v61 = vadd.f32 %v3158_v12, %v3157_v53  ;;  %v2846_v59 = vpop.f32.mrf.mxu0  ;;  %v3145_v5 = vadd.f32 %v3144_v10, %v3143_v14  ;;  %v3111_v24 = vadd.f32 %v3110_v62, %v3109_v35 }
 0x3b5   :  { %v3085_v4 = vmul.f32 %v3004_v28, %v2846_v59  ;;  %v3167_v39 = vsel %vm163_vm0, %v3086_v44, 0.0  ;;  %v3138_v63 = vadd.f32 %v3137_v15, %v3136_v38 }
 0x3b6   :  { %v3153_v13 = vrot.slane %v3152_v54, 2  ;;  %v3160_v36 = vrot.slane %v3159_v61, 4  ;;  %v3798_v1 = vpop.f32.mrf.mxu0  ;;  %v3146_v22 = vrot.slane %v3145_v5, 1  ;;  %v3263_v44 = vsel %vm892_vm1, %v3120_v60, %v3111_v24 }
 0x3b7   :  { %v3166_v7 = vsel %vm163_vm0, %v3085_v4, 0.0  ;;  %v3088_v16 = vmul.f32 %v3798_v1, %v3010_v45  ;;  %v3264_v59 = vsel %vm895_vm2, %v3129_v32, %v3263_v44 }
 0x3b8   :  { %v3154_v41 = vadd.f32 %v3153_v13, %v3152_v54  ;;  %v3161_v29 = vadd.f32 %v3160_v36, %v3159_v61  ;;  %v3168_v43 = vadd.f32 %v3167_v39, %v3166_v7  ;;  %v2856_v56 = vpop.f32.mrf.mxu0  ;;  %v3147_v11 = vadd.f32 %v3146_v22, %v3145_v5  ;;  %v2936_v7 = vpop.permute.xlu0 %2935 }
 0x3b9   :  { %v3087_v28 = vmul.f32 %v3008_v17, %v2856_v56  ;;  %v3176_v48 = vsel %vm163_vm0, %v3088_v16, 0.0  ;;  %v3265_v4 = vsel %vm898_vm3, %v3138_v63, %v3264_v59  ;;  %v2941_v56 = vmul.f32 %v2936_v7, %v5294_v6 }
 0x3ba   :  { %v3162_v20 = vrot.slane %v3161_v29, 2  ;;  %v3169_v42 = vrot.slane %v3168_v43, 4  ;;  %v3801_v27 = vpop.f32.mrf.mxu0  ;;  %v3155_v58 = vrot.slane %v3154_v41, 1  ;;  %v3266_v1 = vsel %vm901_vm4, %v3147_v11, %v3265_v4 }
 0x3bb   :  { %v3175_v57 = vsel %vm163_vm0, %v3087_v28, 0.0  ;;  %v3090_v9 = vmul.f32 %v3801_v27, %v3014_v26 }
 0x3bc   :  { %v3163_v51 = vadd.f32 %v3162_v20, %v3161_v29  ;;  %v3170_v21 = vadd.f32 %v3169_v42, %v3168_v43  ;;  %v3177_v2 = vadd.f32 %v3176_v48, %v3175_v57  ;;  %v2866_v14 = vpop.f32.mrf.mxu0  ;;  %v3156_v45 = vadd.f32 %v3155_v58, %v3154_v41 }
 0x3bd   :  { %v3089_v17 = vmul.f32 %v3012_v8, %v2866_v14  ;;  %v3185_v10 = vsel %vm163_vm0, %v3090_v9, 0.0 }
 0x3be   :  { %v3164_v50 = vrot.slane %v3163_v51, 1  ;;  %v3171_v55 = vrot.slane %v3170_v21, 2  ;;  %v3178_v25 = vrot.slane %v3177_v2, 4  ;;  %v3804_v23 = vpop.f32.mrf.mxu0 }
 0x3bf   :  { %v3184_v12 = vsel %vm163_vm0, %v3089_v17, 0.0  ;;  %v3092_v53 = vmul.f32 %v3804_v23, %v5278_v3 }
 0x3c0   :  { %v3172_v54 = vadd.f32 %v3171_v55, %v3170_v21  ;;  %v3186_v61 = vadd.f32 %v3185_v10, %v3184_v12  ;;  %v2876_v8 = vpop.f32.mrf.mxu0  ;;  %v3165_v35 = vadd.f32 %v3164_v50, %v3163_v51  ;;  %v3179_v38 = vadd.f32 %v3178_v25, %v3177_v2 }
 0x3c1   :  { %v3091_v52 = vmul.f32 %v5280_v49, %v2876_v8  ;;  %v3194_v3 = vsel %vm163_vm0, %v3092_v53, 0.0  ;;  %v3267_v49 = vsel %vm904_vm5, %v3156_v45, %v3266_v1 }
 0x3c2   :  { %v3173_v18 = vrot.slane %v3172_v54, 1  ;;  %v3187_v13 = vrot.slane %v3186_v61, 4  ;;  %v3807_v36 = vpop.f32.mrf.mxu0  ;;  %v3268_v33 = vsel %vm907_vm6, %v3165_v35, %v3267_v49  ;;  %v3180_v28 = vrot.slane %v3179_v38, 2 }
 0x3c3   :  { %v3193_v5 = vsel %vm163_vm0, %v3091_v52, 0.0  ;;  %v3094_v39 = vmul.f32 %v3807_v36, %v5284_v40 }
 0x3c4   :  { %v3174_v16 = vadd.f32 %v3173_v18, %v3172_v54  ;;  %v3188_v41 = vadd.f32 %v3187_v13, %v3186_v61  ;;  %v3195_v29 = vadd.f32 %v3194_v3, %v3193_v5  ;;  %v2886_v43 = vpop.f32.mrf.mxu0  ;;  %v3181_v58 = vadd.f32 %v3180_v28, %v3179_v38 }
 0x3c5   :  { %v3093_v62 = vmul.f32 %v5282_v19, %v2886_v43  ;;  %v3203_v40 = vsel %vm163_vm0, %v3094_v39, 0.0 }
 0x3c6   :  { %v3189_v26 = vrot.slane %v3188_v41, 2  ;;  %v3196_v60 = vrot.slane %v3195_v29, 4  ;;  %v3810_v15 = vpop.f32.mrf.mxu0  ;;  %v3269_v20 = vsel %vm910_vm7, %v3174_v16, %v3268_v33  ;;  %v3182_v23 = vrot.slane %v3181_v58, 1 }
 0x3c7   :  { %v3202_v42 = vsel %vm163_vm0, %v3093_v62, 0.0  ;;  %v3096_v27 = vmul.f32 %v3810_v15, %v5288_v0  ;;  %v3279_v22 = vadd.f32 %v3269_v20, %v2941_v56  ;;  %v3034_v0 = vpop.permute.xlu1 %3033 }
 0x3c8   :  { %v3190_v48 = vadd.f32 %v3189_v26, %v3188_v41  ;;  %v3197_v57 = vadd.f32 %v3196_v60, %v3195_v29  ;;  %v3204_v6 = vadd.f32 %v3203_v40, %v3202_v42  ;;  %v2896_v9 = vpop.f32.mrf.mxu0 }
 0x3c9   :  { %v3095_v19 = vmul.f32 %v5286_v34, %v2896_v9  ;;  %3828 = vmatprep.mubr.msk.f32.mxu1 %vm163_vm0, %v3279_v22  ;;  %v3212_v14 = vsel %vm163_vm0, %v3096_v27, 0.0 }
 0x3ca   :  { %v3198_v51 = vrot.slane %v3197_v57, 2  ;;  %v3205_v21 = vrot.slane %v3204_v6, 4  ;;  %v3813_v2 = vpop.f32.mrf.mxu0  ;;  %v3191_v17 = vrot.slane %v3190_v48, 1 }
 0x3cb   :  { %v3211_v24 = vsel %vm163_vm0, %v3095_v19, 0.0  ;;  %v3098_v32 = vmul.f32 %v3813_v2, %v5296_v31  ;;  %v3038_v18 = vpop.permute.xlu1 %3037 }
 0x3cc   :  { %v3199_v63 = vadd.f32 %v3198_v51, %v3197_v57  ;;  %v3206_v50 = vadd.f32 %v3205_v21, %v3204_v6  ;;  %v3213_v55 = vadd.f32 %v3212_v14, %v3211_v24  ;;  %v2906_v25 = vpop.f32.mrf.mxu0  ;;  %v3192_v61 = vadd.f32 %v3191_v17, %v3190_v48 }
 0x3cd   :  { %v3097_v34 = vmul.f32 %v5290_v47, %v2906_v25  ;;  %v3221_v44 = vsel %vm163_vm0, %v3098_v32, 0.0  ;;  %v3183_v47 = vadd.f32 %v3182_v23, %v3181_v58  ;;  %v3502_v25 = vld [vmem:[%s5380_s9] ss:$0 sm:$0xff] }
 0x3ce   :  { %v3200_v11 = vrot.slane %v3199_v63, 1  ;;  %v3207_v10 = vrot.slane %v3206_v50, 2  ;;  %v3214_v12 = vrot.slane %v3213_v55, 4  ;;  %v3816_v53 = vpop.f32.mrf.mxu0 }
 0x3cf   :  { %v3220_v45 = vsel %vm163_vm0, %v3097_v34, 0.0  ;;  %v3100_v54 = vmul.f32 %v3816_v53, %v3034_v0  ;;  %v3270_v7 = vsel %vm892_vm1, %v3192_v61, %v3183_v47  ;;  %v2938_v24 = vpop.permute.xlu1 %2937 }
 0x3d0   :  { %v3208_v31 = vadd.f32 %v3207_v10, %v3206_v50  ;;  %v3215_v8 = vadd.f32 %v3214_v12, %v3213_v55  ;;  %v3222_v59 = vadd.f32 %v3221_v44, %v3220_v45  ;;  %v2916_v35 = vpop.f32.mrf.mxu0  ;;  %v3201_v52 = vadd.f32 %v3200_v11, %v3199_v63 }
 0x3d1   :  { %v3099_v4 = vmul.f32 %v5314_v37, %v2916_v35  ;;  %v3230_v3 = vsel %vm163_vm0, %v3100_v54, 0.0  ;;  %v2942_v17 = vmul.f32 %v5292_v46, %v2938_v24 }
 0x3d2   :  { %v3209_v38 = vrot.slane %v3208_v31, 1  ;;  %v3223_v13 = vrot.slane %v3222_v59, 4  ;;  %v3819_v36 = vpop.f32.mrf.mxu0  ;;  %v3216_v1 = vrot.slane %v3215_v8, 2  ;;  %v3271_v49 = vsel %vm895_vm2, %v3201_v52, %v3270_v7 }
 0x3d3   :  { %v3229_v5 = vsel %vm163_vm0, %v3099_v4, 0.0  ;;  %v3102_v39 = vmul.f32 %v3819_v36, %v3038_v18 }
 0x3d4   :  { %v3210_v16 = vadd.f32 %v3209_v38, %v3208_v31  ;;  %v3224_v41 = vadd.f32 %v3223_v13, %v3222_v59  ;;  %v3231_v29 = vadd.f32 %v3230_v3, %v3229_v5  ;;  %v2926_v43 = vpop.f32.mrf.mxu0  ;;  %v3217_v28 = vadd.f32 %v3216_v1, %v3215_v8 }
 0x3d5   :  { %v3101_v37 = vmul.f32 %v5318_v30, %v2926_v43  ;;  %v3239_v26 = vsel %vm163_vm0, %v3102_v39, 0.0 }
 0x3d6   :  { %v3272_v56 = vsel %vm898_vm3, %v3210_v16, %v3271_v49  ;;  %v3225_v62 = vrot.slane %v3224_v41, 2  ;;  %v3232_v33 = vrot.slane %v3231_v29, 4  ;;  %v3218_v22 = vrot.slane %v3217_v28, 1 }
 0x3d7   :  { %v3238_v60 = vsel %vm163_vm0, %v3101_v37, 0.0 }
 0x3d8   :  { %v3226_v15 = vadd.f32 %v3225_v62, %v3224_v41  ;;  %v3233_v20 = vadd.f32 %v3232_v33, %v3231_v29  ;;  %v3240_v40 = vadd.f32 %v3239_v26, %v3238_v60  ;;  %v3219_v19 = vadd.f32 %v3218_v22, %v3217_v28 }
 0x3da   :  { %v3234_v42 = vrot.slane %v3233_v20, 2  ;;  %v3241_v27 = vrot.slane %v3240_v40, 4  ;;  %v3227_v48 = vrot.slane %v3226_v15, 1  ;;  %v3273_v14 = vsel %vm901_vm4, %v3219_v19, %v3272_v56 }
 0x3dc   :  { %v3235_v57 = vadd.f32 %v3234_v42, %v3233_v20  ;;  %v3242_v6 = vadd.f32 %v3241_v27, %v3240_v40  ;;  %v3228_v58 = vadd.f32 %v3227_v48, %v3226_v15 }
 0x3de   :  { %v3236_v9 = vrot.slane %v3235_v57, 1  ;;  %v3243_v30 = vrot.slane %v3242_v6, 2  ;;  %v3274_v32 = vsel %vm904_vm5, %v3228_v58, %v3273_v14 }
 0x3e0   :  { %v3244_v51 = vadd.f32 %v3243_v30, %v3242_v6  ;;  %v3237_v21 = vadd.f32 %v3236_v9, %v3235_v57 }
 0x3e2   :  { %v3245_v2 = vrot.slane %v3244_v51, 1  ;;  %v3275_v63 = vsel %vm907_vm6, %v3237_v21, %v3274_v32 }
 0x3e4   :  { %v3246_v0 = vadd.f32 %v3245_v2, %v3244_v51 }
 0x3e6   :  { %v3276_v50 = vsel %vm910_vm7, %v3246_v0, %v3275_v63 }
 0x3e7   :  { %v3280_v55 = vadd.f32 %v3276_v50, %v2942_v17 }
 0x3e9   :  { %3829 = vmatmul.mubr.msk.f32.vlgmr.msra.gmra.mxu1 %vm163_vm0, %v3280_v55 }
 0x4a9   :  { %v3830_v34 = vpop.f32.mrf.mxu1 }
 0x4aa   :  { %v3370_v23 = vadd.f32 %v3830_v34, %v3502_v25 }
 0x4ab   :  { %v3364_v11 = vpop.f32.mrf.mxu1 }
 0x4ac   :  { %3374 = vst [vmem:[#allocation10 + $0x8] sm:$0xff] %v3370_v23  ;;  %v3365_v10 = vadd.f32 %v3502_v25, %v3364_v11 }
 0x4ae   :  { %3373 = vst [vmem:[#allocation10] sm:$0xff] %v3365_v10 }
 0x4af   :  { %4011 = shalt.err (!%p4008_p10)
}
 0x4b0   :  { %3386 = dma.vmem_to_hbm [thread:$0]  %s3381_s24, 256, %s5383_s12, [#allocation4], %s4030_s26, %s4030_s26, %s4031_s27  }
 0x4b1   :  { %4026 = dma.done.wait [#allocation4], 256  }
 0x4b2   :  { %4027 = vsyncadd [#allocation4], 4294967040 }
 0x4b3   :  { %3390 = vsyncpa [#allocation3], 1 }
 0x4b4   :  { %3391 = vsyncpa [#allocation6], 1 }
 0x4b5   :  { %3392 = vsyncpa [#allocation9], 1 }
 0x4b6   :  { %3393 = vsyncpa [#allocation4], 1 }

</bundles_post_ra>
